<compile_context>
chip_gen: v7x
topology: tpu7x:2x2x1
jax: 0.10.0
libtpu: 0.0.40
codegen_flags: <defaults>
</compile_context>

<pallas_src>
import jax
import jax.numpy as jnp
from jax.experimental import pallas as pl
from jax.experimental.pallas import tpu as pltpu

# ---------------- configuration (faithful to module defaults) --------------
BATCH = 8
INPUT_DIM = 32
HIDDEN = 128          # hidden_dim default
NUM_LAYERS = 2        # num_layers default
NUM_HEADS = 4         # nhead=4
HEAD_DIM = HIDDEN // NUM_HEADS
FFN = 2048            # PyTorch TransformerEncoderLayer default dim_feedforward
NUM_CLASSES = 2
LN_EPS = 1e-5

PAD_OUT = 128         # classifier output padded to lane width


# ---------------------------- Pallas kernel --------------------------------
def _layer_norm(y, g, b):
    mu = jnp.mean(y, axis=-1, keepdims=True)
    var = jnp.mean((y - mu) ** 2, axis=-1, keepdims=True)
    return (y - mu) * jax.lax.rsqrt(var + LN_EPS) * g + b


def stacked_transformer_kernel(h0_ref, w_attn_ref, vec_ref, w1_ref, fvec_ref,
                               w2_ref, wfc_ref, bfc_ref, out_ref):
    bf16 = jnp.bfloat16
    f32 = jnp.float32

    h = h0_ref[...]                                    # (B, H) f32

    # Static unroll over layers; every weight is resident in VMEM.
    for l in range(NUM_LAYERS):
        v = vec_ref[l]                                 # (8, H) f32
        b_attn, ln1g, ln1b = v[0:1], v[1:2], v[2:3]
        b2, ln2g, ln2b, s2 = v[3:4], v[4:5], v[5:6], v[6:7]
        fv = fvec_ref[l]                               # (2, FFN) f32
        b1, s1 = fv[0:1], fv[1:2]

        # --- self attention, seq_len==1 fold: h @ (Wv@Wo) + (bv@Wo + bo) ----
        attn = jnp.dot(h.astype(bf16), w_attn_ref[l],
                       preferred_element_type=f32) + b_attn
        # residual + post-LayerNorm (dropout identity in eval mode)
        h = _layer_norm(h + attn, ln1g, ln1b)

        # --- feed forward (ReLU); int8 weights dequantized on the VPU -------
        # int8 values are exactly representable in bf16 (|q| <= 127); the
        # per-output-channel scale is applied to the small f32 accumulator,
        # so (h @ q) * s + b == h @ (q * s) + b exactly.
        w1 = w1_ref[l].astype(f32).astype(bf16)        # (H, FFN) VPU convert
        ff = jnp.dot(h.astype(bf16), w1, preferred_element_type=f32)
        ff = jnp.maximum(ff * s1 + b1, 0.0)
        w2 = w2_ref[l].astype(f32).astype(bf16)        # (FFN, H) VPU convert
        ff = jnp.dot(ff.astype(bf16), w2, preferred_element_type=f32)
        ff = ff * s2 + b2
        h = _layer_norm(h + ff, ln2g, ln2b)

    # --- classifier head (lane-dense 128-wide, sliced back in the wrapper) --
    out_ref[...] = jnp.dot(h.astype(bf16), wfc_ref[...],
                           preferred_element_type=f32) + bfc_ref[...]


# ------------------------------ wrapper -------------------------------------
@jax.jit
def stacked_transformer_forward(x, kparams):
    (w_in, b_in, w_attn, vecs, w1_q, ffn_vecs, w2_q, w_fc_p, b_fc_p) = kparams
    B = x.shape[0]

    # Input projection in XLA (trivially cheap, off the kernel's DMA path).
    h0 = (x @ w_in + b_in).astype(jnp.float32)         # (B, HIDDEN)

    vmem = pl.BlockSpec(memory_space=pltpu.MemorySpace.VMEM)

    out_pad = pl.pallas_call(
        stacked_transformer_kernel,
        out_shape=jax.ShapeDtypeStruct((B, PAD_OUT), jnp.float32),
        in_specs=[vmem] * 8,
        out_specs=vmem,
        compiler_params=pltpu.CompilerParams(
            vmem_limit_bytes=32 * 1024 * 1024),
    )(h0, w_attn, vecs, w1_q, ffn_vecs, w2_q, w_fc_p, b_fc_p)

    return out_pad[:, :NUM_CLASSES]


# ------------------------- parameter construction ---------------------------
def make_params(key):
    """Module-style (PyTorch-equivalent) f32 parameters."""
    ks = jax.random.split(key, 16)

    def w(k, shape, scale=0.05):
        return (scale * jax.random.normal(k, shape)).astype(jnp.float32)

    w_in = w(ks[0], (INPUT_DIM, HIDDEN))
    b_in = w(ks[1], (1, HIDDEN))

    wqkv = w(ks[2], (NUM_LAYERS, HIDDEN, 3 * HIDDEN))
    bqkv = w(ks[3], (NUM_LAYERS, 1, 3 * HIDDEN))
    wo = w(ks[4], (NUM_LAYERS, HIDDEN, HIDDEN))
    bo = w(ks[5], (NUM_LAYERS, 1, HIDDEN))
    ln1g = jnp.ones((NUM_LAYERS, 1, HIDDEN), jnp.float32)
    ln1b = jnp.zeros((NUM_LAYERS, 1, HIDDEN), jnp.float32)
    w1 = w(ks[6], (NUM_LAYERS, HIDDEN, FFN))
    b1 = w(ks[7], (NUM_LAYERS, 1, FFN))
    w2 = w(ks[8], (NUM_LAYERS, FFN, HIDDEN))
    b2 = w(ks[9], (NUM_LAYERS, 1, HIDDEN))
    ln2g = jnp.ones((NUM_LAYERS, 1, HIDDEN), jnp.float32)
    ln2b = jnp.zeros((NUM_LAYERS, 1, HIDDEN), jnp.float32)

    w_fc = w(ks[10], (HIDDEN, NUM_CLASSES))
    b_fc = w(ks[11], (1, NUM_CLASSES))

    return (w_in, b_in, wqkv, bqkv, wo, bo, ln1g, ln1b,
            w1, b1, w2, b2, ln2g, ln2b, w_fc, b_fc)


def _quantize_per_channel(w):
    """Symmetric int8 quantization with one f32 scale per output channel
    (last axis).  w: (L, K, N) f32 -> (q int8 (L,K,N), scale f32 (L,1,N))."""
    amax = jnp.max(jnp.abs(w), axis=-2, keepdims=True)
    scale = jnp.where(amax > 0, amax / 127.0, 1.0)
    q = jnp.clip(jnp.round(w / scale), -127, 127).astype(jnp.int8)
    return q, scale.astype(jnp.float32)


def prepare_kernel_params(params):
    """Offline folding / quantization / padding for the kernel (done once)."""
    (w_in, b_in, wqkv, bqkv, wo, bo, ln1g, ln1b,
     w1, b1, w2, b2, ln2g, ln2b, w_fc, b_fc) = params
    bf16 = jnp.bfloat16

    # fold attention (ONLY valid because seq_len == 1, eval mode):
    #   (h @ Wv + bv) @ Wo + bo == h @ (Wv@Wo) + (bv@Wo + bo)
    w_v = wqkv[:, :, 2 * HIDDEN:3 * HIDDEN]                     # (L, H, H)
    b_v = bqkv[:, :, 2 * HIDDEN:3 * HIDDEN]                     # (L, 1, H)
    w_attn = jnp.einsum('lij,ljk->lik', w_v, wo).astype(bf16)   # (L, H, H)
    b_attn = jnp.einsum('lij,ljk->lik', b_v, wo) + bo           # (L, 1, H)

    # int8 per-output-channel FFN weights + f32 scales (half the HBM bytes)
    w1_q, s1 = _quantize_per_channel(w1)                        # (L,H,FFN), (L,1,FFN)
    w2_q, s2 = _quantize_per_channel(w2)                        # (L,FFN,H), (L,1,H)

    # consolidated per-layer vectors -> one (L, 8, H) DMA
    vecs = jnp.concatenate(
        [b_attn, ln1g, ln1b, b2, ln2g, ln2b, s2,
         jnp.zeros((NUM_LAYERS, 1, HIDDEN), jnp.float32)], axis=1)
    ffn_vecs = jnp.concatenate([b1, s1], axis=1)                # (L, 2, FFN)

    # lane-dense classifier head (zero-padded to 128 output lanes)
    w_fc_p = (jnp.zeros((HIDDEN, PAD_OUT), jnp.float32)
              .at[:, :NUM_CLASSES].set(w_fc).astype(bf16))
    b_fc_p = jnp.zeros((1, PAD_OUT), jnp.float32).at[:, :NUM_CLASSES].set(b_fc)

    return (w_in, b_in, w_attn, vecs, w1_q, ffn_vecs, w2_q, w_fc_p, b_fc_p)


# ------------------- pure-JAX reference (full f32 MHA path) -----------------
def reference_forward(x, params):
    (w_in, b_in, wqkv, bqkv, wo, bo, ln1g, ln1b,
     w1, b1, w2, b2, ln2g, ln2b, w_fc, b_fc) = params

    def ln(y, g, b):
        mu = jnp.mean(y, axis=-1, keepdims=True)
        var = jnp.mean((y - mu) ** 2, axis=-1, keepdims=True)
        return (y - mu) / jnp.sqrt(var + LN_EPS) * g + b

    h = x @ w_in + b_in  # (B, H); seq dim of length 1 is implicit
    B = h.shape[0]
    for l in range(NUM_LAYERS):
        qkv = h @ wqkv[l] + bqkv[l]
        q, k, v = jnp.split(qkv, 3, axis=-1)
        qh = q.reshape(B, NUM_HEADS, HEAD_DIM)
        kh = k.reshape(B, NUM_HEADS, HEAD_DIM)
        vh = v.reshape(B, NUM_HEADS, HEAD_DIM)
        # scores over the (single-element) key axis
        scores = jnp.sum(qh * kh, axis=-1, keepdims=True) / jnp.sqrt(HEAD_DIM)
        p = jax.nn.softmax(scores, axis=-1)          # == 1.0
        attn = (p * vh).reshape(B, HIDDEN)
        attn = attn @ wo[l] + bo[l]
        h = ln(h + attn, ln1g[l], ln1b[l])
        ff = jax.nn.relu(h @ w1[l] + b1[l]) @ w2[l] + b2[l]
        h = ln(h + ff, ln2g[l], ln2b[l])
    return h @ w_fc + b_fc


# ----------------------------------- main ------------------------------------
if __name__ == "__main__":
    key = jax.random.PRNGKey(0)
    kx, kp = jax.random.split(key)
    x = jax.random.normal(kx, (BATCH, INPUT_DIM), dtype=jnp.float32)
    params = make_params(kp)
    kparams = prepare_kernel_params(params)

    out = stacked_transformer_forward(x, kparams)
    out = jax.block_until_ready(out)

    ref = reference_forward(x, params)
    assert out.shape == (BATCH, NUM_CLASSES)
    max_err = jnp.max(jnp.abs(out - ref))
    # int8 (per-channel) FFN weights + bf16 matmul inputs vs f32 reference
    assert jnp.allclose(out, ref, atol=5e-2, rtol=5e-2), f"max err {max_err}"

    print("KERNEL_OK")
</pallas_src>

<mosaic_0001>
module attributes {stable_mosaic.version = 11 : i64} {
  func.func @stacked_transformer_kernel(%arg0: memref<8x128xf32, #tpu.memory_space<vmem>>, %arg1: memref<2x128x128xbf16, #tpu.memory_space<vmem>>, %arg2: memref<2x8x128xf32, #tpu.memory_space<vmem>>, %arg3: memref<2x128x2048xi8, #tpu.memory_space<vmem>>, %arg4: memref<2x2x2048xf32, #tpu.memory_space<vmem>>, %arg5: memref<2x2048x128xi8, #tpu.memory_space<vmem>>, %arg6: memref<128x128xbf16, #tpu.memory_space<vmem>>, %arg7: memref<1x128xf32, #tpu.memory_space<vmem>>, %arg8: memref<8x128xf32, #tpu.memory_space<vmem>>) attributes {dimension_semantics = [], scalar_prefetch = 0 : i64, scratch_operands = 0 : i64, tpu.core_type = #tpu.core_type<tc>} {
    %c0 = arith.constant 0 : index
    %c0_0 = arith.constant 0 : index
    %0 = vector.load %arg0[%c0, %c0_0] : memref<8x128xf32, #tpu.memory_space<vmem>>, vector<8x128xf32>
    %c0_1 = arith.constant 0 : index
    %c0_2 = arith.constant 0 : index
    %c0_3 = arith.constant 0 : index
    %1 = vector.load %arg2[%c0_1, %c0_2, %c0_3] : memref<2x8x128xf32, #tpu.memory_space<vmem>>, vector<1x8x128xf32>
    %2 = vector.shape_cast %1 : vector<1x8x128xf32> to vector<8x128xf32>
    %3 = vector.extract_strided_slice %2 {offsets = [0, 0], sizes = [1, 128], strides = [1, 1]} : vector<8x128xf32> to vector<1x128xf32>
    %4 = vector.extract_strided_slice %2 {offsets = [1, 0], sizes = [1, 128], strides = [1, 1]} : vector<8x128xf32> to vector<1x128xf32>
    %5 = vector.extract_strided_slice %2 {offsets = [2, 0], sizes = [1, 128], strides = [1, 1]} : vector<8x128xf32> to vector<1x128xf32>
    %6 = vector.extract_strided_slice %2 {offsets = [3, 0], sizes = [1, 128], strides = [1, 1]} : vector<8x128xf32> to vector<1x128xf32>
    %7 = vector.extract_strided_slice %2 {offsets = [4, 0], sizes = [1, 128], strides = [1, 1]} : vector<8x128xf32> to vector<1x128xf32>
    %8 = vector.extract_strided_slice %2 {offsets = [5, 0], sizes = [1, 128], strides = [1, 1]} : vector<8x128xf32> to vector<1x128xf32>
    %9 = vector.extract_strided_slice %2 {offsets = [6, 0], sizes = [1, 128], strides = [1, 1]} : vector<8x128xf32> to vector<1x128xf32>
    %c0_4 = arith.constant 0 : index
    %c0_5 = arith.constant 0 : index
    %c0_6 = arith.constant 0 : index
    %10 = vector.load %arg4[%c0_4, %c0_5, %c0_6] : memref<2x2x2048xf32, #tpu.memory_space<vmem>>, vector<1x2x2048xf32>
    %11 = vector.shape_cast %10 : vector<1x2x2048xf32> to vector<2x2048xf32>
    %12 = vector.extract_strided_slice %11 {offsets = [0, 0], sizes = [1, 2048], strides = [1, 1]} : vector<2x2048xf32> to vector<1x2048xf32>
    %13 = vector.extract_strided_slice %11 {offsets = [1, 0], sizes = [1, 2048], strides = [1, 1]} : vector<2x2048xf32> to vector<1x2048xf32>
    %14 = arith.truncf %0 : vector<8x128xf32> to vector<8x128xbf16>
    %c0_7 = arith.constant 0 : index
    %c0_8 = arith.constant 0 : index
    %c0_9 = arith.constant 0 : index
    %15 = vector.load %arg1[%c0_7, %c0_8, %c0_9] : memref<2x128x128xbf16, #tpu.memory_space<vmem>>, vector<1x128x128xbf16>
    %16 = vector.shape_cast %15 : vector<1x128x128xbf16> to vector<128x128xbf16>
    %cst = arith.constant dense<0.000000e+00> : vector<8x128xf32>
    %17 = tpu.matmul %14, %16, %cst {dimension_numbers = #tpu.dot_dimension_numbers<[1], [0], [0], [1], [0, 0, 1, 1], [], []>} : vector<8x128xbf16>, vector<128x128xbf16>, vector<8x128xf32> -> vector<8x128xf32>
    %18 = vector.broadcast %3 : vector<1x128xf32> to vector<8x128xf32>
    %19 = arith.addf %17, %18 : vector<8x128xf32>
    %20 = arith.addf %0, %19 : vector<8x128xf32>
    %cst_10 = arith.constant dense<0.000000e+00> : vector<8xf32>
    %21 = vector.multi_reduction <add>, %20, %cst_10 [1] : vector<8x128xf32> to vector<8xf32>
    %22 = vector.shape_cast %21 : vector<8xf32> to vector<8x1xf32>
    %cst_11 = arith.constant 1.280000e+02 : f32
    %23 = vector.broadcast %cst_11 : f32 to vector<8x1xf32>
    %24 = arith.divf %22, %23 : vector<8x1xf32>
    %25 = vector.broadcast %24 : vector<8x1xf32> to vector<8x128xf32>
    %26 = arith.subf %20, %25 : vector<8x128xf32>
    %27 = arith.mulf %26, %26 : vector<8x128xf32>
    %cst_12 = arith.constant dense<0.000000e+00> : vector<8xf32>
    %28 = vector.multi_reduction <add>, %27, %cst_12 [1] : vector<8x128xf32> to vector<8xf32>
    %29 = vector.shape_cast %28 : vector<8xf32> to vector<8x1xf32>
    %cst_13 = arith.constant 1.280000e+02 : f32
    %30 = vector.broadcast %cst_13 : f32 to vector<8x1xf32>
    %31 = arith.divf %29, %30 : vector<8x1xf32>
    %32 = vector.broadcast %24 : vector<8x1xf32> to vector<8x128xf32>
    %33 = arith.subf %20, %32 : vector<8x128xf32>
    %cst_14 = arith.constant 9.99999974E-6 : f32
    %34 = vector.broadcast %cst_14 : f32 to vector<8x1xf32>
    %35 = arith.addf %31, %34 : vector<8x1xf32>
    %36 = math.rsqrt %35 : vector<8x1xf32>
    %37 = vector.broadcast %36 : vector<8x1xf32> to vector<8x128xf32>
    %38 = arith.mulf %33, %37 : vector<8x128xf32>
    %39 = vector.broadcast %4 : vector<1x128xf32> to vector<8x128xf32>
    %40 = arith.mulf %38, %39 : vector<8x128xf32>
    %41 = vector.broadcast %5 : vector<1x128xf32> to vector<8x128xf32>
    %42 = arith.addf %40, %41 : vector<8x128xf32>
    %c0_15 = arith.constant 0 : index
    %c0_16 = arith.constant 0 : index
    %c0_17 = arith.constant 0 : index
    %43 = vector.load %arg3[%c0_15, %c0_16, %c0_17] : memref<2x128x2048xi8, #tpu.memory_space<vmem>>, vector<1x128x2048xi8>
    %44 = vector.shape_cast %43 : vector<1x128x2048xi8> to vector<128x2048xi8>
    %45 = arith.sitofp %44 : vector<128x2048xi8> to vector<128x2048xf32>
    %46 = arith.truncf %45 : vector<128x2048xf32> to vector<128x2048xbf16>
    %47 = arith.truncf %42 : vector<8x128xf32> to vector<8x128xbf16>
    %cst_18 = arith.constant dense<0.000000e+00> : vector<8x2048xf32>
    %48 = tpu.matmul %47, %46, %cst_18 {dimension_numbers = #tpu.dot_dimension_numbers<[1], [0], [0], [1], [0, 0, 1, 1], [], []>} : vector<8x128xbf16>, vector<128x2048xbf16>, vector<8x2048xf32> -> vector<8x2048xf32>
    %49 = vector.broadcast %13 : vector<1x2048xf32> to vector<8x2048xf32>
    %50 = arith.mulf %48, %49 : vector<8x2048xf32>
    %51 = vector.broadcast %12 : vector<1x2048xf32> to vector<8x2048xf32>
    %52 = arith.addf %50, %51 : vector<8x2048xf32>
    %cst_19 = arith.constant 0.000000e+00 : f32
    %53 = vector.broadcast %cst_19 : f32 to vector<8x2048xf32>
    %54 = arith.maximumf %52, %53 : vector<8x2048xf32>
    %c0_20 = arith.constant 0 : index
    %c0_21 = arith.constant 0 : index
    %c0_22 = arith.constant 0 : index
    %55 = vector.load %arg5[%c0_20, %c0_21, %c0_22] : memref<2x2048x128xi8, #tpu.memory_space<vmem>>, vector<1x2048x128xi8>
    %56 = vector.shape_cast %55 : vector<1x2048x128xi8> to vector<2048x128xi8>
    %57 = arith.sitofp %56 : vector<2048x128xi8> to vector<2048x128xf32>
    %58 = arith.truncf %57 : vector<2048x128xf32> to vector<2048x128xbf16>
    %59 = arith.truncf %54 : vector<8x2048xf32> to vector<8x2048xbf16>
    %cst_23 = arith.constant dense<0.000000e+00> : vector<8x128xf32>
    %60 = tpu.matmul %59, %58, %cst_23 {dimension_numbers = #tpu.dot_dimension_numbers<[1], [0], [0], [1], [0, 0, 1, 1], [], []>} : vector<8x2048xbf16>, vector<2048x128xbf16>, vector<8x128xf32> -> vector<8x128xf32>
    %61 = vector.broadcast %9 : vector<1x128xf32> to vector<8x128xf32>
    %62 = arith.mulf %60, %61 : vector<8x128xf32>
    %63 = vector.broadcast %6 : vector<1x128xf32> to vector<8x128xf32>
    %64 = arith.addf %62, %63 : vector<8x128xf32>
    %65 = arith.addf %42, %64 : vector<8x128xf32>
    %cst_24 = arith.constant dense<0.000000e+00> : vector<8xf32>
    %66 = vector.multi_reduction <add>, %65, %cst_24 [1] : vector<8x128xf32> to vector<8xf32>
    %67 = vector.shape_cast %66 : vector<8xf32> to vector<8x1xf32>
    %cst_25 = arith.constant 1.280000e+02 : f32
    %68 = vector.broadcast %cst_25 : f32 to vector<8x1xf32>
    %69 = arith.divf %67, %68 : vector<8x1xf32>
    %70 = vector.broadcast %69 : vector<8x1xf32> to vector<8x128xf32>
    %71 = arith.subf %65, %70 : vector<8x128xf32>
    %72 = arith.mulf %71, %71 : vector<8x128xf32>
    %cst_26 = arith.constant dense<0.000000e+00> : vector<8xf32>
    %73 = vector.multi_reduction <add>, %72, %cst_26 [1] : vector<8x128xf32> to vector<8xf32>
    %74 = vector.shape_cast %73 : vector<8xf32> to vector<8x1xf32>
    %cst_27 = arith.constant 1.280000e+02 : f32
    %75 = vector.broadcast %cst_27 : f32 to vector<8x1xf32>
    %76 = arith.divf %74, %75 : vector<8x1xf32>
    %77 = vector.broadcast %69 : vector<8x1xf32> to vector<8x128xf32>
    %78 = arith.subf %65, %77 : vector<8x128xf32>
    %cst_28 = arith.constant 9.99999974E-6 : f32
    %79 = vector.broadcast %cst_28 : f32 to vector<8x1xf32>
    %80 = arith.addf %76, %79 : vector<8x1xf32>
    %81 = math.rsqrt %80 : vector<8x1xf32>
    %82 = vector.broadcast %81 : vector<8x1xf32> to vector<8x128xf32>
    %83 = arith.mulf %78, %82 : vector<8x128xf32>
    %84 = vector.broadcast %7 : vector<1x128xf32> to vector<8x128xf32>
    %85 = arith.mulf %83, %84 : vector<8x128xf32>
    %86 = vector.broadcast %8 : vector<1x128xf32> to vector<8x128xf32>
    %87 = arith.addf %85, %86 : vector<8x128xf32>
    %c1 = arith.constant 1 : index
    %c0_29 = arith.constant 0 : index
    %c0_30 = arith.constant 0 : index
    %88 = vector.load %arg2[%c1, %c0_29, %c0_30] : memref<2x8x128xf32, #tpu.memory_space<vmem>>, vector<1x8x128xf32>
    %89 = vector.shape_cast %88 : vector<1x8x128xf32> to vector<8x128xf32>
    %90 = vector.extract_strided_slice %89 {offsets = [0, 0], sizes = [1, 128], strides = [1, 1]} : vector<8x128xf32> to vector<1x128xf32>
    %91 = vector.extract_strided_slice %89 {offsets = [1, 0], sizes = [1, 128], strides = [1, 1]} : vector<8x128xf32> to vector<1x128xf32>
    %92 = vector.extract_strided_slice %89 {offsets = [2, 0], sizes = [1, 128], strides = [1, 1]} : vector<8x128xf32> to vector<1x128xf32>
    %93 = vector.extract_strided_slice %89 {offsets = [3, 0], sizes = [1, 128], strides = [1, 1]} : vector<8x128xf32> to vector<1x128xf32>
    %94 = vector.extract_strided_slice %89 {offsets = [4, 0], sizes = [1, 128], strides = [1, 1]} : vector<8x128xf32> to vector<1x128xf32>
    %95 = vector.extract_strided_slice %89 {offsets = [5, 0], sizes = [1, 128], strides = [1, 1]} : vector<8x128xf32> to vector<1x128xf32>
    %96 = vector.extract_strided_slice %89 {offsets = [6, 0], sizes = [1, 128], strides = [1, 1]} : vector<8x128xf32> to vector<1x128xf32>
    %c1_31 = arith.constant 1 : index
    %c0_32 = arith.constant 0 : index
    %c0_33 = arith.constant 0 : index
    %97 = vector.load %arg4[%c1_31, %c0_32, %c0_33] : memref<2x2x2048xf32, #tpu.memory_space<vmem>>, vector<1x2x2048xf32>
    %98 = vector.shape_cast %97 : vector<1x2x2048xf32> to vector<2x2048xf32>
    %99 = vector.extract_strided_slice %98 {offsets = [0, 0], sizes = [1, 2048], strides = [1, 1]} : vector<2x2048xf32> to vector<1x2048xf32>
    %100 = vector.extract_strided_slice %98 {offsets = [1, 0], sizes = [1, 2048], strides = [1, 1]} : vector<2x2048xf32> to vector<1x2048xf32>
    %101 = arith.truncf %87 : vector<8x128xf32> to vector<8x128xbf16>
    %c1_34 = arith.constant 1 : index
    %c0_35 = arith.constant 0 : index
    %c0_36 = arith.constant 0 : index
    %102 = vector.load %arg1[%c1_34, %c0_35, %c0_36] : memref<2x128x128xbf16, #tpu.memory_space<vmem>>, vector<1x128x128xbf16>
    %103 = vector.shape_cast %102 : vector<1x128x128xbf16> to vector<128x128xbf16>
    %cst_37 = arith.constant dense<0.000000e+00> : vector<8x128xf32>
    %104 = tpu.matmul %101, %103, %cst_37 {dimension_numbers = #tpu.dot_dimension_numbers<[1], [0], [0], [1], [0, 0, 1, 1], [], []>} : vector<8x128xbf16>, vector<128x128xbf16>, vector<8x128xf32> -> vector<8x128xf32>
    %105 = vector.broadcast %90 : vector<1x128xf32> to vector<8x128xf32>
    %106 = arith.addf %104, %105 : vector<8x128xf32>
    %107 = arith.addf %87, %106 : vector<8x128xf32>
    %cst_38 = arith.constant dense<0.000000e+00> : vector<8xf32>
    %108 = vector.multi_reduction <add>, %107, %cst_38 [1] : vector<8x128xf32> to vector<8xf32>
    %109 = vector.shape_cast %108 : vector<8xf32> to vector<8x1xf32>
    %cst_39 = arith.constant 1.280000e+02 : f32
    %110 = vector.broadcast %cst_39 : f32 to vector<8x1xf32>
    %111 = arith.divf %109, %110 : vector<8x1xf32>
    %112 = vector.broadcast %111 : vector<8x1xf32> to vector<8x128xf32>
    %113 = arith.subf %107, %112 : vector<8x128xf32>
    %114 = arith.mulf %113, %113 : vector<8x128xf32>
    %cst_40 = arith.constant dense<0.000000e+00> : vector<8xf32>
    %115 = vector.multi_reduction <add>, %114, %cst_40 [1] : vector<8x128xf32> to vector<8xf32>
    %116 = vector.shape_cast %115 : vector<8xf32> to vector<8x1xf32>
    %cst_41 = arith.constant 1.280000e+02 : f32
    %117 = vector.broadcast %cst_41 : f32 to vector<8x1xf32>
    %118 = arith.divf %116, %117 : vector<8x1xf32>
    %119 = vector.broadcast %111 : vector<8x1xf32> to vector<8x128xf32>
    %120 = arith.subf %107, %119 : vector<8x128xf32>
    %cst_42 = arith.constant 9.99999974E-6 : f32
    %121 = vector.broadcast %cst_42 : f32 to vector<8x1xf32>
    %122 = arith.addf %118, %121 : vector<8x1xf32>
    %123 = math.rsqrt %122 : vector<8x1xf32>
    %124 = vector.broadcast %123 : vector<8x1xf32> to vector<8x128xf32>
    %125 = arith.mulf %120, %124 : vector<8x128xf32>
    %126 = vector.broadcast %91 : vector<1x128xf32> to vector<8x128xf32>
    %127 = arith.mulf %125, %126 : vector<8x128xf32>
    %128 = vector.broadcast %92 : vector<1x128xf32> to vector<8x128xf32>
    %129 = arith.addf %127, %128 : vector<8x128xf32>
    %c1_43 = arith.constant 1 : index
    %c0_44 = arith.constant 0 : index
    %c0_45 = arith.constant 0 : index
    %130 = vector.load %arg3[%c1_43, %c0_44, %c0_45] : memref<2x128x2048xi8, #tpu.memory_space<vmem>>, vector<1x128x2048xi8>
    %131 = vector.shape_cast %130 : vector<1x128x2048xi8> to vector<128x2048xi8>
    %132 = arith.sitofp %131 : vector<128x2048xi8> to vector<128x2048xf32>
    %133 = arith.truncf %132 : vector<128x2048xf32> to vector<128x2048xbf16>
    %134 = arith.truncf %129 : vector<8x128xf32> to vector<8x128xbf16>
    %cst_46 = arith.constant dense<0.000000e+00> : vector<8x2048xf32>
    %135 = tpu.matmul %134, %133, %cst_46 {dimension_numbers = #tpu.dot_dimension_numbers<[1], [0], [0], [1], [0, 0, 1, 1], [], []>} : vector<8x128xbf16>, vector<128x2048xbf16>, vector<8x2048xf32> -> vector<8x2048xf32>
    %136 = vector.broadcast %100 : vector<1x2048xf32> to vector<8x2048xf32>
    %137 = arith.mulf %135, %136 : vector<8x2048xf32>
    %138 = vector.broadcast %99 : vector<1x2048xf32> to vector<8x2048xf32>
    %139 = arith.addf %137, %138 : vector<8x2048xf32>
    %cst_47 = arith.constant 0.000000e+00 : f32
    %140 = vector.broadcast %cst_47 : f32 to vector<8x2048xf32>
    %141 = arith.maximumf %139, %140 : vector<8x2048xf32>
    %c1_48 = arith.constant 1 : index
    %c0_49 = arith.constant 0 : index
    %c0_50 = arith.constant 0 : index
    %142 = vector.load %arg5[%c1_48, %c0_49, %c0_50] : memref<2x2048x128xi8, #tpu.memory_space<vmem>>, vector<1x2048x128xi8>
    %143 = vector.shape_cast %142 : vector<1x2048x128xi8> to vector<2048x128xi8>
    %144 = arith.sitofp %143 : vector<2048x128xi8> to vector<2048x128xf32>
    %145 = arith.truncf %144 : vector<2048x128xf32> to vector<2048x128xbf16>
    %146 = arith.truncf %141 : vector<8x2048xf32> to vector<8x2048xbf16>
    %cst_51 = arith.constant dense<0.000000e+00> : vector<8x128xf32>
    %147 = tpu.matmul %146, %145, %cst_51 {dimension_numbers = #tpu.dot_dimension_numbers<[1], [0], [0], [1], [0, 0, 1, 1], [], []>} : vector<8x2048xbf16>, vector<2048x128xbf16>, vector<8x128xf32> -> vector<8x128xf32>
    %148 = vector.broadcast %96 : vector<1x128xf32> to vector<8x128xf32>
    %149 = arith.mulf %147, %148 : vector<8x128xf32>
    %150 = vector.broadcast %93 : vector<1x128xf32> to vector<8x128xf32>
    %151 = arith.addf %149, %150 : vector<8x128xf32>
    %152 = arith.addf %129, %151 : vector<8x128xf32>
    %cst_52 = arith.constant dense<0.000000e+00> : vector<8xf32>
    %153 = vector.multi_reduction <add>, %152, %cst_52 [1] : vector<8x128xf32> to vector<8xf32>
    %154 = vector.shape_cast %153 : vector<8xf32> to vector<8x1xf32>
    %cst_53 = arith.constant 1.280000e+02 : f32
    %155 = vector.broadcast %cst_53 : f32 to vector<8x1xf32>
    %156 = arith.divf %154, %155 : vector<8x1xf32>
    %157 = vector.broadcast %156 : vector<8x1xf32> to vector<8x128xf32>
    %158 = arith.subf %152, %157 : vector<8x128xf32>
    %159 = arith.mulf %158, %158 : vector<8x128xf32>
    %cst_54 = arith.constant dense<0.000000e+00> : vector<8xf32>
    %160 = vector.multi_reduction <add>, %159, %cst_54 [1] : vector<8x128xf32> to vector<8xf32>
    %161 = vector.shape_cast %160 : vector<8xf32> to vector<8x1xf32>
    %cst_55 = arith.constant 1.280000e+02 : f32
    %162 = vector.broadcast %cst_55 : f32 to vector<8x1xf32>
    %163 = arith.divf %161, %162 : vector<8x1xf32>
    %164 = vector.broadcast %156 : vector<8x1xf32> to vector<8x128xf32>
    %165 = arith.subf %152, %164 : vector<8x128xf32>
    %cst_56 = arith.constant 9.99999974E-6 : f32
    %166 = vector.broadcast %cst_56 : f32 to vector<8x1xf32>
    %167 = arith.addf %163, %166 : vector<8x1xf32>
    %168 = math.rsqrt %167 : vector<8x1xf32>
    %169 = vector.broadcast %168 : vector<8x1xf32> to vector<8x128xf32>
    %170 = arith.mulf %165, %169 : vector<8x128xf32>
    %171 = vector.broadcast %94 : vector<1x128xf32> to vector<8x128xf32>
    %172 = arith.mulf %170, %171 : vector<8x128xf32>
    %173 = vector.broadcast %95 : vector<1x128xf32> to vector<8x128xf32>
    %174 = arith.addf %172, %173 : vector<8x128xf32>
    %175 = arith.truncf %174 : vector<8x128xf32> to vector<8x128xbf16>
    %c0_57 = arith.constant 0 : index
    %c0_58 = arith.constant 0 : index
    %176 = vector.load %arg6[%c0_57, %c0_58] : memref<128x128xbf16, #tpu.memory_space<vmem>>, vector<128x128xbf16>
    %cst_59 = arith.constant dense<0.000000e+00> : vector<8x128xf32>
    %177 = tpu.matmul %175, %176, %cst_59 {dimension_numbers = #tpu.dot_dimension_numbers<[1], [0], [0], [1], [0, 0, 1, 1], [], []>} : vector<8x128xbf16>, vector<128x128xbf16>, vector<8x128xf32> -> vector<8x128xf32>
    %c0_60 = arith.constant 0 : index
    %c0_61 = arith.constant 0 : index
    %178 = vector.load %arg7[%c0_60, %c0_61] : memref<1x128xf32, #tpu.memory_space<vmem>>, vector<1x128xf32>
    %179 = vector.broadcast %178 : vector<1x128xf32> to vector<8x128xf32>
    %180 = arith.addf %177, %179 : vector<8x128xf32>
    %c0_62 = arith.constant 0 : index
    %c0_63 = arith.constant 0 : index
    %181 = vector.load %arg8[%c0_62, %c0_63] : memref<8x128xf32, #tpu.memory_space<vmem>>, vector<8x128xf32>
    tpu.vector_store %arg8[%c0_62, %c0_63], %180 {strides = array<i32>} : memref<8x128xf32, #tpu.memory_space<vmem>>, vector<8x128xf32>,
    return
  }
}

</mosaic_0001>

<bundles_post_ra>
// kernel: stacked_transformer_forward.1
= control target key start
LH: loop header
LB: loop body
LE: loop exit
PB: predicated region body
PF: predicated region fallthrough
CT: control target
= control target key end

     0   :  { %13 = vsyncpa [#allocation3], 0  ;;  %s4412_s0 = inlined_call_operand.vmem [shape: f32[8,128], index: 0, kind: input, shape index: {}]   ;;  %s4413_s1 = inlined_call_operand.hbm [shape: bf16[2,128,128], index: 1, kind: input, shape index: {}]   ;;  %s4414_s2 = inlined_call_operand.hbm [shape: f32[2,8,128], index: 2, kind: input, shape index: {}]   ;;  %s4415_s3 = inlined_call_operand.hbm [shape: s8[2,128,2048], index: 3, kind: input, shape index: {}]   ;;  %s4416_s4 = inlined_call_operand.vmem [shape: f32[2,2,2048], index: 4, kind: input, shape index: {}]   ;;  %s4417_s5 = inlined_call_operand.hbm [shape: s8[2,2048,128], index: 5, kind: input, shape index: {}]   ;;  %s4418_s6 = inlined_call_operand.hbm [shape: bf16[128,128], index: 6, kind: input, shape index: {}]   ;;  %s4419_s7 = inlined_call_operand.vmem [shape: f32[1,128], index: 7, kind: input, shape index: {}]   ;;  %s4420_s8 = inlined_call_operand.vmem [shape: f32[8,128], index: 8, kind: output, shape index: {}]  }
   0x1   :  { %14 = vsyncpa [#allocation5], 0 }
   0x2   :  { %15 = vsyncpa [#allocation8], 0  ;;  %s3970_s27 = smov [#allocation4]   ;;  %s3854_s9 = scalar_lea.hbm %s4414_s2, 256 }
   0x3   :  { %s35_s28 = sshll.u32 %s3970_s27, 4  ;;  %p3855_p0 = scmp.ne.s32.totalorder %s4414_s2, %s3854_s9  ;;  %s36_s28 = int_to_ptr.vmem [resolvable:$true] %s35_s28 }
   0x4   :  { %p3858_p1 = scmp.lt.u32.totalorder %s3854_s9, %s4414_s2 }
   0x6   :  { %p3860_p2 = pnand %p3858_p1, %p3855_p0 }
   0x8   :  { %3863 = shalt.err (!%p3860_p2)
}
   0x9   :  { %s3864_s14 = scalar_lea.vmem %s36_s28, 256  ;;  %p3869_p4 = scmp.lt.s32.totalorder %s36_s28, %s36_s28 }
   0xa   :  { %p3865_p3 = scmp.ne.s32.totalorder %s36_s28, %s3864_s14  ;;  %p3870_p5 = scmp.lt.s32.totalorder %s3864_s14, %s3864_s14 }
   0xc   :  { %p3871_p6 = por %p3870_p5, %p3869_p4 }
   0xe   :  { %p3872_p7 = pnand %p3871_p6, %p3865_p3 }
  0x10   :  { %3875 = shalt.err (!%p3872_p7)
}
  0x11   :  { %s3971_s15 = smov 128   ;;  %s3972_s16 = smov 8  }
  0x12   :  { %41 = dma.hbm_to_vmem [thread:$0]  %s4414_s2, 256, %s36_s28, [#allocation5], %s3971_s15, %s3971_s15, %s3972_s16  }
  0x13   :  { %s3973_s19 = smov [#allocation7]   ;;  %s3974_s21 = smov [#allocation2]  }
  0x14   :  { %s61_s20 = sshll.u32 %s3973_s19, 4  ;;  %s23_s22 = sshll.u32 %s3974_s21, 4  ;;  %s62_s20 = int_to_ptr.vmem [resolvable:$true] %s61_s20  ;;  %s24_s22 = int_to_ptr.vmem [resolvable:$true] %s23_s22 }
  0x15   :  { %s3876_s25 = scalar_lea.hbm %s4417_s5, 16384 }
  0x16   :  { %p3877_p8 = scmp.ne.s32.totalorder %s4417_s5, %s3876_s25  ;;  %p3880_p9 = scmp.lt.u32.totalorder %s3876_s25, %s4417_s5 }
  0x18   :  { %p3882_p10 = pnand %p3880_p9, %p3877_p8 }
  0x1a   :  { %3885 = shalt.err (!%p3882_p10)
}
  0x1b   :  { %s3886_s2 = scalar_lea.vmem %s62_s20, 16384  ;;  %p3891_p12 = scmp.lt.s32.totalorder %s62_s20, %s62_s20 }
  0x1c   :  { %p3887_p11 = scmp.ne.s32.totalorder %s62_s20, %s3886_s2  ;;  %p3892_p13 = scmp.lt.s32.totalorder %s3886_s2, %s3886_s2 }
  0x1e   :  { %p3893_p0 = por %p3892_p13, %p3891_p12 }
  0x20   :  { %p3894_p1 = pnand %p3893_p0, %p3887_p11 }
  0x22   :  { %3897 = shalt.err (!%p3894_p1)
}
  0x23   :  { %67 = dma.hbm_to_vmem [thread:$0]  %s4417_s5, 16384, %s62_s20, [#allocation8], %s3971_s15, %s3971_s15, %s3972_s16  }
  0x24   :  { %s3898_s12 = scalar_lea.hbm %s4413_s1, 2048 }
  0x25   :  { %p3899_p2 = scmp.ne.s32.totalorder %s4413_s1, %s3898_s12  ;;  %p3902_p3 = scmp.lt.u32.totalorder %s3898_s12, %s4413_s1 }
  0x27   :  { %p3904_p4 = pnand %p3902_p3, %p3899_p2 }
  0x29   :  { %3907 = shalt.err (!%p3904_p4)
}
  0x2a   :  { %s3908_s19 = scalar_lea.vmem %s24_s22, 2048  ;;  %p3913_p6 = scmp.lt.s32.totalorder %s24_s22, %s24_s22 }
  0x2b   :  { %p3909_p5 = scmp.ne.s32.totalorder %s24_s22, %s3908_s19  ;;  %p3914_p7 = scmp.lt.s32.totalorder %s3908_s19, %s3908_s19 }
  0x2d   :  { %p3915_p8 = por %p3914_p7, %p3913_p6 }
  0x2f   :  { %p3916_p9 = pnand %p3915_p8, %p3909_p5 }
  0x31   :  { %3919 = shalt.err (!%p3916_p9)
}
  0x32   :  { %s3975_s5 = smov 64   ;;  %s3976_s16 = smov 4  }
  0x33   :  { %29 = dma.hbm_to_vmem [thread:$0]  %s4413_s1, 2048, %s24_s22, [#allocation3], %s3975_s5, %s3975_s5, %s3976_s16  }
  0x34   :  { %s3977_s23 = smov [#allocation6]   ;;  %s3920_s27 = scalar_lea.hbm %s4415_s3, 16384 }
  0x35   :  { %s47_s24 = sshll.u32 %s3977_s23, 4  ;;  %p3921_p10 = scmp.ne.s32.totalorder %s4415_s3, %s3920_s27  ;;  %s48_s24 = int_to_ptr.vmem [resolvable:$true] %s47_s24 }
  0x36   :  { %p3924_p11 = scmp.lt.u32.totalorder %s3920_s27, %s4415_s3 }
  0x38   :  { %p3926_p12 = pnand %p3924_p11, %p3921_p10 }
  0x3a   :  { %3929 = shalt.err (!%p3926_p12)
}
  0x3b   :  { %s3930_s9 = scalar_lea.vmem %s48_s24, 16384  ;;  %p3935_p0 = scmp.lt.s32.totalorder %s48_s24, %s48_s24 }
  0x3c   :  { %p3931_p13 = scmp.ne.s32.totalorder %s48_s24, %s3930_s9  ;;  %p3936_p1 = scmp.lt.s32.totalorder %s3930_s9, %s3930_s9 }
  0x3e   :  { %p3937_p2 = por %p3936_p1, %p3935_p0 }
  0x40   :  { %p3938_p3 = pnand %p3937_p2, %p3931_p13 }
  0x42   :  { %3941 = shalt.err (!%p3938_p3)
}
  0x43   :  { %s3978_s1 = smov 2048   ;;  %s3979_s11 = smov [#allocation9]  }
  0x44   :  { %53 = dma.hbm_to_vmem [thread:$0]  %s4415_s3, 16384, %s48_s24, [#allocation5], %s3978_s1, %s3978_s1, %s3971_s15  }
  0x45   :  { %s73_s12 = sshll.u32 %s3979_s11, 4  ;;  %s3942_s17 = scalar_lea.hbm %s4418_s6, 1024  ;;  %s74_s12 = int_to_ptr.vmem [resolvable:$true] %s73_s12 }
  0x46   :  { %p3943_p4 = scmp.ne.s32.totalorder %s4418_s6, %s3942_s17  ;;  %p3946_p5 = scmp.lt.u32.totalorder %s3942_s17, %s4418_s6 }
  0x48   :  { %p3948_p6 = pnand %p3946_p5, %p3943_p4 }
  0x4a   :  { %3951 = shalt.err (!%p3948_p6)
}
  0x4b   :  { %s3952_s23 = scalar_lea.vmem %s74_s12, 1024  ;;  %p3957_p8 = scmp.lt.s32.totalorder %s74_s12, %s74_s12 }
  0x4c   :  { %p3953_p7 = scmp.ne.s32.totalorder %s74_s12, %s3952_s23  ;;  %p3958_p9 = scmp.lt.s32.totalorder %s3952_s23, %s3952_s23 }
  0x4e   :  { %p3959_p10 = por %p3958_p9, %p3957_p8 }
  0x50   :  { %p3960_p11 = pnand %p3959_p10, %p3953_p7 }
  0x52   :  { %3963 = shalt.err (!%p3960_p11)
}
  0x53   :  { %79 = dma.hbm_to_vmem [thread:$0]  %s4418_s6, 1024, %s74_s12, [#allocation8], %s3975_s5, %s3975_s5, %s3976_s16  }
  0x54   :  { %3964 = dma.done.wait [#allocation3], 2048  }
  0x55   :  { %3965 = vsyncadd [#allocation3], 4294965248 }
  0x56   :  { %3966 = dma.done.wait [#allocation5], 16640  }
  0x57   :  { %3967 = vsyncadd [#allocation5], 4294950656 }
  0x58   :  { %3968 = dma.done.wait [#allocation8], 17408  }
  0x59   :  { %3969 = vsyncadd [#allocation8], 4294949888  ;;  %v3980_v0 = vmov 0.0   ;;  %vm3981_vm0 = vmmov 0   ;;  %v3820_v1 = vld [vmem:[#allocation2] sm:$0xff]   ;;  %v3821_v2 = vld [vmem:[#allocation2 + $0x8] sm:$0xff]   ;;  %v121_v11 = vlaneseq }
  0x5a   :  { %3747 = vmatprep.subr.bf16.mxu0 %v3980_v0  ;;  %3763 = vmatprep.mubr.msk.bf16.mxu0 %vm3981_vm0, %v3980_v0  ;;  %v3822_v3 = vld [vmem:[#allocation2 + $0x10] sm:$0xff]   ;;  %v3823_v4 = vld [vmem:[#allocation2 + $0x18] sm:$0xff]   ;;  %v3824_v5 = vld [vmem:[#allocation2 + $0x20] sm:$0xff]  }
  0x5b   :  { %3748 = vmatpush3.bf16.msra.mxu0 %v3820_v1  ;;  %v3825_v6 = vld [vmem:[#allocation2 + $0x28] sm:$0xff]   ;;  %v3826_v7 = vld [vmem:[#allocation2 + $0x30] sm:$0xff]   ;;  %v3827_v8 = vld [vmem:[#allocation2 + $0x38] sm:$0xff]   ;;  %v4112_v12 = vshrl.u32 %v121_v11, 7 }
  0x5c   :  { %3749 = vmatprep.subr.bf16.mxu0 %v3980_v0  ;;  %v98_v9 = vld [vmem:[%s4412_s0] sm:$0xff]  ;;  %v237_v22 = vld [vmem:[#allocation6 + $0x8] sm:$0xff]  ;;  %v239_v23 = vld [vmem:[#allocation6 + $0x18] sm:$0xff] }
  0x5d   :  { %v104_v10 = vpack.c.bf16 %v98_v9, %v98_v9  ;;  %v4115_v13 = vsub.s32 0, %v4112_v12  ;;  %v4117_v14 = vld [vmem:[#allocation4] sm:$0xff]  ;;  %v236_v24 = vld [vmem:[#allocation6] sm:$0xff]  ;;  %v301_v25 = vunpack.c.l.s8.bf16 %v237_v22  ;;  %v317_v26 = vunpack.c.h.s8.bf16 %v237_v22  ;;  %v253_v32 = vld [vmem:[#allocation6 + $0x88] sm:$0xff] }
  0x5e   :  { %v303_v27 = vunpack.c.l.s8.bf16 %v239_v23  ;;  %v300_v28 = vunpack.c.l.s8.bf16 %v236_v24  ;;  %v238_v29 = vld [vmem:[#allocation6 + $0x10] sm:$0xff]  ;;  %v319_v31 = vunpack.c.h.s8.bf16 %v239_v23  ;;  %v255_v33 = vld [vmem:[#allocation6 + $0x98] sm:$0xff]  ;;  %v316_v34 = vunpack.c.h.s8.bf16 %v236_v24  ;;  %v252_v38 = vld [vmem:[#allocation6 + $0x80] sm:$0xff] }
  0x5f   :  { %3750 = vmatpush3.bf16.msra.mxu0 %v3821_v2  ;;  %v124_v15 = vrot.slane %v4117_v14, %v4115_v13  ;;  %v302_v30 = vunpack.c.l.s8.bf16 %v238_v29  ;;  %429 = vmatprep.subr.bf16.mxu1 %v301_v25  ;;  %v318_v35 = vunpack.c.h.s8.bf16 %v238_v29  ;;  %v333_v36 = vunpack.c.l.s8.bf16 %v253_v32  ;;  %v254_v39 = vld [vmem:[#allocation6 + $0x90] sm:$0xff]  ;;  %v269_v50 = vld [vmem:[#allocation6 + $0x108] sm:$0xff]  ;;  %v271_v51 = vld [vmem:[#allocation6 + $0x118] sm:$0xff] }
  0x60   :  { %3751 = vmatprep.subr.bf16.mxu0 %v3980_v0  ;;  %430 = vmatpush1.bf16.msra.mxu1 %v300_v28  ;;  %v335_v37 = vunpack.c.l.s8.bf16 %v255_v33  ;;  %v332_v40 = vunpack.c.l.s8.bf16 %v252_v38  ;;  %v334_v41 = vunpack.c.l.s8.bf16 %v254_v39  ;;  %v349_v46 = vunpack.c.h.s8.bf16 %v253_v32  ;;  %v268_v54 = vld [vmem:[#allocation6 + $0x100] sm:$0xff]  ;;  %v270_v55 = vld [vmem:[#allocation6 + $0x110] sm:$0xff]  ;;  %v285_v62 = vld [vmem:[#allocation6 + $0x188] sm:$0xff] }
  0x61   :  { %431 = vmatprep.subr.bf16.mxu1 %v317_v26  ;;  %v351_v47 = vunpack.c.h.s8.bf16 %v255_v33  ;;  %v348_v48 = vunpack.c.h.s8.bf16 %v252_v38  ;;  %v350_v49 = vunpack.c.h.s8.bf16 %v254_v39  ;;  %v365_v52 = vunpack.c.l.s8.bf16 %v269_v50  ;;  %v287_v63 = vld [vmem:[#allocation6 + $0x198] sm:$0xff]  ;;  %v241_v11 = vld [vmem:[#allocation6 + $0x28] sm:$0xff]  ;;  %v240_v29 = vld [vmem:[#allocation6 + $0x20] sm:$0xff] }
  0x62   :  { %v367_v53 = vunpack.c.l.s8.bf16 %v271_v51  ;;  %v364_v56 = vunpack.c.l.s8.bf16 %v268_v54  ;;  %v366_v57 = vunpack.c.l.s8.bf16 %v270_v55  ;;  %v381_v58 = vunpack.c.h.s8.bf16 %v269_v50  ;;  %v259_v38 = vld [vmem:[#allocation6 + $0xb8] sm:$0xff] }
  0x63   :  { %3752 = vmatpush3.bf16.msra.mxu0 %v3822_v3  ;;  %v383_v59 = vunpack.c.h.s8.bf16 %v271_v51  ;;  %v380_v60 = vunpack.c.h.s8.bf16 %v268_v54  ;;  %v382_v61 = vunpack.c.h.s8.bf16 %v270_v55  ;;  %v397_v1 = vunpack.c.l.s8.bf16 %v285_v62  ;;  %v284_v3 = vld [vmem:[#allocation6 + $0x180] sm:$0xff]  ;;  %v274_v55 = vld [vmem:[#allocation6 + $0x130] sm:$0xff] }
  0x64   :  { %3753 = vmatprep.subr.bf16.mxu0 %v3980_v0  ;;  %432 = vmatpush1.bf16.msra.mxu1 %v316_v34  ;;  %v399_v2 = vunpack.c.l.s8.bf16 %v287_v63  ;;  %v4128_v22 = vsub.s32 1, %v4112_v12  ;;  %v4131_v23 = vsub.s32 2, %v4112_v12  ;;  %v304_v32 = vunpack.c.l.s8.bf16 %v240_v29  ;;  %v272_v54 = vld [vmem:[#allocation6 + $0x120] sm:$0xff] }
  0x65   :  { %433 = vmatprep.subr.bf16.mxu1 %v333_v36 }
  0x66   :  { %v229_v24 = vrot.slane %v4117_v14, %v4128_v22  ;;  %v234_v26 = vrot.slane %v4117_v14, %v4131_v23  ;;  %v320_v14 = vunpack.c.h.s8.bf16 %v240_v29 }
  0x67   :  { %3754 = vmatpush3.bf16.msra.mxu0 %v3823_v4  ;;  %v286_v4 = vld [vmem:[#allocation6 + $0x190] sm:$0xff] }
  0x68   :  { %3755 = vmatprep.subr.bf16.mxu0 %v3980_v0  ;;  %434 = vmatpush1.bf16.msra.mxu1 %v332_v40 }
  0x69   :  { %435 = vmatprep.subr.bf16.mxu1 %v349_v46 }
  0x6b   :  { %3756 = vmatpush3.bf16.msra.mxu0 %v3824_v5  ;;  %v396_v5 = vunpack.c.l.s8.bf16 %v284_v3 }
  0x6c   :  { %3757 = vmatprep.subr.bf16.mxu0 %v3980_v0  ;;  %436 = vmatpush1.bf16.msra.mxu1 %v348_v48  ;;  %v273_v48 = vld [vmem:[#allocation6 + $0x128] sm:$0xff] }
  0x6d   :  { %437 = vmatprep.subr.bf16.mxu1 %v365_v52  ;;  %v369_v52 = vunpack.c.l.s8.bf16 %v273_v48 }
  0x6f   :  { %3758 = vmatpush3.bf16.msra.mxu0 %v3825_v6  ;;  %v398_v6 = vunpack.c.l.s8.bf16 %v286_v4 }
  0x70   :  { %3759 = vmatprep.subr.bf16.mxu0 %v3980_v0  ;;  %438 = vmatpush1.bf16.msra.mxu1 %v364_v56  ;;  %v368_v56 = vunpack.c.l.s8.bf16 %v272_v54 }
  0x71   :  { %439 = vmatprep.subr.bf16.mxu1 %v381_v58  ;;  %v385_v58 = vunpack.c.h.s8.bf16 %v273_v48 }
  0x73   :  { %3760 = vmatpush3.bf16.msra.mxu0 %v3826_v7  ;;  %v413_v7 = vunpack.c.h.s8.bf16 %v285_v62  ;;  %v384_v62 = vunpack.c.h.s8.bf16 %v272_v54 }
  0x74   :  { %3761 = vmatprep.subr.bf16.mxu0 %v3980_v0  ;;  %440 = vmatpush1.bf16.msra.mxu1 %v380_v60  ;;  %v289_v60 = vld [vmem:[#allocation6 + $0x1a8] sm:$0xff] }
  0x75   :  { %441 = vmatprep.subr.bf16.mxu1 %v397_v1  ;;  %v401_v1 = vunpack.c.l.s8.bf16 %v289_v60 }
  0x77   :  { %3762 = vmatpush3.bf16.msra.mxu0 %v3827_v8  ;;  %v415_v8 = vunpack.c.h.s8.bf16 %v287_v63  ;;  %v386_v63 = vunpack.c.h.s8.bf16 %v274_v55 }
  0x78   :  { %470 = vmatprep.subr.bf16.mxu0 %v303_v27  ;;  %442 = vmatpush1.bf16.msra.mxu1 %v396_v5 }
  0x79   :  { %443 = vmatprep.subr.bf16.mxu1 %v413_v7  ;;  %v417_v7 = vunpack.c.h.s8.bf16 %v289_v60 }
  0x7a   :  { %3764 = vmatmul.mubr.bf16.vlgmr.msra.gmra.mrb[0].mxu0 %v104_v10  ;;  %v414_v10 = vunpack.c.h.s8.bf16 %v286_v4  ;;  %v290_v4 = vld [vmem:[#allocation6 + $0x1b0] sm:$0xff] }
  0x7b   :  { %471 = vmatpush1.bf16.msra.mxu0 %v302_v30  ;;  %v242_v30 = vld [vmem:[#allocation6 + $0x30] sm:$0xff] }
  0x7c   :  { %472 = vmatprep.subr.bf16.mxu0 %v319_v31  ;;  %v306_v33 = vunpack.c.l.s8.bf16 %v242_v30  ;;  %v322_v39 = vunpack.c.h.s8.bf16 %v242_v30 }
  0x7f   :  { %473 = vmatpush1.bf16.msra.mxu0 %v318_v35  ;;  %v321_v35 = vunpack.c.h.s8.bf16 %v241_v11 }
  0x80   :  { %474 = vmatprep.subr.bf16.mxu0 %v335_v37  ;;  %v257_v37 = vld [vmem:[#allocation6 + $0xa8] sm:$0xff] }
  0x81   :  { %v337_v40 = vunpack.c.l.s8.bf16 %v257_v37  ;;  %v353_v46 = vunpack.c.h.s8.bf16 %v257_v37 }
  0x83   :  { %475 = vmatpush1.bf16.msra.mxu0 %v334_v41  ;;  %v339_v41 = vunpack.c.l.s8.bf16 %v259_v38 }
  0x84   :  { %476 = vmatprep.subr.bf16.mxu0 %v351_v47  ;;  %v355_v47 = vunpack.c.h.s8.bf16 %v259_v38 }
  0x87   :  { %477 = vmatpush1.bf16.msra.mxu0 %v350_v49  ;;  %v275_v49 = vld [vmem:[#allocation6 + $0x138] sm:$0xff] }
  0x88   :  { %478 = vmatprep.subr.bf16.mxu0 %v367_v53  ;;  %v371_v53 = vunpack.c.l.s8.bf16 %v275_v49 }
  0x8b   :  { %479 = vmatpush1.bf16.msra.mxu0 %v366_v57  ;;  %v370_v57 = vunpack.c.l.s8.bf16 %v274_v55 }
  0x8c   :  { %480 = vmatprep.subr.bf16.mxu0 %v383_v59  ;;  %v387_v59 = vunpack.c.h.s8.bf16 %v275_v49 }
  0x8f   :  { %481 = vmatpush1.bf16.msra.mxu0 %v382_v61  ;;  %v291_v61 = vld [vmem:[#allocation6 + $0x1b8] sm:$0xff] }
  0x90   :  { %482 = vmatprep.subr.bf16.mxu0 %v399_v2  ;;  %v403_v2 = vunpack.c.l.s8.bf16 %v291_v61 }
  0x93   :  { %483 = vmatpush1.bf16.msra.mxu0 %v398_v6  ;;  %v402_v6 = vunpack.c.l.s8.bf16 %v290_v4 }
  0x94   :  { %484 = vmatprep.subr.bf16.mxu0 %v415_v8  ;;  %v419_v8 = vunpack.c.h.s8.bf16 %v291_v61 }
  0x97   :  { %485 = vmatpush1.bf16.msra.mxu0 %v414_v10  ;;  %v247_v10 = vld [vmem:[#allocation6 + $0x58] sm:$0xff] }
 0x14d   :  { %v207_v16 = vpop.f32.mrb[0].mxu0 }
 0x14e   :  { %v208_v17 = vadd.f32 %v207_v16, %v124_v15  ;;  %v3765_v18 = vpop.f32.mrb[1].mxu0  ;;  %v243_v15 = vld [vmem:[#allocation6 + $0x38] sm:$0xff]  ;;  %v305_v16 = vunpack.c.l.s8.bf16 %v241_v11 }
 0x14f   :  { %v210_v19 = vpop.f32.mrb[2].mxu0  ;;  %v3982_v18 = vmov 0   ;;  %v323_v36 = vunpack.c.h.s8.bf16 %v243_v15 }
 0x150   :  { %v3766_v20 = vpop.f32.mrb[3].mxu0  ;;  %v213_v21 = vadd.f32 %v208_v17, %v98_v9  ;;  %v412_v9 = vunpack.c.h.s8.bf16 %v284_v3  ;;  %v307_v17 = vunpack.c.l.s8.bf16 %v243_v15  ;;  %461 = vmatprep.mubr.bf16.mxu1 %v3982_v18  ;;  %502 = vmatprep.mubr.bf16.mxu0 %v3982_v18  ;;  %v288_v3 = vld [vmem:[#allocation6 + $0x1a0] sm:$0xff]  ;;  %v418_v15 = vunpack.c.h.s8.bf16 %v290_v4 }
 0x151   :  { %v400_v5 = vunpack.c.l.s8.bf16 %v288_v3  ;;  %v416_v11 = vunpack.c.h.s8.bf16 %v288_v3 }
 0x152   :  { %214 = vadd.xlane.f32.xlu0 %v213_v21  ;;  %444 = vmatpush1.bf16.msra.mxu1 %v412_v9  ;;  %v245_v9 = vld [vmem:[#allocation6 + $0x48] sm:$0xff] }
 0x153   :  { %511 = vmatprep.subr.bf16.mxu1 %v305_v16  ;;  %552 = vmatprep.subr.bf16.mxu0 %v307_v17  ;;  %v309_v16 = vunpack.c.l.s8.bf16 %v245_v9  ;;  %v311_v17 = vunpack.c.l.s8.bf16 %v247_v10 }
 0x1df   :  { %v215_v42 = vpop.xlane.xlu0 %214 }
 0x1e0   :  { %v217_v43 = vmul.f32 0.0078125, %v215_v42  ;;  %v256_v42 = vld [vmem:[#allocation6 + $0xa0] sm:$0xff] }
 0x1e1   :  { %v352_v50 = vunpack.c.h.s8.bf16 %v256_v42 }
 0x1e2   :  { %v4121_v44 = vsub.f32 %v213_v21, %v217_v43  ;;  %v258_v43 = vld [vmem:[#allocation6 + $0xb0] sm:$0xff] }
 0x1e3   :  { %v354_v51 = vunpack.c.h.s8.bf16 %v258_v43 }
 0x1e4   :  { %v219_v45 = vmul.f32 %v4121_v44, %v4121_v44 }
 0x1e6   :  { %220 = vadd.xlane.f32.xlu0 %v219_v45  ;;  %v338_v45 = vunpack.c.l.s8.bf16 %v258_v43 }
 0x273   :  { %v221_v19 = vpop.xlane.xlu0 %220 }
 0x274   :  { %v222_v20 = vmul.f32 0.0078125, %v221_v19  ;;  %v244_v19 = vld [vmem:[#allocation6 + $0x40] sm:$0xff] }
 0x275   :  { %v324_v29 = vunpack.c.h.s8.bf16 %v244_v19 }
 0x276   :  { %v223_v21 = vadd.f32 1e-05, %v222_v20  ;;  %v246_v20 = vld [vmem:[#allocation6 + $0x50] sm:$0xff] }
 0x277   :  { %v326_v30 = vunpack.c.h.s8.bf16 %v246_v20 }
 0x278   :  { %3844 = vrsqrt.f32 %v223_v21  ;;  %v308_v21 = vunpack.c.l.s8.bf16 %v244_v19 }
 0x282   :  { %v3845_v25 = vpop.eup %3844 }
 0x283   :  { %v225_v27 = vmul.f32 %v3845_v25, %v4121_v44  ;;  %v336_v44 = vunpack.c.l.s8.bf16 %v256_v42  ;;  %v325_v25 = vunpack.c.h.s8.bf16 %v245_v9 }
 0x285   :  { %v230_v28 = vmul.f32 %v229_v24, %v225_v27  ;;  %v310_v24 = vunpack.c.l.s8.bf16 %v246_v20  ;;  %v261_v27 = vld [vmem:[#allocation6 + $0xc8] sm:$0xff] }
 0x287   :  { %v4138_v31 = vadd.f32 %v234_v26, %v230_v28  ;;  %v327_v26 = vunpack.c.h.s8.bf16 %v247_v10  ;;  %v263_v28 = vld [vmem:[#allocation6 + $0xd8] sm:$0xff] }
 0x289   :  { %v4142_v34 = vpack.c.bf16 %v4138_v31, %v4138_v31 }
 0x28b   :  { %462 = vmatmul.mubr.bf16.vlgmr.msra.gmra.mrb[0].mxu1 %v4142_v34  ;;  %503 = vmatmul.mubr.bf16.vlgmr.msra.gmra.mrb[4].mxu0 %v4142_v34 }
 0x28c   :  { %512 = vmatpush1.bf16.msra.mxu1 %v304_v32  ;;  %553 = vmatpush1.bf16.msra.mxu0 %v306_v33  ;;  %v341_v32 = vunpack.c.l.s8.bf16 %v261_v27  ;;  %v343_v33 = vunpack.c.l.s8.bf16 %v263_v28 }
 0x28d   :  { %513 = vmatprep.subr.bf16.mxu1 %v321_v35  ;;  %554 = vmatprep.subr.bf16.mxu0 %v323_v36  ;;  %v260_v35 = vld [vmem:[#allocation6 + $0xc0] sm:$0xff]  ;;  %v262_v36 = vld [vmem:[#allocation6 + $0xd0] sm:$0xff] }
 0x28e   :  { %543 = vmatprep.mubr.bf16.mxu1 %v3982_v18  ;;  %584 = vmatprep.mubr.bf16.mxu0 %v3982_v18  ;;  %v340_v37 = vunpack.c.l.s8.bf16 %v260_v35  ;;  %v342_v38 = vunpack.c.l.s8.bf16 %v262_v36  ;;  %v356_v42 = vunpack.c.h.s8.bf16 %v260_v35  ;;  %v358_v43 = vunpack.c.h.s8.bf16 %v262_v36 }
 0x290   :  { %514 = vmatpush1.bf16.msra.mxu1 %v320_v14  ;;  %555 = vmatpush1.bf16.msra.mxu0 %v322_v39  ;;  %v357_v14 = vunpack.c.h.s8.bf16 %v261_v27  ;;  %v359_v39 = vunpack.c.h.s8.bf16 %v263_v28 }
 0x291   :  { %515 = vmatprep.subr.bf16.mxu1 %v337_v40  ;;  %556 = vmatprep.subr.bf16.mxu0 %v339_v41  ;;  %v277_v40 = vld [vmem:[#allocation6 + $0x148] sm:$0xff]  ;;  %v279_v41 = vld [vmem:[#allocation6 + $0x158] sm:$0xff] }
 0x294   :  { %516 = vmatpush1.bf16.msra.mxu1 %v336_v44  ;;  %557 = vmatpush1.bf16.msra.mxu0 %v338_v45  ;;  %v373_v44 = vunpack.c.l.s8.bf16 %v277_v40  ;;  %v375_v45 = vunpack.c.l.s8.bf16 %v279_v41 }
 0x295   :  { %517 = vmatprep.subr.bf16.mxu1 %v353_v46  ;;  %558 = vmatprep.subr.bf16.mxu0 %v355_v47  ;;  %v276_v46 = vld [vmem:[#allocation6 + $0x140] sm:$0xff]  ;;  %v278_v47 = vld [vmem:[#allocation6 + $0x150] sm:$0xff] }
 0x296   :  { %v372_v48 = vunpack.c.l.s8.bf16 %v276_v46  ;;  %v374_v49 = vunpack.c.l.s8.bf16 %v278_v47  ;;  %v388_v54 = vunpack.c.h.s8.bf16 %v276_v46  ;;  %v390_v55 = vunpack.c.h.s8.bf16 %v278_v47 }
 0x298   :  { %518 = vmatpush1.bf16.msra.mxu1 %v352_v50  ;;  %559 = vmatpush1.bf16.msra.mxu0 %v354_v51  ;;  %v389_v50 = vunpack.c.h.s8.bf16 %v277_v40  ;;  %v391_v51 = vunpack.c.h.s8.bf16 %v279_v41 }
 0x299   :  { %519 = vmatprep.subr.bf16.mxu1 %v369_v52  ;;  %560 = vmatprep.subr.bf16.mxu0 %v371_v53  ;;  %v293_v52 = vld [vmem:[#allocation6 + $0x1c8] sm:$0xff]  ;;  %v295_v53 = vld [vmem:[#allocation6 + $0x1d8] sm:$0xff] }
 0x29c   :  { %520 = vmatpush1.bf16.msra.mxu1 %v368_v56  ;;  %561 = vmatpush1.bf16.msra.mxu0 %v370_v57  ;;  %v405_v56 = vunpack.c.l.s8.bf16 %v293_v52  ;;  %v407_v57 = vunpack.c.l.s8.bf16 %v295_v53 }
 0x29d   :  { %521 = vmatprep.subr.bf16.mxu1 %v385_v58  ;;  %562 = vmatprep.subr.bf16.mxu0 %v387_v59  ;;  %v292_v58 = vld [vmem:[#allocation6 + $0x1c0] sm:$0xff]  ;;  %v294_v59 = vld [vmem:[#allocation6 + $0x1d0] sm:$0xff] }
 0x29e   :  { %v404_v60 = vunpack.c.l.s8.bf16 %v292_v58  ;;  %v406_v61 = vunpack.c.l.s8.bf16 %v294_v59  ;;  %v420_v3 = vunpack.c.h.s8.bf16 %v292_v58  ;;  %v422_v4 = vunpack.c.h.s8.bf16 %v294_v59 }
 0x2a0   :  { %522 = vmatpush1.bf16.msra.mxu1 %v384_v62  ;;  %563 = vmatpush1.bf16.msra.mxu0 %v386_v63  ;;  %v421_v62 = vunpack.c.h.s8.bf16 %v293_v52  ;;  %v423_v63 = vunpack.c.h.s8.bf16 %v295_v53 }
 0x2a1   :  { %523 = vmatprep.subr.bf16.mxu1 %v401_v1  ;;  %564 = vmatprep.subr.bf16.mxu0 %v403_v2  ;;  %v249_v1 = vld [vmem:[#allocation6 + $0x68] sm:$0xff]  ;;  %v251_v2 = vld [vmem:[#allocation6 + $0x78] sm:$0xff] }
 0x2a4   :  { %524 = vmatpush1.bf16.msra.mxu1 %v400_v5  ;;  %565 = vmatpush1.bf16.msra.mxu0 %v402_v6  ;;  %v313_v5 = vunpack.c.l.s8.bf16 %v249_v1  ;;  %v315_v6 = vunpack.c.l.s8.bf16 %v251_v2 }
 0x2a5   :  { %525 = vmatprep.subr.bf16.mxu1 %v417_v7  ;;  %566 = vmatprep.subr.bf16.mxu0 %v419_v8  ;;  %v248_v7 = vld [vmem:[#allocation6 + $0x60] sm:$0xff]  ;;  %v250_v8 = vld [vmem:[#allocation6 + $0x70] sm:$0xff] }
 0x2a6   :  { %v312_v9 = vunpack.c.l.s8.bf16 %v248_v7  ;;  %v314_v10 = vunpack.c.l.s8.bf16 %v250_v8  ;;  %v328_v19 = vunpack.c.h.s8.bf16 %v248_v7  ;;  %v330_v20 = vunpack.c.h.s8.bf16 %v250_v8 }
 0x2a8   :  { %526 = vmatpush1.bf16.msra.mxu1 %v416_v11  ;;  %567 = vmatpush1.bf16.msra.mxu0 %v418_v15  ;;  %v329_v11 = vunpack.c.h.s8.bf16 %v249_v1  ;;  %v331_v15 = vunpack.c.h.s8.bf16 %v251_v2 }
 0x2a9   :  { %593 = vmatprep.subr.bf16.mxu1 %v309_v16  ;;  %634 = vmatprep.subr.bf16.mxu0 %v311_v17  ;;  %v265_v16 = vld [vmem:[#allocation6 + $0xe8] sm:$0xff]  ;;  %v267_v17 = vld [vmem:[#allocation6 + $0xf8] sm:$0xff] }
 0x2ab   :  { %544 = vmatmul.mubr.bf16.vlgmr.msra.gmra.mrb[4].mxu1 %v4142_v34  ;;  %585 = vmatmul.mubr.bf16.vlgmr.msra.gmra.mrb[8].mxu0 %v4142_v34 }
 0x2ac   :  { %594 = vmatpush1.bf16.msra.mxu1 %v308_v21  ;;  %635 = vmatpush1.bf16.msra.mxu0 %v310_v24  ;;  %v345_v21 = vunpack.c.l.s8.bf16 %v265_v16  ;;  %v347_v24 = vunpack.c.l.s8.bf16 %v267_v17 }
 0x2ad   :  { %595 = vmatprep.subr.bf16.mxu1 %v325_v25  ;;  %636 = vmatprep.subr.bf16.mxu0 %v327_v26  ;;  %v264_v25 = vld [vmem:[#allocation6 + $0xe0] sm:$0xff]  ;;  %v266_v26 = vld [vmem:[#allocation6 + $0xf0] sm:$0xff] }
 0x2ae   :  { %625 = vmatprep.mubr.bf16.mxu1 %v3982_v18  ;;  %666 = vmatprep.mubr.bf16.mxu0 %v3982_v18  ;;  %v344_v27 = vunpack.c.l.s8.bf16 %v264_v25  ;;  %v346_v28 = vunpack.c.l.s8.bf16 %v266_v26  ;;  %v360_v35 = vunpack.c.h.s8.bf16 %v264_v25  ;;  %v362_v36 = vunpack.c.h.s8.bf16 %v266_v26 }
 0x2b0   :  { %596 = vmatpush1.bf16.msra.mxu1 %v324_v29  ;;  %637 = vmatpush1.bf16.msra.mxu0 %v326_v30  ;;  %v361_v29 = vunpack.c.h.s8.bf16 %v265_v16  ;;  %v363_v30 = vunpack.c.h.s8.bf16 %v267_v17 }
 0x2b1   :  { %597 = vmatprep.subr.bf16.mxu1 %v341_v32  ;;  %638 = vmatprep.subr.bf16.mxu0 %v343_v33  ;;  %v281_v32 = vld [vmem:[#allocation6 + $0x168] sm:$0xff]  ;;  %v283_v33 = vld [vmem:[#allocation6 + $0x178] sm:$0xff] }
 0x2b4   :  { %598 = vmatpush1.bf16.msra.mxu1 %v340_v37  ;;  %639 = vmatpush1.bf16.msra.mxu0 %v342_v38  ;;  %v377_v37 = vunpack.c.l.s8.bf16 %v281_v32  ;;  %v379_v38 = vunpack.c.l.s8.bf16 %v283_v33 }
 0x2b5   :  { %599 = vmatprep.subr.bf16.mxu1 %v357_v14  ;;  %640 = vmatprep.subr.bf16.mxu0 %v359_v39  ;;  %v280_v14 = vld [vmem:[#allocation6 + $0x160] sm:$0xff]  ;;  %v282_v39 = vld [vmem:[#allocation6 + $0x170] sm:$0xff] }
 0x2b6   :  { %v376_v40 = vunpack.c.l.s8.bf16 %v280_v14  ;;  %v378_v41 = vunpack.c.l.s8.bf16 %v282_v39  ;;  %v392_v46 = vunpack.c.h.s8.bf16 %v280_v14  ;;  %v394_v47 = vunpack.c.h.s8.bf16 %v282_v39 }
 0x2b8   :  { %600 = vmatpush1.bf16.msra.mxu1 %v356_v42  ;;  %641 = vmatpush1.bf16.msra.mxu0 %v358_v43  ;;  %v393_v42 = vunpack.c.h.s8.bf16 %v281_v32  ;;  %v395_v43 = vunpack.c.h.s8.bf16 %v283_v33 }
 0x2b9   :  { %601 = vmatprep.subr.bf16.mxu1 %v373_v44  ;;  %642 = vmatprep.subr.bf16.mxu0 %v375_v45  ;;  %v297_v44 = vld [vmem:[#allocation6 + $0x1e8] sm:$0xff]  ;;  %v299_v45 = vld [vmem:[#allocation6 + $0x1f8] sm:$0xff] }
 0x2bc   :  { %602 = vmatpush1.bf16.msra.mxu1 %v372_v48  ;;  %643 = vmatpush1.bf16.msra.mxu0 %v374_v49  ;;  %v409_v48 = vunpack.c.l.s8.bf16 %v297_v44  ;;  %v411_v49 = vunpack.c.l.s8.bf16 %v299_v45 }
 0x2bd   :  { %603 = vmatprep.subr.bf16.mxu1 %v389_v50  ;;  %644 = vmatprep.subr.bf16.mxu0 %v391_v51  ;;  %v296_v50 = vld [vmem:[#allocation6 + $0x1e0] sm:$0xff]  ;;  %v298_v51 = vld [vmem:[#allocation6 + $0x1f0] sm:$0xff] }
 0x2be   :  { %v408_v52 = vunpack.c.l.s8.bf16 %v296_v50  ;;  %v410_v53 = vunpack.c.l.s8.bf16 %v298_v51  ;;  %v424_v58 = vunpack.c.h.s8.bf16 %v296_v50  ;;  %v426_v59 = vunpack.c.h.s8.bf16 %v298_v51 }
 0x2c0   :  { %604 = vmatpush1.bf16.msra.mxu1 %v388_v54  ;;  %645 = vmatpush1.bf16.msra.mxu0 %v390_v55  ;;  %v425_v54 = vunpack.c.h.s8.bf16 %v297_v44  ;;  %v427_v55 = vunpack.c.h.s8.bf16 %v299_v45 }
 0x2c1   :  { %605 = vmatprep.subr.bf16.mxu1 %v405_v56  ;;  %646 = vmatprep.subr.bf16.mxu0 %v407_v57  ;;  %v1101_v56 = vld [vmem:[#allocation7 + $0x20] sm:$0xff] }
 0x2c2   :  { %v1109_v57 = vld [vmem:[#allocation7 + $0x60] sm:$0xff] }
 0x2c4   :  { %606 = vmatpush1.bf16.msra.mxu1 %v404_v60  ;;  %647 = vmatpush1.bf16.msra.mxu0 %v406_v61  ;;  %v1169_v60 = vunpack.c.l.s8.bf16 %v1101_v56  ;;  %v1185_v61 = vunpack.c.l.s8.bf16 %v1109_v57 }
 0x2c5   :  { %607 = vmatprep.subr.bf16.mxu1 %v421_v62  ;;  %648 = vmatprep.subr.bf16.mxu0 %v423_v63  ;;  %v1097_v62 = vld [vmem:[#allocation7] sm:$0xff] }
 0x2c6   :  { %v1105_v63 = vld [vmem:[#allocation7 + $0x40] sm:$0xff]  ;;  %v1161_v1 = vunpack.c.l.s8.bf16 %v1097_v62  ;;  %v1162_v7 = vunpack.c.h.s8.bf16 %v1097_v62 }
 0x2c7   :  { %v1177_v2 = vunpack.c.l.s8.bf16 %v1105_v63  ;;  %v1178_v8 = vunpack.c.h.s8.bf16 %v1105_v63 }
 0x2c8   :  { %608 = vmatpush1.bf16.msra.mxu1 %v420_v3  ;;  %649 = vmatpush1.bf16.msra.mxu0 %v422_v4  ;;  %v1170_v3 = vunpack.c.h.s8.bf16 %v1101_v56  ;;  %v1186_v4 = vunpack.c.h.s8.bf16 %v1109_v57  ;;  %v4174_v56 = vsub.s32 7, %v4112_v12  ;;  %v4177_v57 = vsub.s32 4, %v4112_v12 }
 0x2c9   :  { %675 = vmatprep.subr.bf16.mxu1 %v313_v5  ;;  %716 = vmatprep.subr.bf16.mxu0 %v315_v6  ;;  %v1102_v5 = vld [vmem:[#allocation7 + $0x28] sm:$0xff] }
 0x2ca   :  { %v1110_v6 = vld [vmem:[#allocation7 + $0x68] sm:$0xff] }
 0x2cb   :  { %626 = vmatmul.mubr.bf16.vlgmr.msra.gmra.mrb[8].mxu1 %v4142_v34  ;;  %667 = vmatmul.mubr.bf16.vlgmr.msra.gmra.mrb[12].mxu0 %v4142_v34 }
 0x2cc   :  { %676 = vmatpush1.bf16.msra.mxu1 %v312_v9  ;;  %717 = vmatpush1.bf16.msra.mxu0 %v314_v10  ;;  %v1171_v9 = vunpack.c.l.s8.bf16 %v1102_v5  ;;  %v1187_v10 = vunpack.c.l.s8.bf16 %v1110_v6 }
 0x2cd   :  { %677 = vmatprep.subr.bf16.mxu1 %v329_v11  ;;  %718 = vmatprep.subr.bf16.mxu0 %v331_v15  ;;  %v1098_v11 = vld [vmem:[#allocation7 + $0x8] sm:$0xff] }
 0x2ce   :  { %707 = vmatprep.mubr.bf16.mxu1 %v3982_v18  ;;  %748 = vmatprep.mubr.bf16.mxu0 %v3982_v18  ;;  %v1106_v15 = vld [vmem:[#allocation7 + $0x48] sm:$0xff]  ;;  %v1163_v16 = vunpack.c.l.s8.bf16 %v1098_v11 }
 0x2cf   :  { %v1179_v17 = vunpack.c.l.s8.bf16 %v1106_v15  ;;  %v1180_v25 = vunpack.c.h.s8.bf16 %v1106_v15 }
 0x2d0   :  { %678 = vmatpush1.bf16.msra.mxu1 %v328_v19  ;;  %719 = vmatpush1.bf16.msra.mxu0 %v330_v20  ;;  %v1172_v19 = vunpack.c.h.s8.bf16 %v1102_v5  ;;  %v1188_v20 = vunpack.c.h.s8.bf16 %v1110_v6 }
 0x2d1   :  { %679 = vmatprep.subr.bf16.mxu1 %v345_v21  ;;  %720 = vmatprep.subr.bf16.mxu0 %v347_v24  ;;  %v1103_v21 = vld [vmem:[#allocation7 + $0x30] sm:$0xff]  ;;  %v1164_v24 = vunpack.c.h.s8.bf16 %v1098_v11 }
 0x2d2   :  { %v1173_v26 = vunpack.c.l.s8.bf16 %v1103_v21  ;;  %v1174_v33 = vunpack.c.h.s8.bf16 %v1103_v21 }
 0x2d4   :  { %680 = vmatpush1.bf16.msra.mxu1 %v344_v27  ;;  %721 = vmatpush1.bf16.msra.mxu0 %v346_v28  ;;  %v1099_v28 = vld [vmem:[#allocation7 + $0x10] sm:$0xff] }
 0x2d5   :  { %681 = vmatprep.subr.bf16.mxu1 %v361_v29  ;;  %722 = vmatprep.subr.bf16.mxu0 %v363_v30  ;;  %v1107_v29 = vld [vmem:[#allocation7 + $0x50] sm:$0xff]  ;;  %v1165_v30 = vunpack.c.l.s8.bf16 %v1099_v28 }
 0x2d6   :  { %v1181_v32 = vunpack.c.l.s8.bf16 %v1107_v29  ;;  %v1182_v14 = vunpack.c.h.s8.bf16 %v1107_v29 }
 0x2d8   :  { %682 = vmatpush1.bf16.msra.mxu1 %v360_v35  ;;  %723 = vmatpush1.bf16.msra.mxu0 %v362_v36  ;;  %v1104_v36 = vld [vmem:[#allocation7 + $0x38] sm:$0xff] }
 0x2d9   :  { %683 = vmatprep.subr.bf16.mxu1 %v377_v37  ;;  %724 = vmatprep.subr.bf16.mxu0 %v379_v38  ;;  %v1112_v37 = vld [vmem:[#allocation7 + $0x78] sm:$0xff]  ;;  %v1166_v38 = vunpack.c.h.s8.bf16 %v1099_v28  ;;  %v1175_v39 = vunpack.c.l.s8.bf16 %v1104_v36  ;;  %v1176_v45 = vunpack.c.h.s8.bf16 %v1104_v36  ;;  %v1113_v36 = vld [vmem:[#allocation7 + $0x80] sm:$0xff] }
 0x2dc   :  { %684 = vmatpush1.bf16.msra.mxu1 %v376_v40  ;;  %725 = vmatpush1.bf16.msra.mxu0 %v378_v41  ;;  %v1191_v40 = vunpack.c.l.s8.bf16 %v1112_v37  ;;  %v1100_v41 = vld [vmem:[#allocation7 + $0x18] sm:$0xff] }
 0x2dd   :  { %685 = vmatprep.subr.bf16.mxu1 %v393_v42  ;;  %726 = vmatprep.subr.bf16.mxu0 %v395_v43  ;;  %v1108_v42 = vld [vmem:[#allocation7 + $0x58] sm:$0xff]  ;;  %v1167_v43 = vunpack.c.l.s8.bf16 %v1100_v41 }
 0x2de   :  { %v1183_v44 = vunpack.c.l.s8.bf16 %v1108_v42  ;;  %v1184_v50 = vunpack.c.h.s8.bf16 %v1108_v42 }
 0x2e0   :  { %686 = vmatpush1.bf16.msra.mxu1 %v392_v46  ;;  %727 = vmatpush1.bf16.msra.mxu0 %v394_v47  ;;  %v1192_v46 = vunpack.c.h.s8.bf16 %v1112_v37  ;;  %v4158_v47 = vld [vmem:[#allocation7 + $0xa0] sm:$0xff] }
 0x2e1   :  { %687 = vmatprep.subr.bf16.mxu1 %v409_v48  ;;  %728 = vmatprep.subr.bf16.mxu0 %v411_v49  ;;  %v4160_v48 = vld [vmem:[#allocation7 + $0xe0] sm:$0xff]  ;;  %v1168_v49 = vunpack.c.h.s8.bf16 %v1100_v41  ;;  %v1201_v51 = vunpack.c.l.s8.bf16 %v4158_v47  ;;  %v1193_v41 = vunpack.c.l.s8.bf16 %v1113_v36 }
 0x2e2   :  { %v1121_v37 = vld [vmem:[#allocation7 + $0xc0] sm:$0xff] }
 0x2e3   :  { %v1209_v42 = vunpack.c.l.s8.bf16 %v1121_v37 }
 0x2e4   :  { %688 = vmatpush1.bf16.msra.mxu1 %v408_v52  ;;  %729 = vmatpush1.bf16.msra.mxu0 %v410_v53  ;;  %v1217_v52 = vunpack.c.l.s8.bf16 %v4160_v48  ;;  %v4165_v53 = vsub.s32 5, %v4112_v12 }
 0x2e5   :  { %689 = vmatprep.subr.bf16.mxu1 %v425_v54  ;;  %730 = vmatprep.subr.bf16.mxu0 %v427_v55  ;;  %v100_v54 = vld [vmem:[%s4416_s4] sm:$0xff]  ;;  %v4171_v55 = vsub.s32 3, %v4112_v12 }
 0x2e6   :  { %v776_v62 = vrot.slane %v100_v54, %v4174_v56  ;;  %v924_v63 = vrot.slane %v100_v54, %v4115_v13 }
 0x2e8   :  { %690 = vmatpush1.bf16.msra.mxu1 %v424_v58  ;;  %731 = vmatpush1.bf16.msra.mxu0 %v426_v59  ;;  %v4180_v58 = vsub.s32 6, %v4112_v12  ;;  %v764_v59 = vrot.slane %v100_v54, %v4128_v22  ;;  %v856_v6 = vrot.slane %v776_v62, %v4128_v22 }
 0x2e9   :  { %3377 = vmatprep.subr.bf16.mxu1 %v1169_v60  ;;  %3399 = vmatprep.subr.bf16.mxu0 %v1185_v61  ;;  %v772_v60 = vrot.slane %v100_v54, %v4165_v53  ;;  %v768_v61 = vrot.slane %v100_v54, %v4171_v55 }
 0x2eb   :  { %708 = vmatmul.mubr.bf16.vlgmr.msra.gmra.mrb[12].mxu1 %v4142_v34  ;;  %749 = vmatmul.mubr.bf16.vlgmr.msra.gmra.mrb[16].mxu0 %v4142_v34  ;;  %v1111_v34 = vld [vmem:[#allocation7 + $0x70] sm:$0xff]  ;;  %v852_v12 = vrot.slane %v772_v60, %v4128_v22  ;;  %v848_v5 = vrot.slane %v768_v61, %v4128_v22  ;;  %v1114_v60 = vld [vmem:[#allocation7 + $0x88] sm:$0xff] }
 0x2ec   :  { %3378 = vmatpush3.bf16.msra.mxu1 %v1161_v1  ;;  %3400 = vmatpush3.bf16.msra.mxu0 %v1177_v2  ;;  %v1189_v27 = vunpack.c.l.s8.bf16 %v1111_v34  ;;  %v1190_v35 = vunpack.c.h.s8.bf16 %v1111_v34  ;;  %v932_v1 = vrot.slane %v100_v54, %v4177_v57  ;;  %v928_v2 = vrot.slane %v100_v54, %v4131_v23  ;;  %v1122_v61 = vld [vmem:[#allocation7 + $0xc8] sm:$0xff] }
 0x2ed   :  { %3379 = vmatprep.subr.bf16.mxu1 %v1170_v3  ;;  %3401 = vmatprep.subr.bf16.mxu0 %v1186_v4  ;;  %v936_v3 = vrot.slane %v100_v54, %v4180_v58  ;;  %v844_v4 = vrot.slane %v764_v59, %v4128_v22 }
 0x2ee   :  { %v1008_v11 = vrot.slane %v928_v2, %v4115_v13  ;;  %v1127_v2 = vld [vmem:[#allocation7 + $0xf0] sm:$0xff] }
 0x2ef   :  { %v1016_v15 = vrot.slane %v936_v3, %v4115_v13  ;;  %v1196_v3 = vunpack.c.h.s8.bf16 %v1114_v60 }
 0x2f0   :  { %3380 = vmatpush3.bf16.msra.mxu1 %v1162_v7  ;;  %3402 = vmatpush3.bf16.msra.mxu0 %v1178_v8  ;;  %v1004_v7 = vrot.slane %v924_v63, %v4115_v13  ;;  %v1012_v8 = vrot.slane %v932_v1, %v4115_v13  ;;  %v1119_v1 = vld [vmem:[#allocation7 + $0xb0] sm:$0xff] }
 0x2f1   :  { %3381 = vmatprep.subr.bf16.mxu1 %v1171_v9  ;;  %3403 = vmatprep.subr.bf16.mxu0 %v1187_v10 }
 0x2f4   :  { %3382 = vmatpush3.bf16.msra.mxu1 %v1163_v16  ;;  %3404 = vmatpush3.bf16.msra.mxu0 %v1179_v17 }
 0x2f5   :  { %3383 = vmatprep.subr.bf16.mxu1 %v1172_v19  ;;  %3405 = vmatprep.subr.bf16.mxu0 %v1188_v20 }
 0x2f8   :  { %3384 = vmatpush3.bf16.msra.mxu1 %v1164_v24  ;;  %3406 = vmatpush3.bf16.msra.mxu0 %v1180_v25 }
 0x2f9   :  { %3385 = vmatprep.subr.bf16.mxu1 %v1173_v26  ;;  %3407 = vmatprep.subr.bf16.mxu0 %v1189_v27 }
 0x2fc   :  { %3386 = vmatpush3.bf16.msra.mxu1 %v1165_v30  ;;  %3408 = vmatpush3.bf16.msra.mxu0 %v1181_v32 }
 0x2fd   :  { %3387 = vmatprep.subr.bf16.mxu1 %v1174_v33  ;;  %3409 = vmatprep.subr.bf16.mxu0 %v1190_v35 }
 0x300   :  { %3388 = vmatpush3.bf16.msra.mxu1 %v1166_v38  ;;  %3410 = vmatpush3.bf16.msra.mxu0 %v1182_v14 }
 0x301   :  { %3389 = vmatprep.subr.bf16.mxu1 %v1175_v39  ;;  %3411 = vmatprep.subr.bf16.mxu0 %v1191_v40 }
 0x304   :  { %3390 = vmatpush3.bf16.msra.mxu1 %v1167_v43  ;;  %3412 = vmatpush3.bf16.msra.mxu0 %v1183_v44 }
 0x305   :  { %3391 = vmatprep.subr.bf16.mxu1 %v1176_v45  ;;  %3413 = vmatprep.subr.bf16.mxu0 %v1192_v46  ;;  %v1202_v45 = vunpack.c.h.s8.bf16 %v4158_v47  ;;  %v1218_v46 = vunpack.c.h.s8.bf16 %v4160_v48  ;;  %v1195_v47 = vunpack.c.l.s8.bf16 %v1114_v60  ;;  %v1211_v48 = vunpack.c.l.s8.bf16 %v1122_v61 }
 0x308   :  { %3392 = vmatpush3.bf16.msra.mxu1 %v1168_v49  ;;  %3414 = vmatpush3.bf16.msra.mxu0 %v1184_v50  ;;  %v1118_v49 = vld [vmem:[#allocation7 + $0xa8] sm:$0xff] }
 0x309   :  { %3421 = vmatprep.subr.bf16.mxu1 %v1201_v51  ;;  %3443 = vmatprep.subr.bf16.mxu0 %v1217_v52  ;;  %v1126_v50 = vld [vmem:[#allocation7 + $0xe8] sm:$0xff]  ;;  %v1194_v51 = vunpack.c.h.s8.bf16 %v1113_v36  ;;  %v1210_v52 = vunpack.c.h.s8.bf16 %v1121_v37  ;;  %v1203_v54 = vunpack.c.l.s8.bf16 %v1118_v49  ;;  %v1204_v62 = vunpack.c.h.s8.bf16 %v1118_v49  ;;  %v1116_v36 = vld [vmem:[#allocation7 + $0x98] sm:$0xff] }
 0x30a   :  { %v1219_v59 = vunpack.c.l.s8.bf16 %v1126_v50  ;;  %v1220_v63 = vunpack.c.h.s8.bf16 %v1126_v50  ;;  %v1124_v37 = vld [vmem:[#allocation7 + $0xd8] sm:$0xff] }
 0x35e   :  { %v463_v9 = vpop.f32.mrb[0].mxu1  ;;  %v504_v10 = vpop.f32.mrb[4].mxu0 }
 0x35f   :  { %v905_v16 = vmul.f32 %v844_v4, %v463_v9  ;;  %v907_v17 = vmul.f32 %v852_v12, %v504_v10  ;;  %v465_v19 = vpop.f32.mrb[1].mxu1  ;;  %v506_v20 = vpop.f32.mrb[5].mxu0  ;;  %v1212_v4 = vunpack.c.h.s8.bf16 %v1122_v61  ;;  %v1205_v12 = vunpack.c.l.s8.bf16 %v1119_v1 }
 0x360   :  { %v906_v21 = vmul.f32 %v848_v5, %v465_v19  ;;  %v908_v34 = vmul.f32 %v856_v6, %v506_v20  ;;  %v467_v24 = vpop.f32.mrb[2].mxu1  ;;  %v508_v25 = vpop.f32.mrb[6].mxu0  ;;  %v1221_v5 = vunpack.c.l.s8.bf16 %v1127_v2  ;;  %v1115_v6 = vld [vmem:[#allocation7 + $0x90] sm:$0xff] }
 0x361   :  { %v1065_v26 = vadd.f32 %v1004_v7, %v905_v16  ;;  %v1067_v27 = vadd.f32 %v1012_v8, %v907_v17  ;;  %v468_v28 = vpop.f32.mrb[3].mxu1  ;;  %v509_v29 = vpop.f32.mrb[7].mxu0  ;;  %v1123_v7 = vld [vmem:[#allocation7 + $0xd0] sm:$0xff]  ;;  %v101_v8 = vld [vmem:[%s4416_s4 + $0x8] sm:$0xff]  ;;  %v1197_v9 = vunpack.c.l.s8.bf16 %v1115_v6 }
 0x362   :  { %v1066_v30 = vadd.f32 %v1008_v11, %v906_v21  ;;  %v1068_v32 = vadd.f32 %v1016_v15, %v908_v34  ;;  %v1213_v10 = vunpack.c.l.s8.bf16 %v1123_v7  ;;  %v1206_v11 = vunpack.c.h.s8.bf16 %v1119_v1  ;;  %v1120_v21 = vld [vmem:[#allocation7 + $0xb8] sm:$0xff] }
 0x363   :  { %v1081_v33 = vmax.f32 %v1065_v26, 0.0  ;;  %v1083_v35 = vmax.f32 %v1067_v27, 0.0  ;;  %v1222_v15 = vunpack.c.h.s8.bf16 %v1127_v2  ;;  %v780_v16 = vrot.slane %v101_v8, %v4128_v22  ;;  %v1128_v34 = vld [vmem:[#allocation7 + $0xf8] sm:$0xff] }
 0x364   :  { %v1082_v38 = vmax.f32 %v1066_v30, 0.0  ;;  %v1084_v14 = vmax.f32 %v1068_v32, 0.0  ;;  %v788_v17 = vrot.slane %v101_v8, %v4165_v53  ;;  %v784_v19 = vrot.slane %v101_v8, %v4171_v55 }
 0x365   :  { %v1289_v43 = vpack.c.bf16 %v1081_v33, %v1081_v33  ;;  %v1291_v44 = vpack.c.bf16 %v1083_v35, %v1083_v35  ;;  %v792_v20 = vrot.slane %v101_v8, %v4174_v56  ;;  %v940_v24 = vrot.slane %v101_v8, %v4115_v13 }
 0x366   :  { %v1290_v39 = vpack.c.bf16 %v1082_v38, %v1082_v38  ;;  %v1292_v40 = vpack.c.bf16 %v1084_v14, %v1084_v14  ;;  %v948_v25 = vrot.slane %v101_v8, %v4177_v57  ;;  %v1198_v26 = vunpack.c.h.s8.bf16 %v1115_v6 }
 0x367   :  { %v1214_v27 = vunpack.c.h.s8.bf16 %v1123_v7  ;;  %v944_v28 = vrot.slane %v101_v8, %v4131_v23  ;;  %v952_v29 = vrot.slane %v101_v8, %v4180_v58  ;;  %v860_v30 = vrot.slane %v780_v16, %v4128_v22  ;;  %v1137_v16 = vld [vmem:[#allocation7 + $0x140] sm:$0xff] }
 0x368   :  { %1337 = vmatprep.mubr.bf16.mxu1 %v1290_v39  ;;  %1377 = vmatprep.mubr.bf16.mxu0 %v1292_v40  ;;  %v868_v32 = vrot.slane %v788_v17, %v4128_v22  ;;  %v1207_v33 = vunpack.c.l.s8.bf16 %v1120_v21  ;;  %v1223_v35 = vunpack.c.l.s8.bf16 %v1128_v34  ;;  %v864_v38 = vrot.slane %v784_v19, %v4128_v22 }
 0x369   :  { %1338 = vmatmul.mubr.bf16.vlgmr.msra.gmra.mrb[16].mxu1 %v1289_v43  ;;  %1378 = vmatmul.mubr.bf16.vlgmr.msra.gmra.mrb[20].mxu0 %v1291_v44  ;;  %v872_v14 = vrot.slane %v792_v20, %v4128_v22  ;;  %v1020_v39 = vrot.slane %v940_v24, %v4115_v13  ;;  %v1028_v40 = vrot.slane %v948_v25, %v4115_v13  ;;  %v1200_v6 = vunpack.c.h.s8.bf16 %v1116_v36 }
 0x36a   :  { %3422 = vmatpush3.bf16.msra.mxu1 %v1193_v41  ;;  %3444 = vmatpush3.bf16.msra.mxu0 %v1209_v42  ;;  %v1024_v43 = vrot.slane %v944_v28, %v4115_v13  ;;  %v1032_v44 = vrot.slane %v952_v29, %v4115_v13  ;;  %v1216_v7 = vunpack.c.h.s8.bf16 %v1124_v37  ;;  %v1241_v24 = vunpack.c.l.s8.bf16 %v1137_v16  ;;  %v1134_v29 = vld [vmem:[#allocation7 + $0x128] sm:$0xff] }
 0x36b   :  { %3423 = vmatprep.subr.bf16.mxu1 %v1202_v45  ;;  %3445 = vmatprep.subr.bf16.mxu0 %v1218_v46  ;;  %v1199_v45 = vunpack.c.l.s8.bf16 %v1116_v36  ;;  %v1215_v46 = vunpack.c.l.s8.bf16 %v1124_v37  ;;  %v1130_v37 = vld [vmem:[#allocation7 + $0x108] sm:$0xff] }
 0x36e   :  { %3424 = vmatpush3.bf16.msra.mxu1 %v1194_v51  ;;  %3446 = vmatpush3.bf16.msra.mxu0 %v1210_v52 }
 0x36f   :  { %3425 = vmatprep.subr.bf16.mxu1 %v1203_v54  ;;  %3447 = vmatprep.subr.bf16.mxu0 %v1219_v59  ;;  %v1208_v54 = vunpack.c.h.s8.bf16 %v1120_v21  ;;  %v1224_v59 = vunpack.c.h.s8.bf16 %v1128_v34 }
 0x372   :  { %3426 = vmatpush3.bf16.msra.mxu1 %v1195_v47  ;;  %3448 = vmatpush3.bf16.msra.mxu0 %v1211_v48 }
 0x373   :  { %3427 = vmatprep.subr.bf16.mxu1 %v1204_v62  ;;  %3449 = vmatprep.subr.bf16.mxu0 %v1220_v63  ;;  %v1133_v62 = vld [vmem:[#allocation7 + $0x120] sm:$0xff] }
 0x374   :  { %v1141_v63 = vld [vmem:[#allocation7 + $0x160] sm:$0xff] }
 0x375   :  { %v1250_v28 = vunpack.c.h.s8.bf16 %v1141_v63 }
 0x376   :  { %3428 = vmatpush3.bf16.msra.mxu1 %v1196_v3  ;;  %3450 = vmatpush3.bf16.msra.mxu0 %v1212_v4 }
 0x377   :  { %3429 = vmatprep.subr.bf16.mxu1 %v1205_v12  ;;  %3451 = vmatprep.subr.bf16.mxu0 %v1221_v5 }
 0x37a   :  { %3430 = vmatpush3.bf16.msra.mxu1 %v1197_v9  ;;  %3452 = vmatpush3.bf16.msra.mxu0 %v1213_v10  ;;  %v1233_v10 = vunpack.c.l.s8.bf16 %v1133_v62 }
 0x37b   :  { %3431 = vmatprep.subr.bf16.mxu1 %v1206_v11  ;;  %3453 = vmatprep.subr.bf16.mxu0 %v1222_v15  ;;  %v1249_v11 = vunpack.c.l.s8.bf16 %v1141_v63  ;;  %v1129_v15 = vld [vmem:[#allocation7 + $0x100] sm:$0xff] }
 0x37c   :  { %v1225_v34 = vunpack.c.l.s8.bf16 %v1129_v15 }
 0x37e   :  { %v545_v41 = vpop.f32.mrb[4].mxu1  ;;  %v586_v42 = vpop.f32.mrb[8].mxu0  ;;  %3432 = vmatpush3.bf16.msra.mxu1 %v1198_v26  ;;  %3454 = vmatpush3.bf16.msra.mxu0 %v1214_v27  ;;  %v1234_v27 = vunpack.c.h.s8.bf16 %v1133_v62 }
 0x37f   :  { %v909_v49 = vmul.f32 %v860_v30, %v545_v41  ;;  %v911_v50 = vmul.f32 %v868_v32, %v586_v42  ;;  %v547_v51 = vpop.f32.mrb[5].mxu1  ;;  %v588_v52 = vpop.f32.mrb[9].mxu0  ;;  %3433 = vmatprep.subr.bf16.mxu1 %v1207_v33  ;;  %3455 = vmatprep.subr.bf16.mxu0 %v1223_v35  ;;  %v1142_v30 = vld [vmem:[#allocation7 + $0x168] sm:$0xff]  ;;  %v1226_v32 = vunpack.c.h.s8.bf16 %v1129_v15  ;;  %v1242_v33 = vunpack.c.h.s8.bf16 %v1137_v16  ;;  %v1135_v42 = vld [vmem:[#allocation7 + $0x130] sm:$0xff]  ;;  %v1132_v15 = vld [vmem:[#allocation7 + $0x118] sm:$0xff] }
 0x380   :  { %v910_v60 = vmul.f32 %v864_v38, %v547_v51  ;;  %v912_v61 = vmul.f32 %v872_v14, %v588_v52  ;;  %v549_v47 = vpop.f32.mrb[6].mxu1  ;;  %v590_v48 = vpop.f32.mrb[10].mxu0  ;;  %v1235_v35 = vunpack.c.l.s8.bf16 %v1134_v29  ;;  %v1251_v36 = vunpack.c.l.s8.bf16 %v1142_v30  ;;  %v1138_v38 = vld [vmem:[#allocation7 + $0x148] sm:$0xff]  ;;  %v1139_v51 = vld [vmem:[#allocation7 + $0x150] sm:$0xff]  ;;  %v102_v52 = vld [vmem:[%s4416_s4 + $0x10] sm:$0xff] }
 0x381   :  { %v1069_v1 = vadd.f32 %v1020_v39, %v909_v49  ;;  %v1071_v2 = vadd.f32 %v1028_v40, %v911_v50  ;;  %v550_v3 = vpop.f32.mrb[7].mxu1  ;;  %v591_v4 = vpop.f32.mrb[11].mxu0  ;;  %v1227_v14 = vunpack.c.l.s8.bf16 %v1130_v37  ;;  %v1243_v39 = vunpack.c.l.s8.bf16 %v1138_v38  ;;  %v1131_v50 = vld [vmem:[#allocation7 + $0x110] sm:$0xff]  ;;  %v1140_v16 = vld [vmem:[#allocation7 + $0x158] sm:$0xff] }
 0x382   :  { %v1070_v12 = vadd.f32 %v1024_v43, %v910_v60  ;;  %v1072_v5 = vadd.f32 %v1032_v44, %v912_v61  ;;  %3434 = vmatpush3.bf16.msra.mxu1 %v1199_v45  ;;  %3456 = vmatpush3.bf16.msra.mxu0 %v1215_v46  ;;  %v1236_v40 = vunpack.c.h.s8.bf16 %v1134_v29  ;;  %v1252_v41 = vunpack.c.h.s8.bf16 %v1142_v30  ;;  %v1143_v43 = vld [vmem:[#allocation7 + $0x170] sm:$0xff] }
 0x383   :  { %v1085_v8 = vmax.f32 %v1069_v1, 0.0  ;;  %v1087_v9 = vmax.f32 %v1071_v2, 0.0  ;;  %3435 = vmatprep.subr.bf16.mxu1 %v1208_v54  ;;  %3457 = vmatprep.subr.bf16.mxu0 %v1224_v59  ;;  %v1228_v44 = vunpack.c.h.s8.bf16 %v1130_v37  ;;  %v1244_v45 = vunpack.c.h.s8.bf16 %v1138_v38  ;;  %v1136_v1 = vld [vmem:[#allocation7 + $0x138] sm:$0xff] }
 0x384   :  { %v1086_v17 = vmax.f32 %v1070_v12, 0.0  ;;  %v1088_v19 = vmax.f32 %v1072_v5, 0.0  ;;  %v1237_v46 = vunpack.c.l.s8.bf16 %v1135_v42  ;;  %v1253_v49 = vunpack.c.l.s8.bf16 %v1143_v43  ;;  %v1144_v2 = vld [vmem:[#allocation7 + $0x178] sm:$0xff] }
 0x385   :  { %v1293_v25 = vpack.c.bf16 %v1085_v8, %v1085_v8  ;;  %v1295_v26 = vpack.c.bf16 %v1087_v9, %v1087_v9  ;;  %v1229_v54 = vunpack.c.l.s8.bf16 %v1131_v50  ;;  %v1245_v59 = vunpack.c.l.s8.bf16 %v1139_v51 }
 0x386   :  { %v1294_v20 = vpack.c.bf16 %v1086_v17, %v1086_v17  ;;  %v1296_v21 = vpack.c.bf16 %v1088_v19, %v1088_v19  ;;  %3436 = vmatpush3.bf16.msra.mxu1 %v1200_v6  ;;  %3458 = vmatpush3.bf16.msra.mxu0 %v1216_v7  ;;  %v1238_v60 = vunpack.c.h.s8.bf16 %v1135_v42  ;;  %v1254_v61 = vunpack.c.h.s8.bf16 %v1143_v43 }
 0x387   :  { %3465 = vmatprep.subr.bf16.mxu1 %v1233_v10  ;;  %3487 = vmatprep.subr.bf16.mxu0 %v1249_v11  ;;  %v796_v47 = vrot.slane %v102_v52, %v4128_v22  ;;  %v804_v48 = vrot.slane %v102_v52, %v4165_v53  ;;  %v800_v62 = vrot.slane %v102_v52, %v4171_v55  ;;  %v1230_v12 = vunpack.c.h.s8.bf16 %v1131_v50 }
 0x388   :  { %1417 = vmatprep.mubr.bf16.mxu1 %v1294_v20  ;;  %1457 = vmatprep.mubr.bf16.mxu0 %v1296_v21  ;;  %v808_v63 = vrot.slane %v102_v52, %v4174_v56  ;;  %v956_v3 = vrot.slane %v102_v52, %v4115_v13  ;;  %v964_v4 = vrot.slane %v102_v52, %v4177_v57  ;;  %v1246_v5 = vunpack.c.h.s8.bf16 %v1139_v51 }
 0x389   :  { %1418 = vmatmul.mubr.bf16.vlgmr.msra.gmra.mrb[20].mxu1 %v1293_v25  ;;  %1458 = vmatmul.mubr.bf16.vlgmr.msra.gmra.mrb[24].mxu0 %v1295_v26  ;;  %v960_v6 = vrot.slane %v102_v52, %v4131_v23  ;;  %v968_v7 = vrot.slane %v102_v52, %v4180_v58  ;;  %v876_v8 = vrot.slane %v796_v47, %v4128_v22  ;;  %v1239_v10 = vunpack.c.l.s8.bf16 %v1136_v1  ;;  %v1153_v47 = vld [vmem:[#allocation7 + $0x1c0] sm:$0xff] }
 0x38a   :  { %3466 = vmatpush3.bf16.msra.mxu1 %v1225_v34  ;;  %3488 = vmatpush3.bf16.msra.mxu0 %v1241_v24  ;;  %v884_v9 = vrot.slane %v804_v48, %v4128_v22  ;;  %v1255_v11 = vunpack.c.l.s8.bf16 %v1144_v2  ;;  %v880_v17 = vrot.slane %v800_v62, %v4128_v22  ;;  %v888_v19 = vrot.slane %v808_v63, %v4128_v22 }
 0x38b   :  { %3467 = vmatprep.subr.bf16.mxu1 %v1234_v27  ;;  %3489 = vmatprep.subr.bf16.mxu0 %v1250_v28  ;;  %v1036_v20 = vrot.slane %v956_v3, %v4115_v13  ;;  %v1044_v21 = vrot.slane %v964_v4, %v4115_v13  ;;  %v1040_v25 = vrot.slane %v960_v6, %v4115_v13  ;;  %v1231_v27 = vunpack.c.l.s8.bf16 %v1132_v15 }
 0x38c   :  { %v1048_v26 = vrot.slane %v968_v7, %v4115_v13  ;;  %v1247_v28 = vunpack.c.l.s8.bf16 %v1140_v16  ;;  %v1232_v50 = vunpack.c.h.s8.bf16 %v1132_v15  ;;  %v1248_v51 = vunpack.c.h.s8.bf16 %v1140_v16  ;;  %v1150_v7 = vld [vmem:[#allocation7 + $0x1a8] sm:$0xff] }
 0x38d   :  { %v1273_v3 = vunpack.c.l.s8.bf16 %v1153_v47  ;;  %v1146_v16 = vld [vmem:[#allocation7 + $0x188] sm:$0xff] }
 0x38e   :  { %3468 = vmatpush3.bf16.msra.mxu1 %v1226_v32  ;;  %3490 = vmatpush3.bf16.msra.mxu0 %v1242_v33 }
 0x38f   :  { %3469 = vmatprep.subr.bf16.mxu1 %v1235_v35  ;;  %3491 = vmatprep.subr.bf16.mxu0 %v1251_v36  ;;  %v1240_v35 = vunpack.c.h.s8.bf16 %v1136_v1  ;;  %v1256_v36 = vunpack.c.h.s8.bf16 %v1144_v2 }
 0x392   :  { %3470 = vmatpush3.bf16.msra.mxu1 %v1227_v14  ;;  %3492 = vmatpush3.bf16.msra.mxu0 %v1243_v39 }
 0x393   :  { %3471 = vmatprep.subr.bf16.mxu1 %v1236_v40  ;;  %3493 = vmatprep.subr.bf16.mxu0 %v1252_v41  ;;  %v1149_v40 = vld [vmem:[#allocation7 + $0x1a0] sm:$0xff] }
 0x394   :  { %v1157_v41 = vld [vmem:[#allocation7 + $0x1e0] sm:$0xff] }
 0x395   :  { %v1282_v6 = vunpack.c.h.s8.bf16 %v1157_v41 }
 0x396   :  { %3472 = vmatpush3.bf16.msra.mxu1 %v1228_v44  ;;  %3494 = vmatpush3.bf16.msra.mxu0 %v1244_v45 }
 0x397   :  { %3473 = vmatprep.subr.bf16.mxu1 %v1237_v46  ;;  %3495 = vmatprep.subr.bf16.mxu0 %v1253_v49 }
 0x39a   :  { %3474 = vmatpush3.bf16.msra.mxu1 %v1229_v54  ;;  %3496 = vmatpush3.bf16.msra.mxu0 %v1245_v59  ;;  %v1265_v59 = vunpack.c.l.s8.bf16 %v1149_v40 }
 0x39b   :  { %3475 = vmatprep.subr.bf16.mxu1 %v1238_v60  ;;  %3497 = vmatprep.subr.bf16.mxu0 %v1254_v61  ;;  %v1281_v60 = vunpack.c.l.s8.bf16 %v1157_v41  ;;  %v1145_v61 = vld [vmem:[#allocation7 + $0x180] sm:$0xff] }
 0x39c   :  { %v1257_v2 = vunpack.c.l.s8.bf16 %v1145_v61 }
 0x39e   :  { %v627_v34 = vpop.f32.mrb[8].mxu1  ;;  %v668_v24 = vpop.f32.mrb[12].mxu0  ;;  %3476 = vmatpush3.bf16.msra.mxu1 %v1230_v12  ;;  %3498 = vmatpush3.bf16.msra.mxu0 %v1246_v5  ;;  %v1266_v5 = vunpack.c.h.s8.bf16 %v1149_v40 }
 0x39f   :  { %v913_v29 = vmul.f32 %v876_v8, %v627_v34  ;;  %v915_v30 = vmul.f32 %v884_v9, %v668_v24  ;;  %v629_v32 = vpop.f32.mrb[9].mxu1  ;;  %v670_v33 = vpop.f32.mrb[13].mxu0  ;;  %3477 = vmatprep.subr.bf16.mxu1 %v1239_v10  ;;  %3499 = vmatprep.subr.bf16.mxu0 %v1255_v11  ;;  %v1158_v8 = vld [vmem:[#allocation7 + $0x1e8] sm:$0xff]  ;;  %v1258_v9 = vunpack.c.h.s8.bf16 %v1145_v61  ;;  %v1274_v10 = vunpack.c.h.s8.bf16 %v1153_v47  ;;  %v1151_v24 = vld [vmem:[#allocation7 + $0x1b0] sm:$0xff]  ;;  %v1148_v61 = vld [vmem:[#allocation7 + $0x198] sm:$0xff] }
 0x3a0   :  { %v914_v37 = vmul.f32 %v880_v17, %v629_v32  ;;  %v916_v38 = vmul.f32 %v888_v19, %v670_v33  ;;  %v631_v14 = vpop.f32.mrb[10].mxu1  ;;  %v672_v39 = vpop.f32.mrb[14].mxu0  ;;  %v1267_v11 = vunpack.c.l.s8.bf16 %v1150_v7  ;;  %v1283_v15 = vunpack.c.l.s8.bf16 %v1158_v8  ;;  %v1154_v17 = vld [vmem:[#allocation7 + $0x1c8] sm:$0xff]  ;;  %v1155_v32 = vld [vmem:[#allocation7 + $0x1d0] sm:$0xff]  ;;  %v1156_v47 = vld [vmem:[#allocation7 + $0x1d8] sm:$0xff] }
 0x3a1   :  { %v1073_v42 = vadd.f32 %v1036_v20, %v913_v29  ;;  %v1075_v43 = vadd.f32 %v1044_v21, %v915_v30  ;;  %v632_v44 = vpop.f32.mrb[11].mxu1  ;;  %v673_v45 = vpop.f32.mrb[15].mxu0  ;;  %v1259_v19 = vunpack.c.l.s8.bf16 %v1146_v16  ;;  %v1275_v20 = vunpack.c.l.s8.bf16 %v1154_v17  ;;  %v1147_v30 = vld [vmem:[#allocation7 + $0x190] sm:$0xff]  ;;  %v103_v33 = vld [vmem:[%s4416_s4 + $0x18] sm:$0xff] }
 0x3a2   :  { %v1074_v46 = vadd.f32 %v1040_v25, %v914_v37  ;;  %v1076_v49 = vadd.f32 %v1048_v26, %v916_v38  ;;  %3478 = vmatpush3.bf16.msra.mxu1 %v1231_v27  ;;  %3500 = vmatpush3.bf16.msra.mxu0 %v1247_v28  ;;  %v1268_v21 = vunpack.c.h.s8.bf16 %v1150_v7  ;;  %v1284_v34 = vunpack.c.h.s8.bf16 %v1158_v8  ;;  %v1159_v25 = vld [vmem:[#allocation7 + $0x1f0] sm:$0xff] }
 0x3a3   :  { %v1089_v52 = vmax.f32 %v1073_v42, 0.0  ;;  %v1091_v54 = vmax.f32 %v1075_v43, 0.0  ;;  %3479 = vmatprep.subr.bf16.mxu1 %v1240_v35  ;;  %3501 = vmatprep.subr.bf16.mxu0 %v1256_v36  ;;  %v1260_v26 = vunpack.c.h.s8.bf16 %v1146_v16  ;;  %v1276_v27 = vunpack.c.h.s8.bf16 %v1154_v17  ;;  %v1152_v42 = vld [vmem:[#allocation7 + $0x1b8] sm:$0xff] }
 0x3a4   :  { %v1090_v48 = vmax.f32 %v1074_v46, 0.0  ;;  %v1092_v62 = vmax.f32 %v1076_v49, 0.0  ;;  %v1269_v28 = vunpack.c.l.s8.bf16 %v1151_v24  ;;  %v1285_v29 = vunpack.c.l.s8.bf16 %v1159_v25  ;;  %v1160_v43 = vld [vmem:[#allocation7 + $0x1f8] sm:$0xff] }
 0x3a5   :  { %v1297_v4 = vpack.c.bf16 %v1089_v52, %v1089_v52  ;;  %v1299_v12 = vpack.c.bf16 %v1091_v54, %v1091_v54  ;;  %v1261_v35 = vunpack.c.l.s8.bf16 %v1147_v30  ;;  %v1277_v36 = vunpack.c.l.s8.bf16 %v1155_v32 }
 0x3a6   :  { %v1298_v63 = vpack.c.bf16 %v1090_v48, %v1090_v48  ;;  %v1300_v1 = vpack.c.bf16 %v1092_v62, %v1092_v62  ;;  %3480 = vmatpush3.bf16.msra.mxu1 %v1232_v50  ;;  %3502 = vmatpush3.bf16.msra.mxu0 %v1248_v51  ;;  %v1270_v37 = vunpack.c.h.s8.bf16 %v1151_v24  ;;  %v1286_v38 = vunpack.c.h.s8.bf16 %v1159_v25 }
 0x3a7   :  { %3509 = vmatprep.subr.bf16.mxu1 %v1265_v59  ;;  %3531 = vmatprep.subr.bf16.mxu0 %v1281_v60  ;;  %v812_v14 = vrot.slane %v103_v33, %v4128_v22  ;;  %v820_v39 = vrot.slane %v103_v33, %v4165_v53  ;;  %v816_v40 = vrot.slane %v103_v33, %v4171_v55  ;;  %v1262_v46 = vunpack.c.h.s8.bf16 %v1147_v30 }
 0x3a8   :  { %1497 = vmatprep.mubr.bf16.mxu1 %v1298_v63  ;;  %1537 = vmatprep.mubr.bf16.mxu0 %v1300_v1  ;;  %v824_v41 = vrot.slane %v103_v33, %v4174_v56  ;;  %v972_v44 = vrot.slane %v103_v33, %v4115_v13  ;;  %v980_v45 = vrot.slane %v103_v33, %v4177_v57  ;;  %v1278_v49 = vunpack.c.h.s8.bf16 %v1155_v32 }
 0x3a9   :  { %1498 = vmatmul.mubr.bf16.vlgmr.msra.gmra.mrb[24].mxu1 %v1297_v4  ;;  %1538 = vmatmul.mubr.bf16.vlgmr.msra.gmra.mrb[28].mxu0 %v1299_v12  ;;  %v976_v50 = vrot.slane %v103_v33, %v4131_v23  ;;  %v984_v51 = vrot.slane %v103_v33, %v4180_v58  ;;  %v892_v52 = vrot.slane %v812_v14, %v4128_v22  ;;  %v1271_v59 = vunpack.c.l.s8.bf16 %v1152_v42 }
 0x3aa   :  { %3510 = vmatpush3.bf16.msra.mxu1 %v1257_v2  ;;  %3532 = vmatpush3.bf16.msra.mxu0 %v1273_v3  ;;  %v900_v54 = vrot.slane %v820_v39, %v4128_v22  ;;  %v1287_v60 = vunpack.c.l.s8.bf16 %v1160_v43  ;;  %v896_v48 = vrot.slane %v816_v40, %v4128_v22  ;;  %v904_v62 = vrot.slane %v824_v41, %v4128_v22 }
 0x3ab   :  { %3511 = vmatprep.subr.bf16.mxu1 %v1266_v5  ;;  %3533 = vmatprep.subr.bf16.mxu0 %v1282_v6  ;;  %v1052_v63 = vrot.slane %v972_v44, %v4115_v13  ;;  %v1060_v1 = vrot.slane %v980_v45, %v4115_v13  ;;  %v1056_v4 = vrot.slane %v976_v50, %v4115_v13  ;;  %v1263_v5 = vunpack.c.l.s8.bf16 %v1148_v61 }
 0x3ac   :  { %v1064_v12 = vrot.slane %v984_v51, %v4115_v13  ;;  %v1279_v6 = vunpack.c.l.s8.bf16 %v1156_v47 }
 0x3ae   :  { %3512 = vmatpush3.bf16.msra.mxu1 %v1258_v9  ;;  %3534 = vmatpush3.bf16.msra.mxu0 %v1274_v10 }
 0x3af   :  { %3513 = vmatprep.subr.bf16.mxu1 %v1267_v11  ;;  %3535 = vmatprep.subr.bf16.mxu0 %v1283_v15  ;;  %v1272_v11 = vunpack.c.h.s8.bf16 %v1152_v42  ;;  %v1288_v15 = vunpack.c.h.s8.bf16 %v1160_v43 }
 0x3b2   :  { %3514 = vmatpush3.bf16.msra.mxu1 %v1259_v19  ;;  %3536 = vmatpush3.bf16.msra.mxu0 %v1275_v20 }
 0x3b3   :  { %3515 = vmatprep.subr.bf16.mxu1 %v1268_v21  ;;  %3537 = vmatprep.subr.bf16.mxu0 %v1284_v34 }
 0x3b6   :  { %3516 = vmatpush3.bf16.msra.mxu1 %v1260_v26  ;;  %3538 = vmatpush3.bf16.msra.mxu0 %v1276_v27 }
 0x3b7   :  { %3517 = vmatprep.subr.bf16.mxu1 %v1269_v28  ;;  %3539 = vmatprep.subr.bf16.mxu0 %v1285_v29  ;;  %v1264_v28 = vunpack.c.h.s8.bf16 %v1148_v61  ;;  %v1280_v29 = vunpack.c.h.s8.bf16 %v1156_v47 }
 0x3ba   :  { %3518 = vmatpush3.bf16.msra.mxu1 %v1261_v35  ;;  %3540 = vmatpush3.bf16.msra.mxu0 %v1277_v36 }
 0x3bb   :  { %3519 = vmatprep.subr.bf16.mxu1 %v1270_v37  ;;  %3541 = vmatprep.subr.bf16.mxu0 %v1286_v38 }
 0x3be   :  { %v709_v2 = vpop.f32.mrb[12].mxu1  ;;  %v750_v3 = vpop.f32.mrb[16].mxu0  ;;  %3520 = vmatpush3.bf16.msra.mxu1 %v1262_v46  ;;  %3542 = vmatpush3.bf16.msra.mxu0 %v1278_v49 }
 0x3bf   :  { %v917_v7 = vmul.f32 %v892_v52, %v709_v2  ;;  %v919_v8 = vmul.f32 %v900_v54, %v750_v3  ;;  %v711_v9 = vpop.f32.mrb[13].mxu1  ;;  %v752_v10 = vpop.f32.mrb[17].mxu0  ;;  %3521 = vmatprep.subr.bf16.mxu1 %v1271_v59  ;;  %3543 = vmatprep.subr.bf16.mxu0 %v1287_v60 }
 0x3c0   :  { %v918_v16 = vmul.f32 %v896_v48, %v711_v9  ;;  %v920_v17 = vmul.f32 %v904_v62, %v752_v10  ;;  %v713_v19 = vpop.f32.mrb[14].mxu1  ;;  %v754_v20 = vpop.f32.mrb[18].mxu0 }
 0x3c1   :  { %v1077_v21 = vadd.f32 %v1052_v63, %v917_v7  ;;  %v1079_v34 = vadd.f32 %v1060_v1, %v919_v8  ;;  %v714_v24 = vpop.f32.mrb[15].mxu1  ;;  %v755_v25 = vpop.f32.mrb[19].mxu0 }
 0x3c2   :  { %v1078_v26 = vadd.f32 %v1056_v4, %v918_v16  ;;  %v1080_v27 = vadd.f32 %v1064_v12, %v920_v17  ;;  %3522 = vmatpush3.bf16.msra.mxu1 %v1263_v5  ;;  %3544 = vmatpush3.bf16.msra.mxu0 %v1279_v6 }
 0x3c3   :  { %v1093_v30 = vmax.f32 %v1077_v21, 0.0  ;;  %v1095_v32 = vmax.f32 %v1079_v34, 0.0  ;;  %3523 = vmatprep.subr.bf16.mxu1 %v1272_v11  ;;  %3545 = vmatprep.subr.bf16.mxu0 %v1288_v15 }
 0x3c4   :  { %v1094_v33 = vmax.f32 %v1078_v26, 0.0  ;;  %v1096_v35 = vmax.f32 %v1080_v27, 0.0 }
 0x3c5   :  { %v1301_v38 = vpack.c.bf16 %v1093_v30, %v1093_v30  ;;  %v1303_v14 = vpack.c.bf16 %v1095_v32, %v1095_v32  ;;  %v3852_v32 = vld [vmem:[#allocation4] sm:$0xff] }
 0x3c6   :  { %v1302_v36 = vpack.c.bf16 %v1094_v33, %v1094_v33  ;;  %v1304_v37 = vpack.c.bf16 %v1096_v35, %v1096_v35  ;;  %3524 = vmatpush3.bf16.msra.mxu1 %v1264_v28  ;;  %3546 = vmatpush3.bf16.msra.mxu0 %v1280_v29  ;;  %v1628_v33 = vrot.slane %v3852_v32, %v4180_v58 }
 0x3c7   :  { %3767 = vmatprep.subr.bf16.mxu1 %v3980_v0 }
 0x3c8   :  { %1577 = vmatprep.mubr.bf16.mxu1 %v1302_v36  ;;  %1617 = vmatprep.mubr.bf16.mxu0 %v1304_v37  ;;  %v1633_v36 = vrot.slane %v3852_v32, %v4171_v55 }
 0x3c9   :  { %1578 = vmatmul.mubr.bf16.vlgmr.msra.gmra.mrb[28].mxu1 %v1301_v38  ;;  %1618 = vmatmul.mubr.bf16.vlgmr.msra.gmra.mrb[32].mxu0 %v1303_v14 }
 0x3ca   :  { %3783 = vmatprep.mubr.msk.bf16.mxu1 %vm3981_vm0, %v3980_v0  ;;  %2022 = vmatprep.mubr.bf16.mxu0 %v3982_v18 }
 0x43c   :  { %v3393_v39 = vpop.f32.mrb[16].mxu1  ;;  %v3415_v40 = vpop.f32.mrb[20].mxu0 }
 0x43d   :  { %v3394_v41 = vpop.f32.mrb[17].mxu1  ;;  %v3416_v42 = vpop.f32.mrb[21].mxu0 }
 0x43e   :  { %v3395_v43 = vadd.f32 %v3394_v41, %v3393_v39  ;;  %v3417_v44 = vadd.f32 %v3416_v42, %v3415_v40  ;;  %v3396_v45 = vpop.f32.mrb[18].mxu1  ;;  %v3418_v46 = vpop.f32.mrb[22].mxu0  ;;  %v3828_v39 = vld [vmem:[#allocation2 + $0x40] sm:$0xff]   ;;  %v3829_v40 = vld [vmem:[#allocation2 + $0x48] sm:$0xff]  }
 0x43f   :  { %v3397_v49 = vpop.f32.mrb[19].mxu1  ;;  %v3419_v50 = vpop.f32.mrb[23].mxu0  ;;  %3768 = vmatpush3.bf16.msra.mxu1 %v3828_v39  ;;  %v3830_v45 = vld [vmem:[#allocation2 + $0x50] sm:$0xff]   ;;  %v3831_v46 = vld [vmem:[#allocation2 + $0x58] sm:$0xff]  }
 0x440   :  { %v1380_v51 = vadd.f32 %v3417_v44, %v3395_v43  ;;  %3769 = vmatprep.subr.bf16.mxu1 %v3980_v0  ;;  %v3833_v49 = vld [vmem:[#allocation2 + $0x68] sm:$0xff]   ;;  %v3834_v50 = vld [vmem:[#allocation2 + $0x70] sm:$0xff]  }
 0x443   :  { %3770 = vmatpush3.bf16.msra.mxu1 %v3829_v40 }
 0x444   :  { %3771 = vmatprep.subr.bf16.mxu1 %v3980_v0 }
 0x447   :  { %3772 = vmatpush3.bf16.msra.mxu1 %v3830_v45 }
 0x448   :  { %3773 = vmatprep.subr.bf16.mxu1 %v3980_v0 }
 0x44b   :  { %3774 = vmatpush3.bf16.msra.mxu1 %v3831_v46 }
 0x44c   :  { %3775 = vmatprep.subr.bf16.mxu1 %v3980_v0 }
 0x45c   :  { %v3437_v52 = vpop.f32.mrb[20].mxu1  ;;  %v3459_v54 = vpop.f32.mrb[24].mxu0 }
 0x45d   :  { %v3438_v59 = vpop.f32.mrb[21].mxu1  ;;  %v3460_v60 = vpop.f32.mrb[25].mxu0 }
 0x45e   :  { %v3439_v61 = vadd.f32 %v3438_v59, %v3437_v52  ;;  %v3461_v47 = vadd.f32 %v3460_v60, %v3459_v54  ;;  %v3440_v48 = vpop.f32.mrb[22].mxu1  ;;  %v3462_v62 = vpop.f32.mrb[26].mxu0  ;;  %v1650_v60 = vrot.slane %v3852_v32, %v4177_v57 }
 0x45f   :  { %v3441_v63 = vpop.f32.mrb[23].mxu1  ;;  %v3463_v1 = vpop.f32.mrb[27].mxu0  ;;  %v1655_v48 = vrot.slane %v3852_v32, %v4165_v53  ;;  %v1815_v32 = vld [vmem:[#allocation6 + $0x290] sm:$0xff] }
 0x460   :  { %v1420_v2 = vadd.f32 %v3439_v61, %v1380_v51  ;;  %v3835_v51 = vld [vmem:[#allocation2 + $0x78] sm:$0xff]  }
 0x462   :  { %v1460_v3 = vadd.f32 %v3461_v47, %v1420_v2  ;;  %v4274_v2 = vld [vmem:[#allocation4 + $0x8] sm:$0xff] }
 0x47c   :  { %v3481_v4 = vpop.f32.mrb[24].mxu1  ;;  %v3503_v12 = vpop.f32.mrb[28].mxu0 }
 0x47d   :  { %v3482_v5 = vpop.f32.mrb[25].mxu1  ;;  %v3504_v6 = vpop.f32.mrb[29].mxu0 }
 0x47e   :  { %v3483_v7 = vadd.f32 %v3482_v5, %v3481_v4  ;;  %v3505_v8 = vadd.f32 %v3504_v6, %v3503_v12  ;;  %v3484_v9 = vpop.f32.mrb[26].mxu1  ;;  %v3506_v10 = vpop.f32.mrb[30].mxu0 }
 0x47f   :  { %v3485_v11 = vpop.f32.mrb[27].mxu1  ;;  %v3507_v15 = vpop.f32.mrb[31].mxu0  ;;  %v1798_v9 = vld [vmem:[#allocation6 + $0x208] sm:$0xff]  ;;  %v1800_v10 = vld [vmem:[#allocation6 + $0x218] sm:$0xff] }
 0x480   :  { %v1500_v16 = vadd.f32 %v3483_v7, %v1460_v3  ;;  %v1685_v3 = vrot.slane %v4274_v2, %v4115_v13  ;;  %v1797_v11 = vld [vmem:[#allocation6 + $0x200] sm:$0xff]  ;;  %v1862_v15 = vunpack.c.l.s8.bf16 %v1798_v9 }
 0x482   :  { %v1540_v17 = vadd.f32 %v3505_v8, %v1500_v16  ;;  %v1864_v16 = vunpack.c.l.s8.bf16 %v1800_v10  ;;  %1990 = vmatprep.subr.bf16.mxu0 %v1862_v15 }
 0x49c   :  { %v3525_v19 = vpop.f32.mrb[28].mxu1  ;;  %v3547_v20 = vpop.f32.mrb[32].mxu0 }
 0x49d   :  { %v3526_v21 = vpop.f32.mrb[29].mxu1  ;;  %v3548_v34 = vpop.f32.mrb[33].mxu0 }
 0x49e   :  { %v3527_v24 = vadd.f32 %v3526_v21, %v3525_v19  ;;  %v3549_v25 = vadd.f32 %v3548_v34, %v3547_v20  ;;  %v3528_v26 = vpop.f32.mrb[30].mxu1  ;;  %v3550_v27 = vpop.f32.mrb[34].mxu0  ;;  %v1799_v19 = vld [vmem:[#allocation6 + $0x210] sm:$0xff]  ;;  %v1878_v20 = vunpack.c.h.s8.bf16 %v1798_v9  ;;  %v1880_v34 = vunpack.c.h.s8.bf16 %v1800_v10  ;;  %v1804_v9 = vld [vmem:[#allocation6 + $0x238] sm:$0xff] }
 0x49f   :  { %v3529_v28 = vpop.f32.mrb[31].mxu1  ;;  %v3551_v29 = vpop.f32.mrb[35].mxu0  ;;  %v1863_v21 = vunpack.c.l.s8.bf16 %v1799_v19  ;;  %v1877_v26 = vunpack.c.h.s8.bf16 %v1797_v11  ;;  %v1879_v27 = vunpack.c.h.s8.bf16 %v1799_v19  ;;  %v1789_v19 = vrot.slane %v4274_v2, %v4128_v22 }
 0x4a0   :  { %v1580_v30 = vadd.f32 %v3527_v24, %v1540_v17  ;;  %v1861_v17 = vunpack.c.l.s8.bf16 %v1797_v11  ;;  %v1814_v24 = vld [vmem:[#allocation6 + $0x288] sm:$0xff]  ;;  %v1868_v11 = vunpack.c.l.s8.bf16 %v1804_v9 }
 0x4a1   :  { %v1894_v28 = vunpack.c.l.s8.bf16 %v1814_v24  ;;  %v1910_v39 = vunpack.c.h.s8.bf16 %v1814_v24 }
 0x4a2   :  { %v1620_v35 = vadd.f32 %v3549_v25, %v1580_v30  ;;  %v1816_v25 = vld [vmem:[#allocation6 + $0x298] sm:$0xff]  ;;  %1991 = vmatpush1.bf16.msra.mxu0 %v1861_v17  ;;  %v1813_v30 = vld [vmem:[#allocation6 + $0x280] sm:$0xff] }
 0x4a3   :  { %1992 = vmatprep.subr.bf16.mxu0 %v1878_v20  ;;  %v1896_v29 = vunpack.c.l.s8.bf16 %v1816_v25  ;;  %v1912_v40 = vunpack.c.h.s8.bf16 %v1816_v25  ;;  %v1801_v25 = vld [vmem:[#allocation6 + $0x220] sm:$0xff] }
 0x4a4   :  { %v1629_v37 = vmul.f32 %v1628_v33, %v1620_v35  ;;  %v1893_v33 = vunpack.c.l.s8.bf16 %v1813_v30  ;;  %v1895_v35 = vunpack.c.l.s8.bf16 %v1815_v32 }
 0x4a6   :  { %v1634_v38 = vadd.f32 %v1633_v36, %v1629_v37  ;;  %1993 = vmatpush1.bf16.msra.mxu0 %v1877_v26  ;;  %v1803_v26 = vld [vmem:[#allocation6 + $0x230] sm:$0xff] }
 0x4a7   :  { %1994 = vmatprep.subr.bf16.mxu0 %v1894_v28  ;;  %v1865_v28 = vunpack.c.l.s8.bf16 %v1801_v25 }
 0x4a8   :  { %v1635_v14 = vadd.f32 %v1634_v38, %v4138_v31  ;;  %v3832_v31 = vld [vmem:[#allocation2 + $0x60] sm:$0xff]  }
 0x4a9   :  { %3776 = vmatpush3.bf16.msra.mxu1 %v3832_v31  ;;  %v1829_v31 = vld [vmem:[#allocation6 + $0x300] sm:$0xff] }
 0x4aa   :  { %1636 = vadd.xlane.f32.xlu1 %v1635_v14  ;;  %3777 = vmatprep.subr.bf16.mxu1 %v3980_v0 }
 0x4ab   :  { %1995 = vmatpush1.bf16.msra.mxu0 %v1893_v33  ;;  %v1884_v33 = vunpack.c.h.s8.bf16 %v1804_v9 }
 0x4ac   :  { %1996 = vmatprep.subr.bf16.mxu0 %v1910_v39  ;;  %v1817_v39 = vld [vmem:[#allocation6 + $0x2a0] sm:$0xff] }
 0x4ad   :  { %3778 = vmatpush3.bf16.msra.mxu1 %v3833_v49  ;;  %v1831_v49 = vld [vmem:[#allocation6 + $0x310] sm:$0xff] }
 0x4ae   :  { %3779 = vmatprep.subr.bf16.mxu1 %v3980_v0 }
 0x4b1   :  { %3780 = vmatpush3.bf16.msra.mxu1 %v3834_v50  ;;  %v1925_v50 = vunpack.c.l.s8.bf16 %v1829_v31 }
 0x4b2   :  { %3781 = vmatprep.subr.bf16.mxu1 %v3980_v0 }
 0x4b5   :  { %3782 = vmatpush3.bf16.msra.mxu1 %v3835_v51  ;;  %v1927_v51 = vunpack.c.l.s8.bf16 %v1831_v49 }
 0x4b6   :  { %2031 = vmatprep.subr.bf16.mxu1 %v1864_v16 }
 0x537   :  { %v1637_v41 = vpop.xlane.xlu1 %1636 }
 0x538   :  { %v1638_v42 = vmul.f32 0.0078125, %v1637_v41  ;;  %v1909_v41 = vunpack.c.h.s8.bf16 %v1813_v30 }
 0x53a   :  { %v1639_v43 = vsub.f32 %v1635_v14, %v1638_v42  ;;  %v1911_v42 = vunpack.c.h.s8.bf16 %v1815_v32  ;;  %1997 = vmatpush1.bf16.msra.mxu0 %v1909_v41  ;;  %v1897_v41 = vunpack.c.l.s8.bf16 %v1817_v39 }
 0x53c   :  { %v1640_v44 = vmul.f32 %v1639_v43, %v1639_v43 }
 0x53e   :  { %1641 = vadd.xlane.f32.xlu1 %v1640_v44  ;;  %v1832_v44 = vld [vmem:[#allocation6 + $0x318] sm:$0xff] }
 0x53f   :  { %v1928_v46 = vunpack.c.l.s8.bf16 %v1832_v44 }
 0x5cb   :  { %v1642_v52 = vpop.xlane.xlu1 %1641 }
 0x5cc   :  { %v1643_v54 = vmul.f32 0.0078125, %v1642_v52 }
 0x5ce   :  { %v1644_v59 = vadd.f32 1e-05, %v1643_v54  ;;  %v1944_v54 = vunpack.c.h.s8.bf16 %v1832_v44 }
 0x5d0   :  { %3846 = vrsqrt.f32 %v1644_v59  ;;  %v1941_v59 = vunpack.c.h.s8.bf16 %v1829_v31  ;;  %v1913_v31 = vunpack.c.h.s8.bf16 %v1817_v39 }
 0x5da   :  { %v3847_v61 = vpop.eup %3846 }
 0x5db   :  { %v1646_v47 = vmul.f32 %v3847_v61, %v1639_v43  ;;  %v1830_v43 = vld [vmem:[#allocation6 + $0x308] sm:$0xff] }
 0x5dc   :  { %v1926_v45 = vunpack.c.l.s8.bf16 %v1830_v43  ;;  %v1942_v52 = vunpack.c.h.s8.bf16 %v1830_v43  ;;  %v1846_v61 = vld [vmem:[#allocation6 + $0x388] sm:$0xff] }
 0x5dd   :  { %v1651_v62 = vmul.f32 %v1650_v60, %v1646_v47  ;;  %v1943_v60 = vunpack.c.h.s8.bf16 %v1831_v49  ;;  %v1848_v47 = vld [vmem:[#allocation6 + $0x398] sm:$0xff] }
 0x5de   :  { %1998 = vmatprep.subr.bf16.mxu0 %v1926_v45  ;;  %v1834_v45 = vld [vmem:[#allocation6 + $0x328] sm:$0xff] }
 0x5df   :  { %v1656_v63 = vadd.f32 %v1655_v48, %v1651_v62  ;;  %1999 = vmatpush1.bf16.msra.mxu0 %v1925_v50  ;;  %v1958_v48 = vunpack.c.l.s8.bf16 %v1846_v61  ;;  %v1960_v62 = vunpack.c.l.s8.bf16 %v1848_v47  ;;  %v1930_v50 = vunpack.c.l.s8.bf16 %v1834_v45 }
 0x5e0   :  { %2000 = vmatprep.subr.bf16.mxu0 %v1942_v52  ;;  %v1833_v52 = vld [vmem:[#allocation6 + $0x320] sm:$0xff] }
 0x5e1   :  { %v1664_v1 = vpack.c.bf16 %v1656_v63, %v1656_v63 }
 0x5e3   :  { %3784 = vmatmul.mubr.bf16.vlgmr.msra.gmra.mrb[32].mxu1 %v1664_v1  ;;  %2001 = vmatpush1.bf16.msra.mxu0 %v1941_v59  ;;  %v1847_v1 = vld [vmem:[#allocation6 + $0x390] sm:$0xff]  ;;  %v1929_v59 = vunpack.c.l.s8.bf16 %v1833_v52 }
 0x5e4   :  { %2063 = vmatprep.mubr.bf16.mxu1 %v3982_v18  ;;  %2032 = vmatpush1.bf16.msra.mxu1 %v1863_v21  ;;  %v1794_v21 = vrot.slane %v4274_v2, %v4131_v23  ;;  %v1881_v2 = vunpack.c.h.s8.bf16 %v1801_v25 }
 0x5e5   :  { %2033 = vmatprep.subr.bf16.mxu1 %v1880_v34  ;;  %2002 = vmatprep.subr.bf16.mxu0 %v1958_v48  ;;  %v1850_v48 = vld [vmem:[#allocation6 + $0x3a8] sm:$0xff] }
 0x5e8   :  { %2034 = vmatpush1.bf16.msra.mxu1 %v1879_v27 }
 0x5e9   :  { %2035 = vmatprep.subr.bf16.mxu1 %v1896_v29  ;;  %v1867_v29 = vunpack.c.l.s8.bf16 %v1803_v26 }
 0x5ec   :  { %2036 = vmatpush1.bf16.msra.mxu1 %v1895_v35  ;;  %v1818_v35 = vld [vmem:[#allocation6 + $0x2a8] sm:$0xff] }
 0x5ed   :  { %2037 = vmatprep.subr.bf16.mxu1 %v1912_v40  ;;  %v1819_v40 = vld [vmem:[#allocation6 + $0x2b0] sm:$0xff]  ;;  %v1914_v43 = vunpack.c.h.s8.bf16 %v1818_v35 }
 0x5ee   :  { %v1915_v49 = vunpack.c.h.s8.bf16 %v1819_v40 }
 0x5f0   :  { %2038 = vmatpush1.bf16.msra.mxu1 %v1911_v42  ;;  %v1899_v42 = vunpack.c.l.s8.bf16 %v1819_v40 }
 0x5f1   :  { %2039 = vmatprep.subr.bf16.mxu1 %v1928_v46  ;;  %v1836_v46 = vld [vmem:[#allocation6 + $0x338] sm:$0xff] }
 0x5f4   :  { %2040 = vmatpush1.bf16.msra.mxu1 %v1927_v51  ;;  %v1932_v51 = vunpack.c.l.s8.bf16 %v1836_v46 }
 0x5f5   :  { %2041 = vmatprep.subr.bf16.mxu1 %v1944_v54  ;;  %v1835_v54 = vld [vmem:[#allocation6 + $0x330] sm:$0xff] }
 0x5f8   :  { %2042 = vmatpush1.bf16.msra.mxu1 %v1943_v60  ;;  %v1931_v60 = vunpack.c.l.s8.bf16 %v1835_v54 }
 0x5f9   :  { %2043 = vmatprep.subr.bf16.mxu1 %v1960_v62  ;;  %v1852_v62 = vld [vmem:[#allocation6 + $0x3b8] sm:$0xff] }
 0x5fa   :  { %v1980_v9 = vunpack.c.h.s8.bf16 %v1852_v62 }
 0x6b6   :  { %v1768_v4 = vpop.f32.mrb[32].mxu1 }
 0x6b7   :  { %v1769_v12 = vadd.f32 %v1768_v4, %v1685_v3  ;;  %v3785_v5 = vpop.f32.mrb[33].mxu1  ;;  %v1959_v4 = vunpack.c.l.s8.bf16 %v1847_v1 }
 0x6b8   :  { %v1771_v6 = vpop.f32.mrb[34].mxu1  ;;  %v1976_v5 = vunpack.c.h.s8.bf16 %v1848_v47  ;;  %v1948_v47 = vunpack.c.h.s8.bf16 %v1836_v46 }
 0x6b9   :  { %v3786_v7 = vpop.f32.mrb[35].mxu1  ;;  %v1774_v8 = vadd.f32 %v1769_v12, %v1656_v63  ;;  %v1845_v63 = vld [vmem:[#allocation6 + $0x380] sm:$0xff]  ;;  %2044 = vmatpush1.bf16.msra.mxu1 %v1959_v4  ;;  %v1974_v12 = vunpack.c.h.s8.bf16 %v1846_v61  ;;  %v1946_v61 = vunpack.c.h.s8.bf16 %v1834_v45  ;;  %v1964_v4 = vunpack.c.l.s8.bf16 %v1852_v62 }
 0x6ba   :  { %v1957_v3 = vunpack.c.l.s8.bf16 %v1845_v63  ;;  %v1973_v6 = vunpack.c.h.s8.bf16 %v1845_v63  ;;  %v1975_v7 = vunpack.c.h.s8.bf16 %v1847_v1  ;;  %2045 = vmatprep.subr.bf16.mxu1 %v1976_v5  ;;  %v1945_v63 = vunpack.c.h.s8.bf16 %v1833_v52  ;;  %v1851_v5 = vld [vmem:[#allocation6 + $0x3b0] sm:$0xff] }
 0x6bb   :  { %1775 = vadd.xlane.f32.xlu0 %v1774_v8  ;;  %v1947_v1 = vunpack.c.h.s8.bf16 %v1835_v54 }
 0x6bc   :  { %2003 = vmatpush1.bf16.msra.mxu0 %v1957_v3  ;;  %v1962_v3 = vunpack.c.l.s8.bf16 %v1850_v48 }
 0x6bd   :  { %2004 = vmatprep.subr.bf16.mxu0 %v1974_v12  ;;  %2046 = vmatpush1.bf16.msra.mxu1 %v1975_v7  ;;  %v1849_v12 = vld [vmem:[#allocation6 + $0x3a0] sm:$0xff]  ;;  %v1963_v7 = vunpack.c.l.s8.bf16 %v1851_v5 }
 0x6be   :  { %2113 = vmatprep.subr.bf16.mxu1 %v1868_v11  ;;  %v1808_v11 = vld [vmem:[#allocation6 + $0x258] sm:$0xff] }
 0x6c0   :  { %2005 = vmatpush1.bf16.msra.mxu0 %v1973_v6  ;;  %v1961_v6 = vunpack.c.l.s8.bf16 %v1849_v12 }
 0x748   :  { %v1776_v36 = vpop.xlane.xlu0 %1775 }
 0x749   :  { %v1777_v37 = vmul.f32 0.0078125, %v1776_v36  ;;  %v1820_v36 = vld [vmem:[#allocation6 + $0x2b8] sm:$0xff] }
 0x74a   :  { %v1916_v44 = vunpack.c.h.s8.bf16 %v1820_v36 }
 0x74b   :  { %v4278_v38 = vsub.f32 %v1774_v8, %v1777_v37  ;;  %v1802_v8 = vld [vmem:[#allocation6 + $0x228] sm:$0xff]  ;;  %v1883_v37 = vunpack.c.h.s8.bf16 %v1803_v26  ;;  %v1888_v26 = vunpack.c.h.s8.bf16 %v1808_v11 }
 0x74c   :  { %v1866_v10 = vunpack.c.l.s8.bf16 %v1802_v8  ;;  %v1882_v32 = vunpack.c.h.s8.bf16 %v1802_v8  ;;  %v1978_v8 = vunpack.c.h.s8.bf16 %v1850_v48 }
 0x74d   :  { %v1779_v14 = vmul.f32 %v4278_v38, %v4278_v38 }
 0x74e   :  { %2072 = vmatprep.subr.bf16.mxu0 %v1866_v10  ;;  %v1806_v10 = vld [vmem:[#allocation6 + $0x248] sm:$0xff] }
 0x74f   :  { %1780 = vadd.xlane.f32.xlu1 %v1779_v14  ;;  %v1900_v14 = vunpack.c.l.s8.bf16 %v1820_v36  ;;  %v1886_v25 = vunpack.c.h.s8.bf16 %v1806_v10 }
 0x7dc   :  { %v1781_v15 = vpop.xlane.xlu1 %1780 }
 0x7dd   :  { %v1782_v16 = vmul.f32 0.0078125, %v1781_v15  ;;  %v1977_v15 = vunpack.c.h.s8.bf16 %v1849_v12 }
 0x7df   :  { %v1783_v17 = vadd.f32 1e-05, %v1782_v16  ;;  %v1979_v16 = vunpack.c.h.s8.bf16 %v1851_v5 }
 0x7e1   :  { %3848 = vrsqrt.f32 %v1783_v17  ;;  %v1870_v17 = vunpack.c.l.s8.bf16 %v1806_v10 }
 0x7eb   :  { %v3849_v20 = vpop.eup %3848 }
 0x7ec   :  { %v1785_v34 = vmul.f32 %v3849_v20, %v4278_v38  ;;  %v1898_v38 = vunpack.c.l.s8.bf16 %v1818_v35  ;;  %v1805_v20 = vld [vmem:[#allocation6 + $0x240] sm:$0xff] }
 0x7ee   :  { %v1790_v24 = vmul.f32 %v1789_v19, %v1785_v34  ;;  %v1872_v19 = vunpack.c.l.s8.bf16 %v1808_v11  ;;  %v1869_v34 = vunpack.c.l.s8.bf16 %v1805_v20 }
 0x7f0   :  { %v4287_v27 = vadd.f32 %v1794_v21, %v1790_v24  ;;  %v1807_v21 = vld [vmem:[#allocation6 + $0x250] sm:$0xff] }
 0x7f1   :  { %v1871_v24 = vunpack.c.l.s8.bf16 %v1807_v21 }
 0x7f2   :  { %v4291_v30 = vpack.c.bf16 %v4287_v27, %v4287_v27 }
 0x7f4   :  { %2023 = vmatmul.mubr.bf16.vlgmr.msra.gmra.mrb[36].mxu0 %v4291_v30  ;;  %2064 = vmatmul.mubr.bf16.vlgmr.msra.gmra.mrb[36].mxu1 %v4291_v30 }
 0x7f5   :  { %2073 = vmatpush1.bf16.msra.mxu0 %v1865_v28  ;;  %2114 = vmatpush1.bf16.msra.mxu1 %v1867_v29  ;;  %v1822_v28 = vld [vmem:[#allocation6 + $0x2c8] sm:$0xff]  ;;  %v1824_v29 = vld [vmem:[#allocation6 + $0x2d8] sm:$0xff] }
 0x7f6   :  { %2074 = vmatprep.subr.bf16.mxu0 %v1882_v32  ;;  %2115 = vmatprep.subr.bf16.mxu1 %v1884_v33  ;;  %v1885_v32 = vunpack.c.h.s8.bf16 %v1805_v20  ;;  %v1887_v33 = vunpack.c.h.s8.bf16 %v1807_v21  ;;  %v1902_v35 = vunpack.c.l.s8.bf16 %v1822_v28  ;;  %v1904_v36 = vunpack.c.l.s8.bf16 %v1824_v29 }
 0x7f7   :  { %2104 = vmatprep.mubr.bf16.mxu0 %v3982_v18  ;;  %2145 = vmatprep.mubr.bf16.mxu1 %v3982_v18  ;;  %v1918_v39 = vunpack.c.h.s8.bf16 %v1822_v28  ;;  %v1920_v40 = vunpack.c.h.s8.bf16 %v1824_v29 }
 0x7f9   :  { %2075 = vmatpush1.bf16.msra.mxu0 %v1881_v2  ;;  %2116 = vmatpush1.bf16.msra.mxu1 %v1883_v37  ;;  %v1821_v2 = vld [vmem:[#allocation6 + $0x2c0] sm:$0xff]  ;;  %v1823_v37 = vld [vmem:[#allocation6 + $0x2d0] sm:$0xff] }
 0x7fa   :  { %2076 = vmatprep.subr.bf16.mxu0 %v1898_v38  ;;  %2117 = vmatprep.subr.bf16.mxu1 %v1900_v14  ;;  %v1901_v38 = vunpack.c.l.s8.bf16 %v1821_v2  ;;  %v1903_v14 = vunpack.c.l.s8.bf16 %v1823_v37 }
 0x7fd   :  { %2077 = vmatpush1.bf16.msra.mxu0 %v1897_v41  ;;  %2118 = vmatpush1.bf16.msra.mxu1 %v1899_v42  ;;  %v1838_v41 = vld [vmem:[#allocation6 + $0x348] sm:$0xff]  ;;  %v1840_v42 = vld [vmem:[#allocation6 + $0x358] sm:$0xff] }
 0x7fe   :  { %2078 = vmatprep.subr.bf16.mxu0 %v1914_v43  ;;  %2119 = vmatprep.subr.bf16.mxu1 %v1916_v44  ;;  %v1917_v43 = vunpack.c.h.s8.bf16 %v1821_v2  ;;  %v1919_v44 = vunpack.c.h.s8.bf16 %v1823_v37  ;;  %v1934_v45 = vunpack.c.l.s8.bf16 %v1838_v41  ;;  %v1936_v46 = vunpack.c.l.s8.bf16 %v1840_v42 }
 0x7ff   :  { %v1950_v52 = vunpack.c.h.s8.bf16 %v1838_v41  ;;  %v1952_v54 = vunpack.c.h.s8.bf16 %v1840_v42 }
 0x801   :  { %2079 = vmatpush1.bf16.msra.mxu0 %v1913_v31  ;;  %2120 = vmatpush1.bf16.msra.mxu1 %v1915_v49  ;;  %v1837_v31 = vld [vmem:[#allocation6 + $0x340] sm:$0xff]  ;;  %v1839_v49 = vld [vmem:[#allocation6 + $0x350] sm:$0xff] }
 0x802   :  { %2080 = vmatprep.subr.bf16.mxu0 %v1930_v50  ;;  %2121 = vmatprep.subr.bf16.mxu1 %v1932_v51  ;;  %v1933_v50 = vunpack.c.l.s8.bf16 %v1837_v31  ;;  %v1935_v51 = vunpack.c.l.s8.bf16 %v1839_v49 }
 0x805   :  { %2081 = vmatpush1.bf16.msra.mxu0 %v1929_v59  ;;  %2122 = vmatpush1.bf16.msra.mxu1 %v1931_v60  ;;  %v1854_v59 = vld [vmem:[#allocation6 + $0x3c8] sm:$0xff]  ;;  %v1856_v60 = vld [vmem:[#allocation6 + $0x3d8] sm:$0xff] }
 0x806   :  { %2082 = vmatprep.subr.bf16.mxu0 %v1946_v61  ;;  %2123 = vmatprep.subr.bf16.mxu1 %v1948_v47  ;;  %v1949_v61 = vunpack.c.h.s8.bf16 %v1837_v31  ;;  %v1951_v47 = vunpack.c.h.s8.bf16 %v1839_v49  ;;  %v1966_v48 = vunpack.c.l.s8.bf16 %v1854_v59  ;;  %v1968_v62 = vunpack.c.l.s8.bf16 %v1856_v60  ;;  %v1858_v49 = vld [vmem:[#allocation6 + $0x3e8] sm:$0xff] }
 0x807   :  { %v1982_v12 = vunpack.c.h.s8.bf16 %v1854_v59  ;;  %v1984_v5 = vunpack.c.h.s8.bf16 %v1856_v60  ;;  %v1857_v60 = vld [vmem:[#allocation6 + $0x3e0] sm:$0xff] }
 0x809   :  { %2083 = vmatpush1.bf16.msra.mxu0 %v1945_v63  ;;  %2124 = vmatpush1.bf16.msra.mxu1 %v1947_v1  ;;  %v1853_v63 = vld [vmem:[#allocation6 + $0x3c0] sm:$0xff]  ;;  %v1855_v1 = vld [vmem:[#allocation6 + $0x3d0] sm:$0xff] }
 0x80a   :  { %2084 = vmatprep.subr.bf16.mxu0 %v1962_v3  ;;  %2125 = vmatprep.subr.bf16.mxu1 %v1964_v4  ;;  %v1965_v3 = vunpack.c.l.s8.bf16 %v1853_v63  ;;  %v1967_v4 = vunpack.c.l.s8.bf16 %v1855_v1 }
 0x80d   :  { %2085 = vmatpush1.bf16.msra.mxu0 %v1961_v6  ;;  %2126 = vmatpush1.bf16.msra.mxu1 %v1963_v7  ;;  %v1810_v6 = vld [vmem:[#allocation6 + $0x268] sm:$0xff]  ;;  %v1812_v7 = vld [vmem:[#allocation6 + $0x278] sm:$0xff] }
 0x80e   :  { %2086 = vmatprep.subr.bf16.mxu0 %v1978_v8  ;;  %2127 = vmatprep.subr.bf16.mxu1 %v1980_v9  ;;  %v1981_v8 = vunpack.c.h.s8.bf16 %v1853_v63  ;;  %v1983_v9 = vunpack.c.h.s8.bf16 %v1855_v1  ;;  %v1874_v10 = vunpack.c.l.s8.bf16 %v1810_v6  ;;  %v1876_v11 = vunpack.c.l.s8.bf16 %v1812_v7  ;;  %v2663_v1 = vld [vmem:[#allocation7 + $0x220] sm:$0xff] }
 0x80f   :  { %v1890_v20 = vunpack.c.h.s8.bf16 %v1810_v6  ;;  %v1892_v21 = vunpack.c.h.s8.bf16 %v1812_v7  ;;  %v2659_v7 = vld [vmem:[#allocation7 + $0x200] sm:$0xff] }
 0x811   :  { %2087 = vmatpush1.bf16.msra.mxu0 %v1977_v15  ;;  %2128 = vmatpush1.bf16.msra.mxu1 %v1979_v16  ;;  %v1809_v15 = vld [vmem:[#allocation6 + $0x260] sm:$0xff]  ;;  %v1811_v16 = vld [vmem:[#allocation6 + $0x270] sm:$0xff] }
 0x812   :  { %2154 = vmatprep.subr.bf16.mxu0 %v1870_v17  ;;  %2195 = vmatprep.subr.bf16.mxu1 %v1872_v19  ;;  %v1873_v17 = vunpack.c.l.s8.bf16 %v1809_v15  ;;  %v1875_v19 = vunpack.c.l.s8.bf16 %v1811_v16 }
 0x814   :  { %2105 = vmatmul.mubr.bf16.vlgmr.msra.gmra.mrb[40].mxu0 %v4291_v30  ;;  %2146 = vmatmul.mubr.bf16.vlgmr.msra.gmra.mrb[40].mxu1 %v4291_v30 }
 0x815   :  { %2155 = vmatpush1.bf16.msra.mxu0 %v1869_v34  ;;  %2196 = vmatpush1.bf16.msra.mxu1 %v1871_v24  ;;  %v1826_v34 = vld [vmem:[#allocation6 + $0x2e8] sm:$0xff]  ;;  %v1828_v24 = vld [vmem:[#allocation6 + $0x2f8] sm:$0xff] }
 0x816   :  { %2156 = vmatprep.subr.bf16.mxu0 %v1886_v25  ;;  %2197 = vmatprep.subr.bf16.mxu1 %v1888_v26  ;;  %v1889_v25 = vunpack.c.h.s8.bf16 %v1809_v15  ;;  %v1891_v26 = vunpack.c.h.s8.bf16 %v1811_v16  ;;  %v1906_v28 = vunpack.c.l.s8.bf16 %v1826_v34  ;;  %v1908_v29 = vunpack.c.l.s8.bf16 %v1828_v24  ;;  %v2664_v16 = vld [vmem:[#allocation7 + $0x228] sm:$0xff] }
 0x817   :  { %2186 = vmatprep.mubr.bf16.mxu0 %v3982_v18  ;;  %2227 = vmatprep.mubr.bf16.mxu1 %v3982_v18  ;;  %v1922_v2 = vunpack.c.h.s8.bf16 %v1826_v34  ;;  %v1924_v37 = vunpack.c.h.s8.bf16 %v1828_v24  ;;  %v2660_v24 = vld [vmem:[#allocation7 + $0x208] sm:$0xff] }
 0x819   :  { %2157 = vmatpush1.bf16.msra.mxu0 %v1885_v32  ;;  %2198 = vmatpush1.bf16.msra.mxu1 %v1887_v33  ;;  %v1825_v32 = vld [vmem:[#allocation6 + $0x2e0] sm:$0xff]  ;;  %v1827_v33 = vld [vmem:[#allocation6 + $0x2f0] sm:$0xff] }
 0x81a   :  { %2158 = vmatprep.subr.bf16.mxu0 %v1902_v35  ;;  %2199 = vmatprep.subr.bf16.mxu1 %v1904_v36  ;;  %v1905_v35 = vunpack.c.l.s8.bf16 %v1825_v32  ;;  %v1907_v36 = vunpack.c.l.s8.bf16 %v1827_v33 }
 0x81d   :  { %2159 = vmatpush1.bf16.msra.mxu0 %v1901_v38  ;;  %2200 = vmatpush1.bf16.msra.mxu1 %v1903_v14  ;;  %v1842_v38 = vld [vmem:[#allocation6 + $0x368] sm:$0xff]  ;;  %v1844_v14 = vld [vmem:[#allocation6 + $0x378] sm:$0xff] }
 0x81e   :  { %2160 = vmatprep.subr.bf16.mxu0 %v1918_v39  ;;  %2201 = vmatprep.subr.bf16.mxu1 %v1920_v40  ;;  %v1921_v39 = vunpack.c.h.s8.bf16 %v1825_v32  ;;  %v1923_v40 = vunpack.c.h.s8.bf16 %v1827_v33  ;;  %v1938_v41 = vunpack.c.l.s8.bf16 %v1842_v38  ;;  %v1940_v42 = vunpack.c.l.s8.bf16 %v1844_v14  ;;  %v2665_v33 = vld [vmem:[#allocation7 + $0x230] sm:$0xff] }
 0x81f   :  { %v1956_v31 = vunpack.c.h.s8.bf16 %v1844_v14  ;;  %v2669_v14 = vld [vmem:[#allocation7 + $0x250] sm:$0xff] }
 0x821   :  { %2161 = vmatpush1.bf16.msra.mxu0 %v1917_v43  ;;  %2202 = vmatpush1.bf16.msra.mxu1 %v1919_v44  ;;  %v1841_v43 = vld [vmem:[#allocation6 + $0x360] sm:$0xff] }
 0x822   :  { %2162 = vmatprep.subr.bf16.mxu0 %v1934_v45  ;;  %2203 = vmatprep.subr.bf16.mxu1 %v1936_v46  ;;  %v1937_v44 = vunpack.c.l.s8.bf16 %v1841_v43  ;;  %v1954_v46 = vunpack.c.h.s8.bf16 %v1842_v38  ;;  %v2661_v38 = vld [vmem:[#allocation7 + $0x210] sm:$0xff] }
 0x825   :  { %2163 = vmatpush1.bf16.msra.mxu0 %v1933_v50  ;;  %2204 = vmatpush1.bf16.msra.mxu1 %v1935_v51  ;;  %v1860_v50 = vld [vmem:[#allocation6 + $0x3f8] sm:$0xff]  ;;  %v1953_v51 = vunpack.c.h.s8.bf16 %v1841_v43 }
 0x826   :  { %2164 = vmatprep.subr.bf16.mxu0 %v1950_v52  ;;  %2205 = vmatprep.subr.bf16.mxu1 %v1952_v54  ;;  %v1970_v54 = vunpack.c.l.s8.bf16 %v1858_v49  ;;  %v1972_v59 = vunpack.c.l.s8.bf16 %v1860_v50  ;;  %v1988_v63 = vunpack.c.h.s8.bf16 %v1860_v50  ;;  %v2666_v43 = vld [vmem:[#allocation7 + $0x238] sm:$0xff] }
 0x827   :  { %v2670_v50 = vld [vmem:[#allocation7 + $0x258] sm:$0xff] }
 0x829   :  { %2165 = vmatpush1.bf16.msra.mxu0 %v1949_v61  ;;  %2206 = vmatpush1.bf16.msra.mxu1 %v1951_v47  ;;  %v1859_v61 = vld [vmem:[#allocation6 + $0x3f0] sm:$0xff]  ;;  %v1969_v47 = vunpack.c.l.s8.bf16 %v1857_v60 }
 0x82a   :  { %2166 = vmatprep.subr.bf16.mxu0 %v1966_v48  ;;  %2207 = vmatprep.subr.bf16.mxu1 %v1968_v62  ;;  %v1971_v48 = vunpack.c.l.s8.bf16 %v1859_v61  ;;  %v1986_v62 = vunpack.c.h.s8.bf16 %v1858_v49  ;;  %v2662_v49 = vld [vmem:[#allocation7 + $0x218] sm:$0xff] }
 0x82d   :  { %2167 = vmatpush1.bf16.msra.mxu0 %v1965_v3  ;;  %2208 = vmatpush1.bf16.msra.mxu1 %v1967_v4  ;;  %v2671_v3 = vld [vmem:[#allocation7 + $0x260] sm:$0xff]  ;;  %v1985_v4 = vunpack.c.h.s8.bf16 %v1857_v60 }
 0x82e   :  { %2168 = vmatprep.subr.bf16.mxu0 %v1982_v12  ;;  %2209 = vmatprep.subr.bf16.mxu1 %v1984_v5  ;;  %v1987_v12 = vunpack.c.h.s8.bf16 %v1859_v61  ;;  %v2731_v5 = vunpack.c.l.s8.bf16 %v2663_v1  ;;  %v2747_v6 = vunpack.c.l.s8.bf16 %v2671_v3  ;;  %v2748_v15 = vunpack.c.h.s8.bf16 %v2671_v3  ;;  %v4307_v60 = vld [vmem:[#allocation7 + $0x2a0] sm:$0xff] }
 0x82f   :  { %v4309_v61 = vld [vmem:[#allocation7 + $0x2e0] sm:$0xff] }
 0x831   :  { %2169 = vmatpush1.bf16.msra.mxu0 %v1981_v8  ;;  %2210 = vmatpush1.bf16.msra.mxu1 %v1983_v9  ;;  %v2667_v8 = vld [vmem:[#allocation7 + $0x240] sm:$0xff]  ;;  %v2723_v9 = vunpack.c.l.s8.bf16 %v2659_v7 }
 0x832   :  { %2236 = vmatprep.subr.bf16.mxu0 %v1874_v10  ;;  %2277 = vmatprep.subr.bf16.mxu1 %v1876_v11  ;;  %v2739_v10 = vunpack.c.l.s8.bf16 %v2667_v8  ;;  %v2732_v11 = vunpack.c.h.s8.bf16 %v2663_v1  ;;  %v3347_v1 = vld [vmem:[%s4416_s4 + $0x20] sm:$0xff] }
 0x833   :  { %v2325_v3 = vrot.slane %v3347_v1, %v4128_v22 }
 0x834   :  { %2187 = vmatmul.mubr.bf16.vlgmr.msra.gmra.mrb[44].mxu0 %v4291_v30  ;;  %2228 = vmatmul.mubr.bf16.vlgmr.msra.gmra.mrb[44].mxu1 %v4291_v30 }
 0x835   :  { %2237 = vmatpush1.bf16.msra.mxu0 %v1873_v17  ;;  %2278 = vmatpush1.bf16.msra.mxu1 %v1875_v19  ;;  %v2672_v17 = vld [vmem:[#allocation7 + $0x268] sm:$0xff]  ;;  %v2724_v19 = vunpack.c.h.s8.bf16 %v2659_v7  ;;  %v2493_v7 = vrot.slane %v3347_v1, %v4177_v57 }
 0x836   :  { %2238 = vmatprep.subr.bf16.mxu0 %v1890_v20  ;;  %2279 = vmatprep.subr.bf16.mxu1 %v1892_v21  ;;  %v2740_v20 = vunpack.c.h.s8.bf16 %v2667_v8  ;;  %v2733_v21 = vunpack.c.l.s8.bf16 %v2664_v16  ;;  %v2749_v34 = vunpack.c.l.s8.bf16 %v2672_v17  ;;  %v2750_v32 = vunpack.c.h.s8.bf16 %v2672_v17 }
 0x837   :  { %2268 = vmatprep.mubr.bf16.mxu0 %v3982_v18  ;;  %2309 = vmatprep.mubr.bf16.mxu1 %v3982_v18  ;;  %v1843_v18 = vld [vmem:[#allocation6 + $0x370] sm:$0xff]  ;;  %v2489_v8 = vrot.slane %v3347_v1, %v4131_v23 }
 0x838   :  { %v1939_v45 = vunpack.c.l.s8.bf16 %v1843_v18  ;;  %v1955_v52 = vunpack.c.h.s8.bf16 %v1843_v18  ;;  %v2674_v18 = vld [vmem:[#allocation7 + $0x278] sm:$0xff] }
 0x839   :  { %2239 = vmatpush1.bf16.msra.mxu0 %v1889_v25  ;;  %2280 = vmatpush1.bf16.msra.mxu1 %v1891_v26  ;;  %v2668_v25 = vld [vmem:[#allocation7 + $0x248] sm:$0xff]  ;;  %v2725_v26 = vunpack.c.l.s8.bf16 %v2660_v24 }
 0x83a   :  { %2240 = vmatprep.subr.bf16.mxu0 %v1906_v28  ;;  %2281 = vmatprep.subr.bf16.mxu1 %v1908_v29  ;;  %v2741_v28 = vunpack.c.l.s8.bf16 %v2668_v25  ;;  %v2734_v29 = vunpack.c.h.s8.bf16 %v2664_v16 }
 0x83d   :  { %2241 = vmatpush1.bf16.msra.mxu0 %v1905_v35  ;;  %2282 = vmatpush1.bf16.msra.mxu1 %v1907_v36  ;;  %v2726_v35 = vunpack.c.h.s8.bf16 %v2660_v24  ;;  %v2742_v36 = vunpack.c.h.s8.bf16 %v2668_v25 }
 0x83e   :  { %2242 = vmatprep.subr.bf16.mxu0 %v1922_v2  ;;  %2283 = vmatprep.subr.bf16.mxu1 %v1924_v37  ;;  %v2735_v2 = vunpack.c.l.s8.bf16 %v2665_v33 }
 0x841   :  { %2243 = vmatpush1.bf16.msra.mxu0 %v1921_v39  ;;  %2284 = vmatpush1.bf16.msra.mxu1 %v1923_v40  ;;  %v2727_v39 = vunpack.c.l.s8.bf16 %v2661_v38  ;;  %v2743_v40 = vunpack.c.l.s8.bf16 %v2669_v14 }
 0x842   :  { %2244 = vmatprep.subr.bf16.mxu0 %v1938_v41  ;;  %2285 = vmatprep.subr.bf16.mxu1 %v1940_v42  ;;  %v2736_v41 = vunpack.c.h.s8.bf16 %v2665_v33 }
 0x845   :  { %2245 = vmatpush1.bf16.msra.mxu0 %v1937_v44  ;;  %2286 = vmatpush1.bf16.msra.mxu1 %v1939_v45  ;;  %v2728_v44 = vunpack.c.h.s8.bf16 %v2661_v38  ;;  %v2744_v45 = vunpack.c.h.s8.bf16 %v2669_v14 }
 0x846   :  { %2246 = vmatprep.subr.bf16.mxu0 %v1954_v46  ;;  %2287 = vmatprep.subr.bf16.mxu1 %v1956_v31  ;;  %v2737_v46 = vunpack.c.l.s8.bf16 %v2666_v43  ;;  %v2753_v31 = vunpack.c.l.s8.bf16 %v2674_v18 }
 0x849   :  { %2247 = vmatpush1.bf16.msra.mxu0 %v1953_v51  ;;  %2288 = vmatpush1.bf16.msra.mxu1 %v1955_v52  ;;  %v2729_v51 = vunpack.c.l.s8.bf16 %v2662_v49  ;;  %v2745_v52 = vunpack.c.l.s8.bf16 %v2670_v50 }
 0x84a   :  { %2248 = vmatprep.subr.bf16.mxu0 %v1970_v54  ;;  %2289 = vmatprep.subr.bf16.mxu1 %v1972_v59  ;;  %v2738_v54 = vunpack.c.h.s8.bf16 %v2666_v43  ;;  %v2754_v59 = vunpack.c.h.s8.bf16 %v2674_v18  ;;  %v2683_v43 = vld [vmem:[#allocation7 + $0x2c0] sm:$0xff] }
 0x84d   :  { %2249 = vmatpush1.bf16.msra.mxu0 %v1969_v47  ;;  %2290 = vmatpush1.bf16.msra.mxu1 %v1971_v48  ;;  %v2730_v47 = vunpack.c.h.s8.bf16 %v2662_v49  ;;  %v2746_v48 = vunpack.c.h.s8.bf16 %v2670_v50  ;;  %v2771_v49 = vunpack.c.l.s8.bf16 %v2683_v43 }
 0x84e   :  { %2250 = vmatprep.subr.bf16.mxu0 %v1986_v62  ;;  %2291 = vmatprep.subr.bf16.mxu1 %v1988_v63  ;;  %v2763_v62 = vunpack.c.l.s8.bf16 %v4307_v60  ;;  %v2779_v63 = vunpack.c.l.s8.bf16 %v4309_v61 }
 0x851   :  { %2251 = vmatpush1.bf16.msra.mxu0 %v1985_v4  ;;  %2292 = vmatpush1.bf16.msra.mxu1 %v1987_v12  ;;  %v2333_v4 = vrot.slane %v3347_v1, %v4165_v53  ;;  %v2329_v12 = vrot.slane %v3347_v1, %v4171_v55 }
 0x852   :  { %3562 = vmatprep.subr.bf16.mxu0 %v2731_v5  ;;  %3584 = vmatprep.subr.bf16.mxu1 %v2747_v6  ;;  %v2337_v5 = vrot.slane %v3347_v1, %v4174_v56  ;;  %v2485_v6 = vrot.slane %v3347_v1, %v4115_v13 }
 0x854   :  { %2269 = vmatmul.mubr.bf16.vlgmr.msra.gmra.mrb[48].mxu0 %v4291_v30  ;;  %2310 = vmatmul.mubr.bf16.vlgmr.msra.gmra.mrb[48].mxu1 %v4291_v30  ;;  %v2673_v30 = vld [vmem:[#allocation7 + $0x270] sm:$0xff]  ;;  %v2417_v16 = vrot.slane %v2337_v5, %v4128_v22  ;;  %v2565_v17 = vrot.slane %v2485_v6, %v4115_v13 }
 0x855   :  { %3563 = vmatpush3.bf16.msra.mxu0 %v2723_v9  ;;  %3585 = vmatpush3.bf16.msra.mxu1 %v2739_v10  ;;  %v2751_v37 = vunpack.c.l.s8.bf16 %v2673_v30  ;;  %v2752_v42 = vunpack.c.h.s8.bf16 %v2673_v30  ;;  %v2497_v9 = vrot.slane %v3347_v1, %v4180_v58  ;;  %v2405_v10 = vrot.slane %v2325_v3, %v4128_v22  ;;  %v2676_v3 = vld [vmem:[#allocation7 + $0x288] sm:$0xff]  ;;  %v2681_v6 = vld [vmem:[#allocation7 + $0x2b0] sm:$0xff] }
 0x856   :  { %3564 = vmatprep.subr.bf16.mxu0 %v2732_v11  ;;  %3586 = vmatprep.subr.bf16.mxu1 %v2748_v15  ;;  %v2413_v11 = vrot.slane %v2333_v4, %v4128_v22  ;;  %v2409_v15 = vrot.slane %v2329_v12, %v4128_v22  ;;  %v2684_v4 = vld [vmem:[#allocation7 + $0x2c8] sm:$0xff] }
 0x857   :  { %v2577_v24 = vrot.slane %v2497_v9, %v4115_v13  ;;  %v2774_v9 = vunpack.c.h.s8.bf16 %v2684_v4 }
 0x859   :  { %3565 = vmatpush3.bf16.msra.mxu0 %v2724_v19  ;;  %3587 = vmatpush3.bf16.msra.mxu1 %v2740_v20  ;;  %v2573_v19 = vrot.slane %v2493_v7, %v4115_v13  ;;  %v2689_v7 = vld [vmem:[#allocation7 + $0x2f0] sm:$0xff] }
 0x85a   :  { %3566 = vmatprep.subr.bf16.mxu0 %v2733_v21  ;;  %3588 = vmatprep.subr.bf16.mxu1 %v2749_v34  ;;  %v2569_v34 = vrot.slane %v2489_v8, %v4115_v13  ;;  %v2758_v8 = vunpack.c.h.s8.bf16 %v2676_v3 }
 0x85d   :  { %3567 = vmatpush3.bf16.msra.mxu0 %v2725_v26  ;;  %3589 = vmatpush3.bf16.msra.mxu1 %v2741_v28 }
 0x85e   :  { %3568 = vmatprep.subr.bf16.mxu0 %v2734_v29  ;;  %3590 = vmatprep.subr.bf16.mxu1 %v2750_v32 }
 0x861   :  { %3569 = vmatpush3.bf16.msra.mxu0 %v2726_v35  ;;  %3591 = vmatpush3.bf16.msra.mxu1 %v2742_v36 }
 0x862   :  { %3570 = vmatprep.subr.bf16.mxu0 %v2735_v2  ;;  %3592 = vmatprep.subr.bf16.mxu1 %v2751_v37 }
 0x865   :  { %3571 = vmatpush3.bf16.msra.mxu0 %v2727_v39  ;;  %3593 = vmatpush3.bf16.msra.mxu1 %v2743_v40 }
 0x866   :  { %3572 = vmatprep.subr.bf16.mxu0 %v2736_v41  ;;  %3594 = vmatprep.subr.bf16.mxu1 %v2752_v42  ;;  %v2675_v42 = vld [vmem:[#allocation7 + $0x280] sm:$0xff] }
 0x869   :  { %3573 = vmatpush3.bf16.msra.mxu0 %v2728_v44  ;;  %3595 = vmatpush3.bf16.msra.mxu1 %v2744_v45 }
 0x86a   :  { %3574 = vmatprep.subr.bf16.mxu0 %v2737_v46  ;;  %3596 = vmatprep.subr.bf16.mxu1 %v2753_v31  ;;  %v2755_v31 = vunpack.c.l.s8.bf16 %v2675_v42 }
 0x86d   :  { %3575 = vmatpush3.bf16.msra.mxu0 %v2729_v51  ;;  %3597 = vmatpush3.bf16.msra.mxu1 %v2745_v52  ;;  %v2764_v52 = vunpack.c.h.s8.bf16 %v4307_v60  ;;  %v2757_v60 = vunpack.c.l.s8.bf16 %v2676_v3 }
 0x86e   :  { %3576 = vmatprep.subr.bf16.mxu0 %v2738_v54  ;;  %3598 = vmatprep.subr.bf16.mxu1 %v2754_v59  ;;  %v2780_v54 = vunpack.c.h.s8.bf16 %v4309_v61  ;;  %v2680_v59 = vld [vmem:[#allocation7 + $0x2a8] sm:$0xff]  ;;  %v2773_v61 = vunpack.c.l.s8.bf16 %v2684_v4 }
 0x86f   :  { %v2766_v12 = vunpack.c.h.s8.bf16 %v2680_v59 }
 0x871   :  { %3577 = vmatpush3.bf16.msra.mxu0 %v2730_v47  ;;  %3599 = vmatpush3.bf16.msra.mxu1 %v2746_v48  ;;  %v2688_v47 = vld [vmem:[#allocation7 + $0x2e8] sm:$0xff]  ;;  %v2756_v48 = vunpack.c.h.s8.bf16 %v2675_v42  ;;  %v2686_v42 = vld [vmem:[#allocation7 + $0x2d8] sm:$0xff] }
 0x872   :  { %3606 = vmatprep.subr.bf16.mxu0 %v2763_v62  ;;  %3628 = vmatprep.subr.bf16.mxu1 %v2779_v63  ;;  %v2772_v62 = vunpack.c.h.s8.bf16 %v2683_v43  ;;  %v2765_v63 = vunpack.c.l.s8.bf16 %v2680_v59  ;;  %v2781_v1 = vunpack.c.l.s8.bf16 %v2688_v47  ;;  %v2782_v5 = vunpack.c.h.s8.bf16 %v2688_v47 }
 0x8c7   :  { %v2024_v20 = vpop.f32.mrb[36].mxu0  ;;  %v2065_v21 = vpop.f32.mrb[36].mxu1 }
 0x8c8   :  { %v2466_v25 = vmul.f32 %v2405_v10, %v2024_v20  ;;  %v2468_v26 = vmul.f32 %v2413_v11, %v2065_v21  ;;  %v2026_v28 = vpop.f32.mrb[37].mxu0  ;;  %v2067_v29 = vpop.f32.mrb[37].mxu1  ;;  %v2767_v10 = vunpack.c.l.s8.bf16 %v2681_v6  ;;  %v2783_v11 = vunpack.c.l.s8.bf16 %v2689_v7 }
 0x8c9   :  { %v2467_v32 = vmul.f32 %v2409_v15, %v2026_v28  ;;  %v2469_v33 = vmul.f32 %v2417_v16, %v2067_v29  ;;  %v2028_v30 = vpop.f32.mrb[38].mxu0  ;;  %v2069_v35 = vpop.f32.mrb[38].mxu1  ;;  %v2677_v15 = vld [vmem:[#allocation7 + $0x290] sm:$0xff]  ;;  %v2768_v21 = vunpack.c.h.s8.bf16 %v2681_v6  ;;  %v2682_v29 = vld [vmem:[#allocation7 + $0x2b8] sm:$0xff] }
 0x8ca   :  { %v2626_v36 = vadd.f32 %v2565_v17, %v2466_v25  ;;  %v2628_v2 = vadd.f32 %v2573_v19, %v2468_v26  ;;  %v2029_v37 = vpop.f32.mrb[39].mxu0  ;;  %v2070_v38 = vpop.f32.mrb[39].mxu1  ;;  %v2685_v16 = vld [vmem:[#allocation7 + $0x2d0] sm:$0xff]  ;;  %v3348_v17 = vld [vmem:[%s4416_s4 + $0x28] sm:$0xff]  ;;  %v2759_v19 = vunpack.c.l.s8.bf16 %v2677_v15  ;;  %v2760_v35 = vunpack.c.h.s8.bf16 %v2677_v15 }
 0x8cb   :  { %v2627_v14 = vadd.f32 %v2569_v34, %v2467_v32  ;;  %v2629_v39 = vadd.f32 %v2577_v24, %v2469_v33  ;;  %v2775_v20 = vunpack.c.l.s8.bf16 %v2685_v16  ;;  %v2784_v34 = vunpack.c.h.s8.bf16 %v2689_v7  ;;  %v2690_v32 = vld [vmem:[#allocation7 + $0x2f8] sm:$0xff] }
 0x8cc   :  { %v2642_v40 = vmax.f32 %v2626_v36, 0.0  ;;  %v2644_v41 = vmax.f32 %v2628_v2, 0.0  ;;  %v2341_v24 = vrot.slane %v3348_v17, %v4128_v22  ;;  %v2349_v25 = vrot.slane %v3348_v17, %v4165_v53 }
 0x8cd   :  { %v2643_v18 = vmax.f32 %v2627_v14, 0.0  ;;  %v2645_v44 = vmax.f32 %v2629_v39, 0.0  ;;  %v2345_v26 = vrot.slane %v3348_v17, %v4171_v55  ;;  %v2353_v28 = vrot.slane %v3348_v17, %v4174_v56 }
 0x8ce   :  { %v2851_v50 = vpack.c.bf16 %v2642_v40, %v2642_v40  ;;  %v2853_v51 = vpack.c.bf16 %v2644_v41, %v2644_v41  ;;  %v2501_v33 = vrot.slane %v3348_v17, %v4115_v13  ;;  %v2509_v30 = vrot.slane %v3348_v17, %v4177_v57  ;;  %v2678_v41 = vld [vmem:[#allocation7 + $0x298] sm:$0xff] }
 0x8cf   :  { %v2852_v45 = vpack.c.bf16 %v2643_v18, %v2643_v18  ;;  %v2854_v46 = vpack.c.bf16 %v2645_v44, %v2645_v44  ;;  %v2776_v36 = vunpack.c.h.s8.bf16 %v2685_v16  ;;  %v2505_v2 = vrot.slane %v3348_v17, %v4131_v23 }
 0x8d0   :  { %v2513_v37 = vrot.slane %v3348_v17, %v4180_v58  ;;  %v2421_v38 = vrot.slane %v2341_v24, %v4128_v22  ;;  %v2429_v14 = vrot.slane %v2349_v25, %v4128_v22  ;;  %v2769_v39 = vunpack.c.l.s8.bf16 %v2682_v29 }
 0x8d1   :  { %2899 = vmatprep.mubr.bf16.mxu0 %v2852_v45  ;;  %2939 = vmatprep.mubr.bf16.mxu1 %v2854_v46  ;;  %v2785_v40 = vunpack.c.l.s8.bf16 %v2690_v32  ;;  %v2425_v43 = vrot.slane %v2345_v26, %v4128_v22  ;;  %v2433_v18 = vrot.slane %v2353_v28, %v4128_v22  ;;  %v2581_v44 = vrot.slane %v2501_v33, %v4115_v13 }
 0x8d2   :  { %2900 = vmatmul.mubr.bf16.vlgmr.msra.gmra.mrb[52].mxu0 %v2851_v50  ;;  %2940 = vmatmul.mubr.bf16.vlgmr.msra.gmra.mrb[52].mxu1 %v2853_v51  ;;  %v2589_v45 = vrot.slane %v2509_v30, %v4115_v13  ;;  %v2593_v50 = vrot.slane %v2513_v37, %v4115_v13  ;;  %v2761_v51 = vunpack.c.l.s8.bf16 %v2678_v41  ;;  %v2778_v15 = vunpack.c.h.s8.bf16 %v2686_v42  ;;  %v2704_v37 = vld [vmem:[#allocation7 + $0x368] sm:$0xff] }
 0x8d3   :  { %3607 = vmatpush3.bf16.msra.mxu0 %v2755_v31  ;;  %3629 = vmatpush3.bf16.msra.mxu1 %v2771_v49  ;;  %v2585_v49 = vrot.slane %v2505_v2, %v4115_v13  ;;  %v2696_v2 = vld [vmem:[#allocation7 + $0x328] sm:$0xff] }
 0x8d4   :  { %3608 = vmatprep.subr.bf16.mxu0 %v2764_v52  ;;  %3630 = vmatprep.subr.bf16.mxu1 %v2780_v54  ;;  %v2777_v52 = vunpack.c.l.s8.bf16 %v2686_v42  ;;  %v2700_v42 = vld [vmem:[#allocation7 + $0x348] sm:$0xff] }
 0x8d7   :  { %3609 = vmatpush3.bf16.msra.mxu0 %v2756_v48  ;;  %3631 = vmatpush3.bf16.msra.mxu1 %v2772_v62  ;;  %v2770_v62 = vunpack.c.h.s8.bf16 %v2682_v29 }
 0x8d8   :  { %3610 = vmatprep.subr.bf16.mxu0 %v2765_v63  ;;  %3632 = vmatprep.subr.bf16.mxu1 %v2781_v1  ;;  %v2786_v63 = vunpack.c.h.s8.bf16 %v2690_v32 }
 0x8db   :  { %3611 = vmatpush3.bf16.msra.mxu0 %v2757_v60  ;;  %3633 = vmatpush3.bf16.msra.mxu1 %v2773_v61  ;;  %v2695_v61 = vld [vmem:[#allocation7 + $0x320] sm:$0xff] }
 0x8dc   :  { %3612 = vmatprep.subr.bf16.mxu0 %v2766_v12  ;;  %3634 = vmatprep.subr.bf16.mxu1 %v2782_v5  ;;  %v2703_v12 = vld [vmem:[#allocation7 + $0x360] sm:$0xff] }
 0x8df   :  { %3613 = vmatpush3.bf16.msra.mxu0 %v2758_v8  ;;  %3635 = vmatpush3.bf16.msra.mxu1 %v2774_v9 }
 0x8e0   :  { %3614 = vmatprep.subr.bf16.mxu0 %v2767_v10  ;;  %3636 = vmatprep.subr.bf16.mxu1 %v2783_v11  ;;  %v2762_v11 = vunpack.c.h.s8.bf16 %v2678_v41  ;;  %v2692_v41 = vld [vmem:[#allocation7 + $0x308] sm:$0xff] }
 0x8e3   :  { %3615 = vmatpush3.bf16.msra.mxu0 %v2759_v19  ;;  %3637 = vmatpush3.bf16.msra.mxu1 %v2775_v20  ;;  %v2795_v19 = vunpack.c.l.s8.bf16 %v2695_v61  ;;  %v2811_v20 = vunpack.c.l.s8.bf16 %v2703_v12 }
 0x8e4   :  { %3616 = vmatprep.subr.bf16.mxu0 %v2768_v21  ;;  %3638 = vmatprep.subr.bf16.mxu1 %v2784_v34  ;;  %v2691_v21 = vld [vmem:[#allocation7 + $0x300] sm:$0xff] }
 0x8e5   :  { %v2699_v34 = vld [vmem:[#allocation7 + $0x340] sm:$0xff]  ;;  %v2787_v29 = vunpack.c.l.s8.bf16 %v2691_v21 }
 0x8e6   :  { %v2803_v32 = vunpack.c.l.s8.bf16 %v2699_v34 }
 0x8e7   :  { %v2106_v46 = vpop.f32.mrb[40].mxu0  ;;  %v2147_v31 = vpop.f32.mrb[40].mxu1  ;;  %3617 = vmatpush3.bf16.msra.mxu0 %v2760_v35  ;;  %3639 = vmatpush3.bf16.msra.mxu1 %v2776_v36  ;;  %v2796_v35 = vunpack.c.h.s8.bf16 %v2695_v61  ;;  %v2812_v36 = vunpack.c.h.s8.bf16 %v2703_v12  ;;  %v2698_v12 = vld [vmem:[#allocation7 + $0x338] sm:$0xff] }
 0x8e8   :  { %v2470_v54 = vmul.f32 %v2421_v38, %v2106_v46  ;;  %v2472_v59 = vmul.f32 %v2429_v14, %v2147_v31  ;;  %v2108_v47 = vpop.f32.mrb[41].mxu0  ;;  %v2149_v48 = vpop.f32.mrb[41].mxu1  ;;  %3618 = vmatprep.subr.bf16.mxu0 %v2769_v39  ;;  %3640 = vmatprep.subr.bf16.mxu1 %v2785_v40  ;;  %v2788_v38 = vunpack.c.h.s8.bf16 %v2691_v21  ;;  %v2804_v14 = vunpack.c.h.s8.bf16 %v2699_v34  ;;  %v2697_v46 = vld [vmem:[#allocation7 + $0x330] sm:$0xff]  ;;  %v2702_v21 = vld [vmem:[#allocation7 + $0x358] sm:$0xff] }
 0x8e9   :  { %v2471_v1 = vmul.f32 %v2425_v43, %v2108_v47  ;;  %v2473_v3 = vmul.f32 %v2433_v18, %v2149_v48  ;;  %v2110_v4 = vpop.f32.mrb[42].mxu0  ;;  %v2151_v60 = vpop.f32.mrb[42].mxu1  ;;  %v2797_v39 = vunpack.c.l.s8.bf16 %v2696_v2  ;;  %v2813_v40 = vunpack.c.l.s8.bf16 %v2704_v37  ;;  %v2705_v31 = vld [vmem:[#allocation7 + $0x370] sm:$0xff]  ;;  %v3349_v47 = vld [vmem:[%s4416_s4 + $0x30] sm:$0xff] }
 0x8ea   :  { %v2630_v5 = vadd.f32 %v2581_v44, %v2470_v54  ;;  %v2632_v6 = vadd.f32 %v2589_v45, %v2472_v59  ;;  %v2111_v7 = vpop.f32.mrb[43].mxu0  ;;  %v2152_v8 = vpop.f32.mrb[43].mxu1  ;;  %v2789_v43 = vunpack.c.l.s8.bf16 %v2692_v41  ;;  %v2805_v18 = vunpack.c.l.s8.bf16 %v2700_v42  ;;  %v2693_v54 = vld [vmem:[#allocation7 + $0x310] sm:$0xff] }
 0x8eb   :  { %v2631_v9 = vadd.f32 %v2585_v49, %v2471_v1  ;;  %v2633_v10 = vadd.f32 %v2593_v50, %v2473_v3  ;;  %3619 = vmatpush3.bf16.msra.mxu0 %v2761_v51  ;;  %3641 = vmatpush3.bf16.msra.mxu1 %v2777_v52  ;;  %v2798_v44 = vunpack.c.h.s8.bf16 %v2696_v2  ;;  %v2814_v45 = vunpack.c.h.s8.bf16 %v2704_v37  ;;  %v2701_v59 = vld [vmem:[#allocation7 + $0x350] sm:$0xff] }
 0x8ec   :  { %v2646_v16 = vmax.f32 %v2630_v5, 0.0  ;;  %v2648_v17 = vmax.f32 %v2632_v6, 0.0  ;;  %3620 = vmatprep.subr.bf16.mxu0 %v2770_v62  ;;  %3642 = vmatprep.subr.bf16.mxu1 %v2786_v63  ;;  %v2790_v49 = vunpack.c.h.s8.bf16 %v2692_v41  ;;  %v2806_v50 = vunpack.c.h.s8.bf16 %v2700_v42  ;;  %v2706_v5 = vld [vmem:[#allocation7 + $0x378] sm:$0xff] }
 0x8ed   :  { %v2647_v24 = vmax.f32 %v2631_v9, 0.0  ;;  %v2649_v25 = vmax.f32 %v2633_v10, 0.0  ;;  %v2799_v51 = vunpack.c.l.s8.bf16 %v2697_v46  ;;  %v2815_v52 = vunpack.c.l.s8.bf16 %v2705_v31 }
 0x8ee   :  { %v2855_v33 = vpack.c.bf16 %v2646_v16, %v2646_v16  ;;  %v2857_v30 = vpack.c.bf16 %v2648_v17, %v2648_v17  ;;  %v2791_v48 = vunpack.c.l.s8.bf16 %v2693_v54  ;;  %v2807_v62 = vunpack.c.l.s8.bf16 %v2701_v59 }
 0x8ef   :  { %v2856_v26 = vpack.c.bf16 %v2647_v24, %v2647_v24  ;;  %v2858_v28 = vpack.c.bf16 %v2649_v25, %v2649_v25  ;;  %3621 = vmatpush3.bf16.msra.mxu0 %v2762_v11  ;;  %3643 = vmatpush3.bf16.msra.mxu1 %v2778_v15  ;;  %v2800_v63 = vunpack.c.h.s8.bf16 %v2697_v46  ;;  %v2816_v1 = vunpack.c.h.s8.bf16 %v2705_v31 }
 0x8f0   :  { %3650 = vmatprep.subr.bf16.mxu0 %v2795_v19  ;;  %3672 = vmatprep.subr.bf16.mxu1 %v2811_v20  ;;  %v2357_v3 = vrot.slane %v3349_v47, %v4128_v22  ;;  %v2365_v4 = vrot.slane %v3349_v47, %v4165_v53  ;;  %v2361_v60 = vrot.slane %v3349_v47, %v4171_v55  ;;  %v2792_v8 = vunpack.c.h.s8.bf16 %v2693_v54  ;;  %v2694_v20 = vld [vmem:[#allocation7 + $0x318] sm:$0xff] }
 0x8f1   :  { %2979 = vmatprep.mubr.bf16.mxu0 %v2856_v26  ;;  %3019 = vmatprep.mubr.bf16.mxu1 %v2858_v28  ;;  %v2369_v61 = vrot.slane %v3349_v47, %v4174_v56  ;;  %v2517_v6 = vrot.slane %v3349_v47, %v4115_v13  ;;  %v2525_v7 = vrot.slane %v3349_v47, %v4177_v57  ;;  %v2808_v9 = vunpack.c.h.s8.bf16 %v2701_v59 }
 0x8f2   :  { %2980 = vmatmul.mubr.bf16.vlgmr.msra.gmra.mrb[56].mxu0 %v2855_v33  ;;  %3020 = vmatmul.mubr.bf16.vlgmr.msra.gmra.mrb[56].mxu1 %v2857_v30  ;;  %v2521_v10 = vrot.slane %v3349_v47, %v4131_v23  ;;  %v2529_v11 = vrot.slane %v3349_v47, %v4180_v58  ;;  %v2437_v15 = vrot.slane %v2357_v3, %v4128_v22  ;;  %v2801_v17 = vunpack.c.l.s8.bf16 %v2698_v12 }
 0x8f3   :  { %3651 = vmatpush3.bf16.msra.mxu0 %v2787_v29  ;;  %3673 = vmatpush3.bf16.msra.mxu1 %v2803_v32  ;;  %v2445_v16 = vrot.slane %v2365_v4, %v4128_v22  ;;  %v2817_v19 = vunpack.c.l.s8.bf16 %v2706_v5  ;;  %v2441_v34 = vrot.slane %v2361_v60, %v4128_v22  ;;  %v2449_v24 = vrot.slane %v2369_v61, %v4128_v22 }
 0x8f4   :  { %3652 = vmatprep.subr.bf16.mxu0 %v2796_v35  ;;  %3674 = vmatprep.subr.bf16.mxu1 %v2812_v36  ;;  %v2597_v25 = vrot.slane %v2517_v6, %v4115_v13  ;;  %v2605_v26 = vrot.slane %v2525_v7, %v4115_v13  ;;  %v2601_v32 = vrot.slane %v2521_v10, %v4115_v13  ;;  %v2793_v30 = vunpack.c.l.s8.bf16 %v2694_v20  ;;  %v2712_v10 = vld [vmem:[#allocation7 + $0x3a8] sm:$0xff] }
 0x8f5   :  { %v2609_v33 = vrot.slane %v2529_v11, %v4115_v13  ;;  %v2809_v35 = vunpack.c.l.s8.bf16 %v2702_v21  ;;  %v2810_v54 = vunpack.c.h.s8.bf16 %v2702_v21  ;;  %v2720_v11 = vld [vmem:[#allocation7 + $0x3e8] sm:$0xff] }
 0x8f6   :  { %v2716_v21 = vld [vmem:[#allocation7 + $0x3c8] sm:$0xff] }
 0x8f7   :  { %3653 = vmatpush3.bf16.msra.mxu0 %v2788_v38  ;;  %3675 = vmatpush3.bf16.msra.mxu1 %v2804_v14  ;;  %v2802_v14 = vunpack.c.h.s8.bf16 %v2698_v12 }
 0x8f8   :  { %3654 = vmatprep.subr.bf16.mxu0 %v2797_v39  ;;  %3676 = vmatprep.subr.bf16.mxu1 %v2813_v40  ;;  %v2818_v39 = vunpack.c.h.s8.bf16 %v2706_v5 }
 0x8fb   :  { %3655 = vmatpush3.bf16.msra.mxu0 %v2789_v43  ;;  %3677 = vmatpush3.bf16.msra.mxu1 %v2805_v18  ;;  %v2711_v18 = vld [vmem:[#allocation7 + $0x3a0] sm:$0xff] }
 0x8fc   :  { %3656 = vmatprep.subr.bf16.mxu0 %v2798_v44  ;;  %3678 = vmatprep.subr.bf16.mxu1 %v2814_v45  ;;  %v2719_v44 = vld [vmem:[#allocation7 + $0x3e0] sm:$0xff] }
 0x8ff   :  { %3657 = vmatpush3.bf16.msra.mxu0 %v2790_v49  ;;  %3679 = vmatpush3.bf16.msra.mxu1 %v2806_v50 }
 0x900   :  { %3658 = vmatprep.subr.bf16.mxu0 %v2799_v51  ;;  %3680 = vmatprep.subr.bf16.mxu1 %v2815_v52  ;;  %v2794_v52 = vunpack.c.h.s8.bf16 %v2694_v20  ;;  %v2708_v20 = vld [vmem:[#allocation7 + $0x388] sm:$0xff] }
 0x903   :  { %3659 = vmatpush3.bf16.msra.mxu0 %v2791_v48  ;;  %3681 = vmatpush3.bf16.msra.mxu1 %v2807_v62  ;;  %v2827_v48 = vunpack.c.l.s8.bf16 %v2711_v18  ;;  %v2843_v62 = vunpack.c.l.s8.bf16 %v2719_v44 }
 0x904   :  { %3660 = vmatprep.subr.bf16.mxu0 %v2800_v63  ;;  %3682 = vmatprep.subr.bf16.mxu1 %v2816_v1  ;;  %v2707_v63 = vld [vmem:[#allocation7 + $0x380] sm:$0xff] }
 0x905   :  { %v2715_v1 = vld [vmem:[#allocation7 + $0x3c0] sm:$0xff]  ;;  %v2819_v12 = vunpack.c.l.s8.bf16 %v2707_v63 }
 0x906   :  { %v2835_v5 = vunpack.c.l.s8.bf16 %v2715_v1 }
 0x907   :  { %v2188_v28 = vpop.f32.mrb[44].mxu0  ;;  %v2229_v29 = vpop.f32.mrb[44].mxu1  ;;  %3661 = vmatpush3.bf16.msra.mxu0 %v2792_v8  ;;  %3683 = vmatpush3.bf16.msra.mxu1 %v2808_v9  ;;  %v2828_v8 = vunpack.c.h.s8.bf16 %v2711_v18  ;;  %v2844_v9 = vunpack.c.h.s8.bf16 %v2719_v44  ;;  %v2714_v44 = vld [vmem:[#allocation7 + $0x3b8] sm:$0xff] }
 0x908   :  { %v2474_v36 = vmul.f32 %v2437_v15, %v2188_v28  ;;  %v2476_v2 = vmul.f32 %v2445_v16, %v2229_v29  ;;  %v2190_v37 = vpop.f32.mrb[45].mxu0  ;;  %v2231_v38 = vpop.f32.mrb[45].mxu1  ;;  %3662 = vmatprep.subr.bf16.mxu0 %v2801_v17  ;;  %3684 = vmatprep.subr.bf16.mxu1 %v2817_v19  ;;  %v2820_v15 = vunpack.c.h.s8.bf16 %v2707_v63  ;;  %v2836_v16 = vunpack.c.h.s8.bf16 %v2715_v1  ;;  %v2713_v28 = vld [vmem:[#allocation7 + $0x3b0] sm:$0xff] }
 0x909   :  { %v2475_v40 = vmul.f32 %v2441_v34, %v2190_v37  ;;  %v2477_v41 = vmul.f32 %v2449_v24, %v2231_v38  ;;  %v2192_v42 = vpop.f32.mrb[46].mxu0  ;;  %v2233_v43 = vpop.f32.mrb[46].mxu1  ;;  %v2829_v17 = vunpack.c.l.s8.bf16 %v2712_v10  ;;  %v2845_v19 = vunpack.c.l.s8.bf16 %v2720_v11  ;;  %v2721_v29 = vld [vmem:[#allocation7 + $0x3f0] sm:$0xff]  ;;  %v3350_v37 = vld [vmem:[%s4416_s4 + $0x38] sm:$0xff] }
 0x90a   :  { %v2634_v45 = vadd.f32 %v2597_v25, %v2474_v36  ;;  %v2636_v46 = vadd.f32 %v2605_v26, %v2476_v2  ;;  %v2193_v31 = vpop.f32.mrb[47].mxu0  ;;  %v2234_v49 = vpop.f32.mrb[47].mxu1  ;;  %v2821_v34 = vunpack.c.l.s8.bf16 %v2708_v20  ;;  %v2837_v24 = vunpack.c.l.s8.bf16 %v2716_v21  ;;  %v2709_v36 = vld [vmem:[#allocation7 + $0x390] sm:$0xff] }
 0x90b   :  { %v2635_v50 = vadd.f32 %v2601_v32, %v2475_v40  ;;  %v2637_v51 = vadd.f32 %v2609_v33, %v2477_v41  ;;  %3663 = vmatpush3.bf16.msra.mxu0 %v2793_v30  ;;  %3685 = vmatpush3.bf16.msra.mxu1 %v2809_v35  ;;  %v2830_v25 = vunpack.c.h.s8.bf16 %v2712_v10  ;;  %v2846_v26 = vunpack.c.h.s8.bf16 %v2720_v11  ;;  %v2717_v2 = vld [vmem:[#allocation7 + $0x3d0] sm:$0xff] }
 0x90c   :  { %v2650_v59 = vmax.f32 %v2634_v45, 0.0  ;;  %v2652_v47 = vmax.f32 %v2636_v46, 0.0  ;;  %3664 = vmatprep.subr.bf16.mxu0 %v2802_v14  ;;  %3686 = vmatprep.subr.bf16.mxu1 %v2818_v39  ;;  %v2822_v32 = vunpack.c.h.s8.bf16 %v2708_v20  ;;  %v2838_v33 = vunpack.c.h.s8.bf16 %v2716_v21  ;;  %v2722_v45 = vld [vmem:[#allocation7 + $0x3f8] sm:$0xff] }
 0x90d   :  { %v2651_v3 = vmax.f32 %v2635_v50, 0.0  ;;  %v2653_v4 = vmax.f32 %v2637_v51, 0.0  ;;  %v2831_v30 = vunpack.c.l.s8.bf16 %v2713_v28  ;;  %v2847_v35 = vunpack.c.l.s8.bf16 %v2721_v29 }
 0x90e   :  { %v2859_v6 = vpack.c.bf16 %v2650_v59, %v2650_v59  ;;  %v2861_v7 = vpack.c.bf16 %v2652_v47, %v2652_v47  ;;  %v2823_v38 = vunpack.c.l.s8.bf16 %v2709_v36  ;;  %v2839_v14 = vunpack.c.l.s8.bf16 %v2717_v2 }
 0x90f   :  { %v2860_v60 = vpack.c.bf16 %v2651_v3, %v2651_v3  ;;  %v2862_v61 = vpack.c.bf16 %v2653_v4, %v2653_v4  ;;  %3665 = vmatpush3.bf16.msra.mxu0 %v2794_v52  ;;  %3687 = vmatpush3.bf16.msra.mxu1 %v2810_v54  ;;  %v2832_v39 = vunpack.c.h.s8.bf16 %v2713_v28  ;;  %v2848_v40 = vunpack.c.h.s8.bf16 %v2721_v29 }
 0x910   :  { %3694 = vmatprep.subr.bf16.mxu0 %v2827_v48  ;;  %3716 = vmatprep.subr.bf16.mxu1 %v2843_v62  ;;  %v2373_v41 = vrot.slane %v3350_v37, %v4128_v22  ;;  %v2381_v42 = vrot.slane %v3350_v37, %v4165_v53  ;;  %v2377_v43 = vrot.slane %v3350_v37, %v4171_v55  ;;  %v2824_v49 = vunpack.c.h.s8.bf16 %v2709_v36  ;;  %v2710_v48 = vld [vmem:[#allocation7 + $0x398] sm:$0xff] }
 0x911   :  { %3059 = vmatprep.mubr.bf16.mxu0 %v2860_v60  ;;  %3099 = vmatprep.mubr.bf16.mxu1 %v2862_v61  ;;  %v2385_v18 = vrot.slane %v3350_v37, %v4174_v56  ;;  %v2533_v46 = vrot.slane %v3350_v37, %v4115_v13  ;;  %v2541_v31 = vrot.slane %v3350_v37, %v4177_v57  ;;  %v2840_v50 = vunpack.c.h.s8.bf16 %v2717_v2  ;;  %v2718_v62 = vld [vmem:[#allocation7 + $0x3d8] sm:$0xff] }
 0x912   :  { %3060 = vmatmul.mubr.bf16.vlgmr.msra.gmra.mrb[60].mxu0 %v2859_v6  ;;  %3100 = vmatmul.mubr.bf16.vlgmr.msra.gmra.mrb[60].mxu1 %v2861_v7  ;;  %v2537_v51 = vrot.slane %v3350_v37, %v4131_v23  ;;  %v2545_v52 = vrot.slane %v3350_v37, %v4180_v58  ;;  %v2453_v54 = vrot.slane %v2373_v41, %v4128_v22  ;;  %v2833_v59 = vunpack.c.l.s8.bf16 %v2714_v44 }
 0x913   :  { %3695 = vmatpush3.bf16.msra.mxu0 %v2819_v12  ;;  %3717 = vmatpush3.bf16.msra.mxu1 %v2835_v5  ;;  %v2461_v56 = vrot.slane %v2381_v42, %v4128_v22  ;;  %v2849_v47 = vunpack.c.l.s8.bf16 %v2722_v45  ;;  %v2457_v63 = vrot.slane %v2377_v43, %v4128_v22  ;;  %v2465_v1 = vrot.slane %v2385_v18, %v4128_v22 }
 0x914   :  { %3696 = vmatprep.subr.bf16.mxu0 %v2828_v8  ;;  %3718 = vmatprep.subr.bf16.mxu1 %v2844_v9  ;;  %v2613_v3 = vrot.slane %v2533_v46, %v4115_v13  ;;  %v2621_v23 = vrot.slane %v2541_v31, %v4115_v13  ;;  %v2617_v61 = vrot.slane %v2537_v51, %v4115_v13  ;;  %v2825_v5 = vunpack.c.l.s8.bf16 %v2710_v48 }
 0x915   :  { %v2625_v12 = vrot.slane %v2545_v52, %v4115_v13  ;;  %v2841_v6 = vunpack.c.l.s8.bf16 %v2718_v62  ;;  %v2834_v22 = vunpack.c.h.s8.bf16 %v2714_v44  ;;  %v2850_v11 = vunpack.c.h.s8.bf16 %v2722_v45 }
 0x916   :  { %v2842_v28 = vunpack.c.h.s8.bf16 %v2718_v62 }
 0x917   :  { %3697 = vmatpush3.bf16.msra.mxu0 %v2820_v15  ;;  %3719 = vmatpush3.bf16.msra.mxu1 %v2836_v16 }
 0x918   :  { %3698 = vmatprep.subr.bf16.mxu0 %v2829_v17  ;;  %3720 = vmatprep.subr.bf16.mxu1 %v2845_v19 }
 0x91b   :  { %3699 = vmatpush3.bf16.msra.mxu0 %v2821_v34  ;;  %3721 = vmatpush3.bf16.msra.mxu1 %v2837_v24 }
 0x91c   :  { %3700 = vmatprep.subr.bf16.mxu0 %v2830_v25  ;;  %3722 = vmatprep.subr.bf16.mxu1 %v2846_v26  ;;  %v2826_v26 = vunpack.c.h.s8.bf16 %v2710_v48 }
 0x91f   :  { %3701 = vmatpush3.bf16.msra.mxu0 %v2822_v32  ;;  %3723 = vmatpush3.bf16.msra.mxu1 %v2838_v33 }
 0x920   :  { %3702 = vmatprep.subr.bf16.mxu0 %v2831_v30  ;;  %3724 = vmatprep.subr.bf16.mxu1 %v2847_v35 }
 0x923   :  { %3703 = vmatpush3.bf16.msra.mxu0 %v2823_v38  ;;  %3725 = vmatpush3.bf16.msra.mxu1 %v2839_v14 }
 0x924   :  { %3704 = vmatprep.subr.bf16.mxu0 %v2832_v39  ;;  %3726 = vmatprep.subr.bf16.mxu1 %v2848_v40 }
 0x927   :  { %v2270_v4 = vpop.f32.mrb[48].mxu0  ;;  %v2311_v60 = vpop.f32.mrb[48].mxu1  ;;  %3705 = vmatpush3.bf16.msra.mxu0 %v2824_v49  ;;  %3727 = vmatpush3.bf16.msra.mxu1 %v2840_v50 }
 0x928   :  { %v2478_v7 = vmul.f32 %v2453_v54, %v2270_v4  ;;  %v2480_v8 = vmul.f32 %v2461_v56, %v2311_v60  ;;  %v2272_v9 = vpop.f32.mrb[49].mxu0  ;;  %v2313_v10 = vpop.f32.mrb[49].mxu1  ;;  %3706 = vmatprep.subr.bf16.mxu0 %v2833_v59  ;;  %3728 = vmatprep.subr.bf16.mxu1 %v2849_v47 }
 0x929   :  { %v2479_v15 = vmul.f32 %v2457_v63, %v2272_v9  ;;  %v2481_v16 = vmul.f32 %v2465_v1, %v2313_v10  ;;  %v2274_v17 = vpop.f32.mrb[50].mxu0  ;;  %v2315_v19 = vpop.f32.mrb[50].mxu1 }
 0x92a   :  { %v2638_v20 = vadd.f32 %v2613_v3, %v2478_v7  ;;  %v2640_v21 = vadd.f32 %v2621_v23, %v2480_v8  ;;  %v2275_v34 = vpop.f32.mrb[51].mxu0  ;;  %v2316_v24 = vpop.f32.mrb[51].mxu1 }
 0x92b   :  { %v2639_v25 = vadd.f32 %v2617_v61, %v2479_v15  ;;  %v2641_v13 = vadd.f32 %v2625_v12, %v2481_v16  ;;  %3707 = vmatpush3.bf16.msra.mxu0 %v2825_v5  ;;  %3729 = vmatpush3.bf16.msra.mxu1 %v2841_v6 }
 0x92c   :  { %v2654_v29 = vmax.f32 %v2638_v20, 0.0  ;;  %v2656_v32 = vmax.f32 %v2640_v21, 0.0  ;;  %3708 = vmatprep.subr.bf16.mxu0 %v2834_v22  ;;  %3730 = vmatprep.subr.bf16.mxu1 %v2850_v11 }
 0x92d   :  { %v2655_v33 = vmax.f32 %v2639_v25, 0.0  ;;  %v2657_v30 = vmax.f32 %v2641_v13, 0.0  ;;  %v3853_v25 = vld [vmem:[#allocation4 + $0x8] sm:$0xff] }
 0x92e   :  { %v2863_v2 = vpack.c.bf16 %v2654_v29, %v2654_v29  ;;  %v2865_v37 = vpack.c.bf16 %v2656_v32, %v2656_v32  ;;  %v3190_v13 = vrot.slane %v3853_v25, %v4180_v58 }
 0x92f   :  { %v2864_v35 = vpack.c.bf16 %v2655_v33, %v2655_v33  ;;  %v2866_v36 = vpack.c.bf16 %v2657_v30, %v2657_v30  ;;  %3709 = vmatpush3.bf16.msra.mxu0 %v2826_v26  ;;  %3731 = vmatpush3.bf16.msra.mxu1 %v2842_v28  ;;  %v3195_v28 = vrot.slane %v3853_v25, %v4171_v55  ;;  %v3836_v30 = vld [vmem:[#allocation9] sm:$0xff]   ;;  %v3839_v55 = vld [vmem:[#allocation9 + $0x18] sm:$0xff]  }
 0x930   :  { %3787 = vmatprep.subr.bf16.mxu0 %v3980_v0 }
 0x931   :  { %3139 = vmatprep.mubr.bf16.mxu0 %v2864_v35  ;;  %3179 = vmatprep.mubr.bf16.mxu1 %v2866_v36  ;;  %v3837_v35 = vld [vmem:[#allocation9 + $0x8] sm:$0xff]  }
 0x932   :  { %3140 = vmatmul.mubr.bf16.vlgmr.msra.gmra.mrb[64].mxu0 %v2863_v2  ;;  %3180 = vmatmul.mubr.bf16.vlgmr.msra.gmra.mrb[64].mxu1 %v2865_v37 }
 0x933   :  { %3803 = vmatprep.mubr.msk.bf16.mxu0 %vm3981_vm0, %v3980_v0  ;;  %3788 = vmatpush3.bf16.msra.mxu0 %v3836_v30 }
 0x934   :  { %3789 = vmatprep.subr.bf16.mxu0 %v3980_v0 }
 0x937   :  { %3790 = vmatpush3.bf16.msra.mxu0 %v3837_v35 }
 0x938   :  { %3791 = vmatprep.subr.bf16.mxu0 %v3980_v0 }
 0x9a5   :  { %v3578_v38 = vpop.f32.mrb[52].mxu0  ;;  %v3600_v14 = vpop.f32.mrb[52].mxu1 }
 0x9a6   :  { %v3579_v39 = vpop.f32.mrb[53].mxu0  ;;  %v3601_v40 = vpop.f32.mrb[53].mxu1 }
 0x9a7   :  { %v3580_v41 = vadd.f32 %v3579_v39, %v3578_v38  ;;  %v3602_v42 = vadd.f32 %v3601_v40, %v3600_v14  ;;  %v3581_v43 = vpop.f32.mrb[54].mxu0  ;;  %v3603_v18 = vpop.f32.mrb[54].mxu1  ;;  %v3838_v38 = vld [vmem:[#allocation9 + $0x10] sm:$0xff]   ;;  %v3841_v14 = vld [vmem:[#allocation9 + $0x28] sm:$0xff]   ;;  %v3843_v40 = vld [vmem:[#allocation9 + $0x38] sm:$0xff]  }
 0x9a8   :  { %v3582_v44 = vpop.f32.mrb[55].mxu0  ;;  %v3604_v45 = vpop.f32.mrb[55].mxu1  ;;  %3792 = vmatpush3.bf16.msra.mxu0 %v3838_v38  ;;  %v3842_v39 = vld [vmem:[#allocation9 + $0x30] sm:$0xff]   ;;  %v3212_v18 = vrot.slane %v3853_v25, %v4177_v57 }
 0x9a9   :  { %v2942_v46 = vadd.f32 %v3602_v42, %v3580_v41  ;;  %3793 = vmatprep.subr.bf16.mxu0 %v3980_v0 }
 0x9ac   :  { %3794 = vmatpush3.bf16.msra.mxu0 %v3839_v55 }
 0x9ad   :  { %3795 = vmatprep.subr.bf16.mxu0 %v3980_v0 }
 0x9c5   :  { %v3622_v31 = vpop.f32.mrb[56].mxu0  ;;  %v3644_v49 = vpop.f32.mrb[56].mxu1 }
 0x9c6   :  { %v3623_v50 = vpop.f32.mrb[57].mxu0  ;;  %v3645_v51 = vpop.f32.mrb[57].mxu1 }
 0x9c7   :  { %v3624_v52 = vadd.f32 %v3623_v50, %v3622_v31  ;;  %v3646_v54 = vadd.f32 %v3645_v51, %v3644_v49  ;;  %v3625_v56 = vpop.f32.mrb[58].mxu0  ;;  %v3647_v59 = vpop.f32.mrb[58].mxu1  ;;  %v3359_v51 = vld [vmem:[%s4419_s7] ss:$0 sm:$0xff] }
 0x9c8   :  { %v3626_v47 = vpop.f32.mrb[59].mxu0  ;;  %v3648_v48 = vpop.f32.mrb[59].mxu1 }
 0x9c9   :  { %v2982_v62 = vadd.f32 %v3624_v52, %v2942_v46  ;;  %v3217_v46 = vrot.slane %v3853_v25, %v4165_v53 }
 0x9cb   :  { %v3022_v63 = vadd.f32 %v3646_v54, %v2982_v62 }
 0x9e5   :  { %v3666_v1 = vpop.f32.mrb[60].mxu0  ;;  %v3688_v3 = vpop.f32.mrb[60].mxu1 }
 0x9e6   :  { %v3667_v23 = vpop.f32.mrb[61].mxu0  ;;  %v3689_v4 = vpop.f32.mrb[61].mxu1 }
 0x9e7   :  { %v3668_v60 = vadd.f32 %v3667_v23, %v3666_v1  ;;  %v3690_v61 = vadd.f32 %v3689_v4, %v3688_v3  ;;  %v3669_v12 = vpop.f32.mrb[62].mxu0  ;;  %v3691_v5 = vpop.f32.mrb[62].mxu1 }
 0x9e8   :  { %v3670_v6 = vpop.f32.mrb[63].mxu0  ;;  %v3692_v7 = vpop.f32.mrb[63].mxu1 }
 0x9e9   :  { %v3062_v8 = vadd.f32 %v3668_v60, %v3022_v63 }
 0x9eb   :  { %v3102_v9 = vadd.f32 %v3690_v61, %v3062_v8 }
 0xa05   :  { %v3710_v10 = vpop.f32.mrb[64].mxu0  ;;  %v3732_v22 = vpop.f32.mrb[64].mxu1 }
 0xa06   :  { %v3711_v11 = vpop.f32.mrb[65].mxu0  ;;  %v3733_v15 = vpop.f32.mrb[65].mxu1 }
 0xa07   :  { %v3712_v16 = vadd.f32 %v3711_v11, %v3710_v10  ;;  %v3734_v17 = vadd.f32 %v3733_v15, %v3732_v22  ;;  %v3713_v19 = vpop.f32.mrb[66].mxu0  ;;  %v3735_v20 = vpop.f32.mrb[66].mxu1 }
 0xa08   :  { %v3714_v21 = vpop.f32.mrb[67].mxu0  ;;  %v3736_v34 = vpop.f32.mrb[67].mxu1 }
 0xa09   :  { %v3142_v24 = vadd.f32 %v3712_v16, %v3102_v9 }
 0xa0b   :  { %v3182_v26 = vadd.f32 %v3734_v17, %v3142_v24 }
 0xa0d   :  { %v3191_v29 = vmul.f32 %v3190_v13, %v3182_v26 }
 0xa0f   :  { %v3196_v32 = vadd.f32 %v3195_v28, %v3191_v29 }
 0xa11   :  { %v3197_v33 = vadd.f32 %v3196_v32, %v4287_v27  ;;  %v3840_v27 = vld [vmem:[#allocation9 + $0x20] sm:$0xff]  }
 0xa12   :  { %3796 = vmatpush3.bf16.msra.mxu0 %v3840_v27 }
 0xa13   :  { %3198 = vadd.xlane.f32.xlu0 %v3197_v33  ;;  %3797 = vmatprep.subr.bf16.mxu0 %v3980_v0 }
 0xa16   :  { %3798 = vmatpush3.bf16.msra.mxu0 %v3841_v14 }
 0xa17   :  { %3799 = vmatprep.subr.bf16.mxu0 %v3980_v0 }
 0xa1a   :  { %3800 = vmatpush3.bf16.msra.mxu0 %v3842_v39 }
 0xa1b   :  { %3801 = vmatprep.subr.bf16.mxu0 %v3980_v0 }
 0xa1e   :  { %3802 = vmatpush3.bf16.msra.mxu0 %v3843_v40 }
 0xaa0   :  { %v3199_v36 = vpop.xlane.xlu0 %3198 }
 0xaa1   :  { %v3200_v2 = vmul.f32 0.0078125, %v3199_v36 }
 0xaa3   :  { %v3201_v37 = vsub.f32 %v3197_v33, %v3200_v2 }
 0xaa5   :  { %v3202_v58 = vmul.f32 %v3201_v37, %v3201_v37 }
 0xaa7   :  { %3203 = vadd.xlane.f32.xlu1 %v3202_v58 }
 0xb34   :  { %v3204_v41 = vpop.xlane.xlu1 %3203 }
 0xb35   :  { %v3205_v42 = vmul.f32 0.0078125, %v3204_v41 }
 0xb37   :  { %v3206_v43 = vadd.f32 1e-05, %v3205_v42 }
 0xb39   :  { %3850 = vrsqrt.f32 %v3206_v43 }
 0xb43   :  { %v3851_v44 = vpop.eup %3850 }
 0xb44   :  { %v3208_v45 = vmul.f32 %v3851_v44, %v3201_v37 }
 0xb46   :  { %v3213_v31 = vmul.f32 %v3212_v18, %v3208_v45 }
 0xb48   :  { %v3218_v49 = vadd.f32 %v3217_v46, %v3213_v31 }
 0xb4a   :  { %v3219_v50 = vpack.c.bf16 %v3218_v49, %v3218_v49 }
 0xb4c   :  { %3804 = vmatmul.mubr.bf16.vlgmr.msra.gmra.mrb[68].mxu0 %v3219_v50 }
 0xc1f   :  { %v3325_v0 = vpop.f32.mrb[68].mxu0 }
 0xc20   :  { %v3326_v52 = vadd.f32 %v3359_v51, %v3325_v0  ;;  %v3805_v54 = vpop.f32.mrb[69].mxu0 }
 0xc21   :  { %v3328_v56 = vpop.f32.mrb[70].mxu0 }
 0xc22   :  { %3331 = vst [vmem:[%s4420_s8] sm:$0xff] %v3326_v52  ;;  %v3806_v57 = vpop.f32.mrb[71].mxu0 }
 0xc23   :  { %3336 = vsyncpa [#allocation3], 1 }
 0xc24   :  { %3337 = vsyncpa [#allocation5], 1 }
 0xc25   :  { %3338 = vsyncpa [#allocation8], 1 }

</bundles_post_ra>
